<compile_context>
chip_gen: v7x
topology: tpu7x:2x2x1
jax: 0.10.0
libtpu: 0.0.40
codegen_flags: <defaults>
</compile_context>

<pallas_src>
import functools

import jax
import jax.numpy as jnp
from jax.experimental import pallas as pl
from jax.experimental.pallas import tpu as pltpu

EPS = 1e-5          # torch.nn.LayerNorm default eps
NEG_INF = -1e30     # softmax mask value (exp underflows to exactly 0.0)


# ---------------------------------------------------------------------------
# Helpers (used both inside the kernel and by the pure-JAX reference)
# ---------------------------------------------------------------------------
def _layernorm(x, gamma, beta):
    mu = jnp.mean(x, axis=-1, keepdims=True)
    var = jnp.mean((x - mu) ** 2, axis=-1, keepdims=True)
    return (x - mu) * jax.lax.rsqrt(var + EPS) * gamma + beta


def _mm(a, b):
    return jnp.dot(a, b, preferred_element_type=jnp.float32)


# ---------------------------------------------------------------------------
# Fused whole-stack kernel: one grid step == one batch element through all
# layers.  Activation slab stays resident in VMEM/vregs for the whole stack.
# ---------------------------------------------------------------------------
def _msa_stack_kernel(
        x_ref, rmask_ref, cmask_ref,
        ln1r_g, ln1r_b, wvg_r, bg_r, wo_r, bo_r, ln2r_g, ln2r_b,
        ln1c_g, ln1c_b, wqkvg_c, bg_c, wo_c, bo_c, ln2c_g, ln2c_b,
        lno_g, lno_b,
        o_ref, *, num_layers, heads, dim_head):
    _, M, D = x_ref.shape                      # M = R*C flat positions
    inner = heads * dim_head
    scale = dim_head ** (-0.5)

    act = x_ref[...].reshape(M, D)             # (M, D) activation slab
    rmask = rmask_ref[...]                     # (M, M) f32: 1 iff same MSA row
    cmask = cmask_ref[...] > 0.5               # (M, M) bool: same column

    for l in range(num_layers):                # static unroll over layers
        resid = act                            # CoreModel outer residual

        # ---------------- Row axial attention (tied=True) ------------------
        xn = _layernorm(act, ln1r_g[l], ln1r_b[l])          # AxialAttention.norm
        vg = _mm(xn, wvg_r[l])                               # fused V|G proj
        v = vg[:, :inner]
        gates = vg[:, inner:] + bg_r[l]
        # tied attention weights are identically 1 (see header derivation):
        # out[p] = sum of v over positions sharing p's MSA row.
        vsum = _mm(rmask, v)                                 # (M, inner)
        row_out = vsum * jax.nn.sigmoid(gates)
        row_out = _mm(row_out, wo_r[l]) + bo_r[l]            # to_out
        y_row = _layernorm(xn + row_out, ln2r_g[l], ln2r_b[l])   # x + out; Attention.norm

        # ---------------- Column axial attention (tied=False) --------------
        xn2 = _layernorm(y_row, ln1c_g[l], ln1c_b[l])        # AxialAttention.norm
        qkvg = _mm(xn2, wqkvg_c[l])                          # fused Q|K|V|G proj
        q = qkvg[:, :inner] * scale
        k = qkvg[:, inner:2 * inner]
        vv = qkvg[:, 2 * inner:3 * inner]
        g2 = qkvg[:, 3 * inner:] + bg_c[l]

        wo_l = wo_c[l]                                       # (inner, D)
        col_out = jnp.zeros((M, D), jnp.float32)
        for h in range(heads):                               # static, H=2
            sl = slice(h * dim_head, (h + 1) * dim_head)
            s = jnp.einsum('id,jd->ij', q[:, sl], k[:, sl],
                           preferred_element_type=jnp.float32)   # (M, M) scores
            s = jnp.where(cmask, s, NEG_INF)                 # keep same-column pairs
            s = s - jnp.max(s, axis=-1, keepdims=True)
            e = jnp.exp(s)
            attn = e / jnp.sum(e, axis=-1, keepdims=True)    # exact softmax
            oh = _mm(attn, vv[:, sl]) * jax.nn.sigmoid(g2[:, sl])   # gated head out
            col_out = col_out + _mm(oh, wo_l[sl, :])         # accumulate into to_out
        col_out = col_out + bo_c[l]
        y_col = _layernorm(xn2 + col_out, ln2c_g[l], ln2c_b[l])  # x + out; Attention.norm

        # ---------------- CoreModel outer residual + LayerNorm -------------
        act = _layernorm(y_col + resid, lno_g[l], lno_b[l])

    o_ref[...] = act.reshape(1, M, D)


# ---------------------------------------------------------------------------
# Forward wrapper: embedding gather (XLA) + single pallas_call.
# ---------------------------------------------------------------------------
@functools.partial(jax.jit, static_argnames=("heads", "dim_head"))
def core_model_forward(sequences, packed, *, heads, dim_head):
    B, R, C = sequences.shape
    emb = packed["embedding"]
    D = emb.shape[-1]
    L = packed["lno_g"].shape[0]
    M = R * C

    # Embedding gather stays in XLA (data-dependent gather; slab is tiny).
    x = jnp.take(emb, sequences, axis=0)                 # (B, R, C, D)
    x2 = x.reshape(B, M, D).astype(jnp.float32)

    # Axial-fold masks over the flat position axis p = r*C + c (constant-folded
    # under jit): same-row for tied row attention, same-column for col attention.
    p = jnp.arange(M, dtype=jnp.int32)
    row_id = p // C
    col_id = p % C
    rmask = (row_id[:, None] == row_id[None, :]).astype(jnp.float32)
    cmask = (col_id[:, None] == col_id[None, :]).astype(jnp.float32)

    def cspec(shape):
        zero = (0,) * len(shape)
        return pl.BlockSpec(shape, lambda b, _z=zero: _z)

    blk = pl.BlockSpec((1, M, D), lambda b: (b, 0, 0))

    weight_names = ["ln1r_g", "ln1r_b", "wvg_r", "bg_r", "wo_r", "bo_r",
                    "ln2r_g", "ln2r_b",
                    "ln1c_g", "ln1c_b", "wqkvg_c", "bg_c", "wo_c", "bo_c",
                    "ln2c_g", "ln2c_b", "lno_g", "lno_b"]
    weights = [packed[n] for n in weight_names]

    kernel = functools.partial(_msa_stack_kernel, num_layers=L,
                               heads=heads, dim_head=dim_head)
    out = pl.pallas_call(
        kernel,
        out_shape=jax.ShapeDtypeStruct((B, M, D), jnp.float32),
        grid=(B,),
        in_specs=[blk, cspec((M, M)), cspec((M, M))]
                 + [cspec(w.shape) for w in weights],
        out_specs=blk,
        compiler_params=pltpu.CompilerParams(dimension_semantics=("parallel",)),
    )(x2, rmask, cmask, *weights)
    return out.reshape(B, R, C, D)


# ---------------------------------------------------------------------------
# Parameter construction (mirrors the PyTorch module's structure/inits) and
# packing into the fused/stacked form consumed by the kernel.
# ---------------------------------------------------------------------------
def init_attention_params(key, dim, heads, dim_head):
    inner = heads * dim_head
    ks = jax.random.split(key, 4)
    s = 0.05
    return {
        "ln1_g": jnp.ones((dim,), jnp.float32),          # AxialAttention.norm
        "ln1_b": jnp.zeros((dim,), jnp.float32),
        "wq": (jax.random.normal(ks[0], (dim, inner)) * s).astype(jnp.float32),
        "wkv": (jax.random.normal(ks[1], (dim, 2 * inner)) * s).astype(jnp.float32),
        "wo": (jax.random.normal(ks[2], (inner, dim)) * s).astype(jnp.float32),
        "bo": (jax.random.normal(ks[3], (dim,)) * s).astype(jnp.float32),
        "wg": jnp.zeros((dim, inner), jnp.float32),      # nn.init.constant_(w, 0)
        "bg": jnp.ones((inner,), jnp.float32),           # nn.init.constant_(b, 1)
        "ln2_g": jnp.ones((dim,), jnp.float32),          # Attention.norm
        "ln2_b": jnp.zeros((dim,), jnp.float32),
    }


def init_core_model_params(key, vocab_size, embed_dim, heads, dim_head, num_layers):
    keys = jax.random.split(key, 1 + 2 * num_layers)
    emb = (jax.random.normal(keys[0], (vocab_size, embed_dim)) * 0.1).astype(jnp.float32)
    emb = emb.at[0].set(0.0)                              # padding_idx=0
    layers = []
    for l in range(num_layers):
        layers.append({
            "row": init_attention_params(keys[1 + 2 * l], embed_dim, heads, dim_head),
            "col": init_attention_params(keys[2 + 2 * l], embed_dim, heads, dim_head),
            "ln_g": jnp.ones((embed_dim,), jnp.float32),  # CoreModel.norm_layers[l]
            "ln_b": jnp.zeros((embed_dim,), jnp.float32),
        })
    return {"embedding": emb, "layers": layers}


def pack_core_model_params(params, *, heads, dim_head):
    """Fuse shared-LHS projections and stack per-layer weights on a leading
    layer axis (done once, outside the per-call path)."""
    layers = params["layers"]
    D = params["embedding"].shape[-1]
    inner = heads * dim_head

    def stack(fn):
        return jnp.stack([fn(l) for l in layers], axis=0)

    return {
        "embedding": params["embedding"],
        # row attention (tied): only the V half of to_kv is live; fuse V|G.
        "ln1r_g": stack(lambda l: l["row"]["ln1_g"].reshape(1, D)),
        "ln1r_b": stack(lambda l: l["row"]["ln1_b"].reshape(1, D)),
        "wvg_r":  stack(lambda l: jnp.concatenate(
            [l["row"]["wkv"][:, inner:], l["row"]["wg"]], axis=1)),
        "bg_r":   stack(lambda l: l["row"]["bg"].reshape(1, inner)),
        "wo_r":   stack(lambda l: l["row"]["wo"]),
        "bo_r":   stack(lambda l: l["row"]["bo"].reshape(1, D)),
        "ln2r_g": stack(lambda l: l["row"]["ln2_g"].reshape(1, D)),
        "ln2r_b": stack(lambda l: l["row"]["ln2_b"].reshape(1, D)),
        # column attention: fuse Q|K|V|G into one (D, 4*inner) projection.
        "ln1c_g": stack(lambda l: l["col"]["ln1_g"].reshape(1, D)),
        "ln1c_b": stack(lambda l: l["col"]["ln1_b"].reshape(1, D)),
        "wqkvg_c": stack(lambda l: jnp.concatenate(
            [l["col"]["wq"], l["col"]["wkv"], l["col"]["wg"]], axis=1)),
        "bg_c":   stack(lambda l: l["col"]["bg"].reshape(1, inner)),
        "wo_c":   stack(lambda l: l["col"]["wo"]),
        "bo_c":   stack(lambda l: l["col"]["bo"].reshape(1, D)),
        "ln2c_g": stack(lambda l: l["col"]["ln2_g"].reshape(1, D)),
        "ln2c_b": stack(lambda l: l["col"]["ln2_b"].reshape(1, D)),
        # CoreModel.norm_layers
        "lno_g":  stack(lambda l: l["ln_g"].reshape(1, D)),
        "lno_b":  stack(lambda l: l["ln_b"].reshape(1, D)),
    }


# ---------------------------------------------------------------------------
# Pure-JAX reference (mirrors the PyTorch module op-for-op, with explicit
# folds/transposes and per-column softmax) used to validate the kernel.
# ---------------------------------------------------------------------------
def _mmr(a, b):
    return jnp.dot(a, b, precision=jax.lax.Precision.HIGHEST,
                   preferred_element_type=jnp.float32)


def _attention_ref(x, p, *, heads, dim_head, tied):
    BN, N, D = x.shape
    inner = heads * dim_head
    scale = dim_head ** (-0.5)
    q = _mmr(x, p["wq"])
    kv = _mmr(x, p["wkv"])
    k, v = kv[..., :inner], kv[..., inner:]

    def split(t):
        return jnp.transpose(t.reshape(BN, N, heads, dim_head), (0, 2, 1, 3))

    q, k, v = split(q) * scale, split(k), split(v)
    if tied:
        # dots is overwritten by the (b,h,i,1) row-average; softmax over the
        # singleton axis is all ones -> out[i] = sum_j v[j].
        out = jnp.broadcast_to(jnp.sum(v, axis=2, keepdims=True), v.shape)
    else:
        dots = jnp.einsum('bhid,bhjd->bhij', q, k,
                          precision=jax.lax.Precision.HIGHEST)
        attn = jax.nn.softmax(dots, axis=-1)
        out = jnp.einsum('bhij,bhjd->bhid', attn, v,
                         precision=jax.lax.Precision.HIGHEST)
    out = jnp.transpose(out, (0, 2, 1, 3)).reshape(BN, N, inner)
    gates = _mmr(x, p["wg"]) + p["bg"]
    out = out * jax.nn.sigmoid(gates)
    out = _mmr(out, p["wo"]) + p["bo"]
    out = x + out
    return _layernorm(out, p["ln2_g"], p["ln2_b"])


def _axial_ref(x, p, *, heads, dim_head, row_attn):
    B, R, C, D = x.shape
    xn = _layernorm(x, p["ln1_g"], p["ln1_b"])
    if row_attn:
        xf = xn.reshape(B * R, C, D)
        out = _attention_ref(xf, p, heads=heads, dim_head=dim_head, tied=True)
        return out.reshape(B, R, C, D)
    xf = jnp.transpose(xn, (0, 2, 1, 3)).reshape(B * C, R, D)
    out = _attention_ref(xf, p, heads=heads, dim_head=dim_head, tied=False)
    return jnp.transpose(out.reshape(B, C, R, D), (0, 2, 1, 3))


def core_model_reference(sequences, params, *, heads, dim_head):
    x = jnp.take(params["embedding"], sequences, axis=0)
    for layer in params["layers"]:
        resid = x
        x = _axial_ref(x, layer["row"], heads=heads, dim_head=dim_head, row_attn=True)
        x = _axial_ref(x, layer["col"], heads=heads, dim_head=dim_head, row_attn=False)
        x = _layernorm(x + resid, layer["ln_g"], layer["ln_b"])
    return x


# ---------------------------------------------------------------------------
if __name__ == "__main__":
    VOCAB = 12
    B, R, C = 2, 4, 8              # batch, MSA rows, sequence length
    EMBED_DIM = 32
    HEADS = 2
    DIM_HEAD = 64                  # Attention's default (module hardcodes it)
    NUM_LAYERS = 2

    key = jax.random.PRNGKey(0)
    k_seq, k_par = jax.random.split(key)
    sequences = jax.random.randint(k_seq, (B, R, C), 0, VOCAB, dtype=jnp.int32)
    params = init_core_model_params(k_par, VOCAB, EMBED_DIM, HEADS, DIM_HEAD, NUM_LAYERS)
    packed = pack_core_model_params(params, heads=HEADS, dim_head=DIM_HEAD)

    out = jax.block_until_ready(
        core_model_forward(sequences, packed, heads=HEADS, dim_head=DIM_HEAD))

    assert out.shape == (B, R, C, EMBED_DIM), out.shape
    assert bool(jnp.all(jnp.isfinite(out)))

    # Validate against the op-for-op pure-JAX reference (loose tolerance to
    # absorb matmul-precision / accumulation-order differences only).
    ref = core_model_reference(sequences, params, heads=HEADS, dim_head=DIM_HEAD)
    max_err = float(jnp.max(jnp.abs(out - ref)))
    assert max_err < 3e-2, f"kernel/reference mismatch: max abs err {max_err}"

    print("KERNEL_OK")
</pallas_src>

<mosaic_0001>
module attributes {stable_mosaic.version = 11 : i64} {
  func.func @_msa_stack_kernel(%arg0: i32, %arg1: memref<1x32x32xf32, #tpu.memory_space<vmem>>, %arg2: memref<32x32xf32, #tpu.memory_space<vmem>>, %arg3: memref<32x32xf32, #tpu.memory_space<vmem>>, %arg4: memref<2x1x32xf32, #tpu.memory_space<vmem>>, %arg5: memref<2x1x32xf32, #tpu.memory_space<vmem>>, %arg6: memref<2x32x256xf32, #tpu.memory_space<vmem>>, %arg7: memref<2x1x128xf32, #tpu.memory_space<vmem>>, %arg8: memref<2x128x32xf32, #tpu.memory_space<vmem>>, %arg9: memref<2x1x32xf32, #tpu.memory_space<vmem>>, %arg10: memref<2x1x32xf32, #tpu.memory_space<vmem>>, %arg11: memref<2x1x32xf32, #tpu.memory_space<vmem>>, %arg12: memref<2x1x32xf32, #tpu.memory_space<vmem>>, %arg13: memref<2x1x32xf32, #tpu.memory_space<vmem>>, %arg14: memref<2x32x512xf32, #tpu.memory_space<vmem>>, %arg15: memref<2x1x128xf32, #tpu.memory_space<vmem>>, %arg16: memref<2x128x32xf32, #tpu.memory_space<vmem>>, %arg17: memref<2x1x32xf32, #tpu.memory_space<vmem>>, %arg18: memref<2x1x32xf32, #tpu.memory_space<vmem>>, %arg19: memref<2x1x32xf32, #tpu.memory_space<vmem>>, %arg20: memref<2x1x32xf32, #tpu.memory_space<vmem>>, %arg21: memref<2x1x32xf32, #tpu.memory_space<vmem>>, %arg22: memref<1x32x32xf32, #tpu.memory_space<vmem>>) attributes {dimension_semantics = [#tpu.dimension_semantics<parallel>], iteration_bounds = array<i64: 2>, scalar_prefetch = 0 : i64, scratch_operands = 0 : i64, tpu.core_type = #tpu.core_type<tc>, window_params = [{transform_indices = @transform_0, window_bounds = array<i64: 1, 32, 32>}, {pipeline_mode = #tpu.pipeline_mode<synchronous>, transform_indices = @transform_1, window_bounds = array<i64: 32, 32>}, {pipeline_mode = #tpu.pipeline_mode<synchronous>, transform_indices = @transform_2, window_bounds = array<i64: 32, 32>}, {pipeline_mode = #tpu.pipeline_mode<synchronous>, transform_indices = @transform_3, window_bounds = array<i64: 2, 1, 32>}, {pipeline_mode = #tpu.pipeline_mode<synchronous>, transform_indices = @transform_4, window_bounds = array<i64: 2, 1, 32>}, {pipeline_mode = #tpu.pipeline_mode<synchronous>, transform_indices = @transform_5, window_bounds = array<i64: 2, 32, 256>}, {pipeline_mode = #tpu.pipeline_mode<synchronous>, transform_indices = @transform_6, window_bounds = array<i64: 2, 1, 128>}, {pipeline_mode = #tpu.pipeline_mode<synchronous>, transform_indices = @transform_7, window_bounds = array<i64: 2, 128, 32>}, {pipeline_mode = #tpu.pipeline_mode<synchronous>, transform_indices = @transform_8, window_bounds = array<i64: 2, 1, 32>}, {pipeline_mode = #tpu.pipeline_mode<synchronous>, transform_indices = @transform_9, window_bounds = array<i64: 2, 1, 32>}, {pipeline_mode = #tpu.pipeline_mode<synchronous>, transform_indices = @transform_10, window_bounds = array<i64: 2, 1, 32>}, {pipeline_mode = #tpu.pipeline_mode<synchronous>, transform_indices = @transform_11, window_bounds = array<i64: 2, 1, 32>}, {pipeline_mode = #tpu.pipeline_mode<synchronous>, transform_indices = @transform_12, window_bounds = array<i64: 2, 1, 32>}, {pipeline_mode = #tpu.pipeline_mode<synchronous>, transform_indices = @transform_13, window_bounds = array<i64: 2, 32, 512>}, {pipeline_mode = #tpu.pipeline_mode<synchronous>, transform_indices = @transform_14, window_bounds = array<i64: 2, 1, 128>}, {pipeline_mode = #tpu.pipeline_mode<synchronous>, transform_indices = @transform_15, window_bounds = array<i64: 2, 128, 32>}, {pipeline_mode = #tpu.pipeline_mode<synchronous>, transform_indices = @transform_16, window_bounds = array<i64: 2, 1, 32>}, {pipeline_mode = #tpu.pipeline_mode<synchronous>, transform_indices = @transform_17, window_bounds = array<i64: 2, 1, 32>}, {pipeline_mode = #tpu.pipeline_mode<synchronous>, transform_indices = @transform_18, window_bounds = array<i64: 2, 1, 32>}, {pipeline_mode = #tpu.pipeline_mode<synchronous>, transform_indices = @transform_19, window_bounds = array<i64: 2, 1, 32>}, {pipeline_mode = #tpu.pipeline_mode<synchronous>, transform_indices = @transform_20, window_bounds = array<i64: 2, 1, 32>}, {transform_indices = @transform_21, window_bounds = array<i64: 1, 32, 32>}]} {
    %c0 = arith.constant 0 : index
    %c0_0 = arith.constant 0 : index
    %c0_1 = arith.constant 0 : index
    %0 = vector.load %arg1[%c0, %c0_0, %c0_1] : memref<1x32x32xf32, #tpu.memory_space<vmem>>, vector<1x32x32xf32>
    %1 = vector.shape_cast %0 : vector<1x32x32xf32> to vector<32x32xf32>
    %c0_2 = arith.constant 0 : index
    %c0_3 = arith.constant 0 : index
    %2 = vector.load %arg2[%c0_2, %c0_3] : memref<32x32xf32, #tpu.memory_space<vmem>>, vector<32x32xf32>
    %c0_4 = arith.constant 0 : index
    %c0_5 = arith.constant 0 : index
    %3 = vector.load %arg3[%c0_4, %c0_5] : memref<32x32xf32, #tpu.memory_space<vmem>>, vector<32x32xf32>
    %cst = arith.constant 5.000000e-01 : f32
    %4 = vector.broadcast %cst : f32 to vector<32x32xf32>
    %5 = arith.cmpf ogt, %3, %4 : vector<32x32xf32>
    %c0_6 = arith.constant 0 : index
    %c0_7 = arith.constant 0 : index
    %c0_8 = arith.constant 0 : index
    %6 = vector.load %arg4[%c0_6, %c0_7, %c0_8] : memref<2x1x32xf32, #tpu.memory_space<vmem>>, vector<1x1x32xf32>
    %7 = vector.shape_cast %6 : vector<1x1x32xf32> to vector<1x32xf32>
    %c0_9 = arith.constant 0 : index
    %c0_10 = arith.constant 0 : index
    %c0_11 = arith.constant 0 : index
    %8 = vector.load %arg5[%c0_9, %c0_10, %c0_11] : memref<2x1x32xf32, #tpu.memory_space<vmem>>, vector<1x1x32xf32>
    %9 = vector.shape_cast %8 : vector<1x1x32xf32> to vector<1x32xf32>
    %cst_12 = arith.constant dense<0.000000e+00> : vector<32xf32>
    %10 = vector.multi_reduction <add>, %1, %cst_12 [1] : vector<32x32xf32> to vector<32xf32>
    %11 = vector.shape_cast %10 : vector<32xf32> to vector<32x1xf32>
    %cst_13 = arith.constant 3.200000e+01 : f32
    %12 = vector.broadcast %cst_13 : f32 to vector<32x1xf32>
    %13 = arith.divf %11, %12 : vector<32x1xf32>
    %14 = vector.broadcast %13 : vector<32x1xf32> to vector<32x32xf32>
    %15 = arith.subf %1, %14 : vector<32x32xf32>
    %16 = arith.mulf %15, %15 : vector<32x32xf32>
    %cst_14 = arith.constant dense<0.000000e+00> : vector<32xf32>
    %17 = vector.multi_reduction <add>, %16, %cst_14 [1] : vector<32x32xf32> to vector<32xf32>
    %18 = vector.shape_cast %17 : vector<32xf32> to vector<32x1xf32>
    %cst_15 = arith.constant 3.200000e+01 : f32
    %19 = vector.broadcast %cst_15 : f32 to vector<32x1xf32>
    %20 = arith.divf %18, %19 : vector<32x1xf32>
    %21 = vector.broadcast %13 : vector<32x1xf32> to vector<32x32xf32>
    %22 = arith.subf %1, %21 : vector<32x32xf32>
    %cst_16 = arith.constant 9.99999974E-6 : f32
    %23 = vector.broadcast %cst_16 : f32 to vector<32x1xf32>
    %24 = arith.addf %20, %23 : vector<32x1xf32>
    %25 = math.rsqrt %24 : vector<32x1xf32>
    %26 = vector.broadcast %25 : vector<32x1xf32> to vector<32x32xf32>
    %27 = arith.mulf %22, %26 : vector<32x32xf32>
    %28 = vector.broadcast %7 : vector<1x32xf32> to vector<32x32xf32>
    %29 = arith.mulf %27, %28 : vector<32x32xf32>
    %30 = vector.broadcast %9 : vector<1x32xf32> to vector<32x32xf32>
    %31 = arith.addf %29, %30 : vector<32x32xf32>
    %c0_17 = arith.constant 0 : index
    %c0_18 = arith.constant 0 : index
    %c0_19 = arith.constant 0 : index
    %32 = vector.load %arg6[%c0_17, %c0_18, %c0_19] : memref<2x32x256xf32, #tpu.memory_space<vmem>>, vector<1x32x256xf32>
    %33 = vector.shape_cast %32 : vector<1x32x256xf32> to vector<32x256xf32>
    %cst_20 = arith.constant dense<0.000000e+00> : vector<32x256xf32>
    %34 = tpu.matmul %31, %33, %cst_20 {dimension_numbers = #tpu.dot_dimension_numbers<[1], [0], [0], [1], [0, 0, 1, 1], [], []>} : vector<32x32xf32>, vector<32x256xf32>, vector<32x256xf32> -> vector<32x256xf32>
    %35 = vector.extract_strided_slice %34 {offsets = [0, 0], sizes = [32, 128], strides = [1, 1]} : vector<32x256xf32> to vector<32x128xf32>
    %36 = vector.extract_strided_slice %34 {offsets = [0, 128], sizes = [32, 128], strides = [1, 1]} : vector<32x256xf32> to vector<32x128xf32>
    %c0_21 = arith.constant 0 : index
    %c0_22 = arith.constant 0 : index
    %c0_23 = arith.constant 0 : index
    %37 = vector.load %arg7[%c0_21, %c0_22, %c0_23] : memref<2x1x128xf32, #tpu.memory_space<vmem>>, vector<1x1x128xf32>
    %38 = vector.shape_cast %37 : vector<1x1x128xf32> to vector<1x128xf32>
    %39 = vector.broadcast %38 : vector<1x128xf32> to vector<32x128xf32>
    %40 = arith.addf %36, %39 : vector<32x128xf32>
    %cst_24 = arith.constant dense<0.000000e+00> : vector<32x128xf32>
    %41 = tpu.matmul %2, %35, %cst_24 {dimension_numbers = #tpu.dot_dimension_numbers<[1], [0], [0], [1], [0, 0, 1, 1], [], []>} : vector<32x32xf32>, vector<32x128xf32>, vector<32x128xf32> -> vector<32x128xf32>
    %42 = arith.negf %40 : vector<32x128xf32>
    %43 = math.exp %42 : vector<32x128xf32>
    %cst_25 = arith.constant 1.000000e+00 : f32
    %44 = vector.broadcast %cst_25 : f32 to vector<32x128xf32>
    %45 = arith.addf %44, %43 : vector<32x128xf32>
    %46 = arith.divf %44, %45 : vector<32x128xf32>
    %47 = arith.mulf %41, %46 : vector<32x128xf32>
    %c0_26 = arith.constant 0 : index
    %c0_27 = arith.constant 0 : index
    %c0_28 = arith.constant 0 : index
    %48 = vector.load %arg8[%c0_26, %c0_27, %c0_28] : memref<2x128x32xf32, #tpu.memory_space<vmem>>, vector<1x128x32xf32>
    %49 = vector.shape_cast %48 : vector<1x128x32xf32> to vector<128x32xf32>
    %cst_29 = arith.constant dense<0.000000e+00> : vector<32x32xf32>
    %50 = tpu.matmul %47, %49, %cst_29 {dimension_numbers = #tpu.dot_dimension_numbers<[1], [0], [0], [1], [0, 0, 1, 1], [], []>} : vector<32x128xf32>, vector<128x32xf32>, vector<32x32xf32> -> vector<32x32xf32>
    %c0_30 = arith.constant 0 : index
    %c0_31 = arith.constant 0 : index
    %c0_32 = arith.constant 0 : index
    %51 = vector.load %arg9[%c0_30, %c0_31, %c0_32] : memref<2x1x32xf32, #tpu.memory_space<vmem>>, vector<1x1x32xf32>
    %52 = vector.shape_cast %51 : vector<1x1x32xf32> to vector<1x32xf32>
    %53 = vector.broadcast %52 : vector<1x32xf32> to vector<32x32xf32>
    %54 = arith.addf %50, %53 : vector<32x32xf32>
    %55 = arith.addf %31, %54 : vector<32x32xf32>
    %c0_33 = arith.constant 0 : index
    %c0_34 = arith.constant 0 : index
    %c0_35 = arith.constant 0 : index
    %56 = vector.load %arg10[%c0_33, %c0_34, %c0_35] : memref<2x1x32xf32, #tpu.memory_space<vmem>>, vector<1x1x32xf32>
    %57 = vector.shape_cast %56 : vector<1x1x32xf32> to vector<1x32xf32>
    %c0_36 = arith.constant 0 : index
    %c0_37 = arith.constant 0 : index
    %c0_38 = arith.constant 0 : index
    %58 = vector.load %arg11[%c0_36, %c0_37, %c0_38] : memref<2x1x32xf32, #tpu.memory_space<vmem>>, vector<1x1x32xf32>
    %59 = vector.shape_cast %58 : vector<1x1x32xf32> to vector<1x32xf32>
    %cst_39 = arith.constant dense<0.000000e+00> : vector<32xf32>
    %60 = vector.multi_reduction <add>, %55, %cst_39 [1] : vector<32x32xf32> to vector<32xf32>
    %61 = vector.shape_cast %60 : vector<32xf32> to vector<32x1xf32>
    %cst_40 = arith.constant 3.200000e+01 : f32
    %62 = vector.broadcast %cst_40 : f32 to vector<32x1xf32>
    %63 = arith.divf %61, %62 : vector<32x1xf32>
    %64 = vector.broadcast %63 : vector<32x1xf32> to vector<32x32xf32>
    %65 = arith.subf %55, %64 : vector<32x32xf32>
    %66 = arith.mulf %65, %65 : vector<32x32xf32>
    %cst_41 = arith.constant dense<0.000000e+00> : vector<32xf32>
    %67 = vector.multi_reduction <add>, %66, %cst_41 [1] : vector<32x32xf32> to vector<32xf32>
    %68 = vector.shape_cast %67 : vector<32xf32> to vector<32x1xf32>
    %cst_42 = arith.constant 3.200000e+01 : f32
    %69 = vector.broadcast %cst_42 : f32 to vector<32x1xf32>
    %70 = arith.divf %68, %69 : vector<32x1xf32>
    %71 = vector.broadcast %63 : vector<32x1xf32> to vector<32x32xf32>
    %72 = arith.subf %55, %71 : vector<32x32xf32>
    %cst_43 = arith.constant 9.99999974E-6 : f32
    %73 = vector.broadcast %cst_43 : f32 to vector<32x1xf32>
    %74 = arith.addf %70, %73 : vector<32x1xf32>
    %75 = math.rsqrt %74 : vector<32x1xf32>
    %76 = vector.broadcast %75 : vector<32x1xf32> to vector<32x32xf32>
    %77 = arith.mulf %72, %76 : vector<32x32xf32>
    %78 = vector.broadcast %57 : vector<1x32xf32> to vector<32x32xf32>
    %79 = arith.mulf %77, %78 : vector<32x32xf32>
    %80 = vector.broadcast %59 : vector<1x32xf32> to vector<32x32xf32>
    %81 = arith.addf %79, %80 : vector<32x32xf32>
    %c0_44 = arith.constant 0 : index
    %c0_45 = arith.constant 0 : index
    %c0_46 = arith.constant 0 : index
    %82 = vector.load %arg12[%c0_44, %c0_45, %c0_46] : memref<2x1x32xf32, #tpu.memory_space<vmem>>, vector<1x1x32xf32>
    %83 = vector.shape_cast %82 : vector<1x1x32xf32> to vector<1x32xf32>
    %c0_47 = arith.constant 0 : index
    %c0_48 = arith.constant 0 : index
    %c0_49 = arith.constant 0 : index
    %84 = vector.load %arg13[%c0_47, %c0_48, %c0_49] : memref<2x1x32xf32, #tpu.memory_space<vmem>>, vector<1x1x32xf32>
    %85 = vector.shape_cast %84 : vector<1x1x32xf32> to vector<1x32xf32>
    %cst_50 = arith.constant dense<0.000000e+00> : vector<32xf32>
    %86 = vector.multi_reduction <add>, %81, %cst_50 [1] : vector<32x32xf32> to vector<32xf32>
    %87 = vector.shape_cast %86 : vector<32xf32> to vector<32x1xf32>
    %cst_51 = arith.constant 3.200000e+01 : f32
    %88 = vector.broadcast %cst_51 : f32 to vector<32x1xf32>
    %89 = arith.divf %87, %88 : vector<32x1xf32>
    %90 = vector.broadcast %89 : vector<32x1xf32> to vector<32x32xf32>
    %91 = arith.subf %81, %90 : vector<32x32xf32>
    %92 = arith.mulf %91, %91 : vector<32x32xf32>
    %cst_52 = arith.constant dense<0.000000e+00> : vector<32xf32>
    %93 = vector.multi_reduction <add>, %92, %cst_52 [1] : vector<32x32xf32> to vector<32xf32>
    %94 = vector.shape_cast %93 : vector<32xf32> to vector<32x1xf32>
    %cst_53 = arith.constant 3.200000e+01 : f32
    %95 = vector.broadcast %cst_53 : f32 to vector<32x1xf32>
    %96 = arith.divf %94, %95 : vector<32x1xf32>
    %97 = vector.broadcast %89 : vector<32x1xf32> to vector<32x32xf32>
    %98 = arith.subf %81, %97 : vector<32x32xf32>
    %cst_54 = arith.constant 9.99999974E-6 : f32
    %99 = vector.broadcast %cst_54 : f32 to vector<32x1xf32>
    %100 = arith.addf %96, %99 : vector<32x1xf32>
    %101 = math.rsqrt %100 : vector<32x1xf32>
    %102 = vector.broadcast %101 : vector<32x1xf32> to vector<32x32xf32>
    %103 = arith.mulf %98, %102 : vector<32x32xf32>
    %104 = vector.broadcast %83 : vector<1x32xf32> to vector<32x32xf32>
    %105 = arith.mulf %103, %104 : vector<32x32xf32>
    %106 = vector.broadcast %85 : vector<1x32xf32> to vector<32x32xf32>
    %107 = arith.addf %105, %106 : vector<32x32xf32>
    %c0_55 = arith.constant 0 : index
    %c0_56 = arith.constant 0 : index
    %c0_57 = arith.constant 0 : index
    %108 = vector.load %arg14[%c0_55, %c0_56, %c0_57] : memref<2x32x512xf32, #tpu.memory_space<vmem>>, vector<1x32x512xf32>
    %109 = vector.shape_cast %108 : vector<1x32x512xf32> to vector<32x512xf32>
    %cst_58 = arith.constant dense<0.000000e+00> : vector<32x512xf32>
    %110 = tpu.matmul %107, %109, %cst_58 {dimension_numbers = #tpu.dot_dimension_numbers<[1], [0], [0], [1], [0, 0, 1, 1], [], []>} : vector<32x32xf32>, vector<32x512xf32>, vector<32x512xf32> -> vector<32x512xf32>
    %111 = vector.extract_strided_slice %110 {offsets = [0, 0], sizes = [32, 128], strides = [1, 1]} : vector<32x512xf32> to vector<32x128xf32>
    %cst_59 = arith.constant 1.250000e-01 : f32
    %112 = vector.broadcast %cst_59 : f32 to vector<32x128xf32>
    %113 = arith.mulf %111, %112 : vector<32x128xf32>
    %114 = vector.extract_strided_slice %110 {offsets = [0, 128], sizes = [32, 128], strides = [1, 1]} : vector<32x512xf32> to vector<32x128xf32>
    %115 = vector.extract_strided_slice %110 {offsets = [0, 256], sizes = [32, 128], strides = [1, 1]} : vector<32x512xf32> to vector<32x128xf32>
    %116 = vector.extract_strided_slice %110 {offsets = [0, 384], sizes = [32, 128], strides = [1, 1]} : vector<32x512xf32> to vector<32x128xf32>
    %c0_60 = arith.constant 0 : index
    %c0_61 = arith.constant 0 : index
    %c0_62 = arith.constant 0 : index
    %117 = vector.load %arg15[%c0_60, %c0_61, %c0_62] : memref<2x1x128xf32, #tpu.memory_space<vmem>>, vector<1x1x128xf32>
    %118 = vector.shape_cast %117 : vector<1x1x128xf32> to vector<1x128xf32>
    %119 = vector.broadcast %118 : vector<1x128xf32> to vector<32x128xf32>
    %120 = arith.addf %116, %119 : vector<32x128xf32>
    %c0_63 = arith.constant 0 : index
    %c0_64 = arith.constant 0 : index
    %c0_65 = arith.constant 0 : index
    %121 = vector.load %arg16[%c0_63, %c0_64, %c0_65] : memref<2x128x32xf32, #tpu.memory_space<vmem>>, vector<1x128x32xf32>
    %122 = vector.shape_cast %121 : vector<1x128x32xf32> to vector<128x32xf32>
    %cst_66 = arith.constant 0.000000e+00 : f32
    %123 = vector.broadcast %cst_66 : f32 to vector<32x32xf32>
    %124 = vector.extract_strided_slice %113 {offsets = [0, 0], sizes = [32, 64], strides = [1, 1]} : vector<32x128xf32> to vector<32x64xf32>
    %125 = vector.extract_strided_slice %114 {offsets = [0, 0], sizes = [32, 64], strides = [1, 1]} : vector<32x128xf32> to vector<32x64xf32>
    "tpu.trace_start"() <{level = 10 : i32, message = "id,jd->ij"}> : () -> ()
    %cst_67 = arith.constant dense<0.000000e+00> : vector<32x32xf32>
    %126 = tpu.matmul %124, %125, %cst_67 {dimension_numbers = #tpu.dot_dimension_numbers<[1], [1], [0], [0], [0, 0, 1, 0], [], []>} : vector<32x64xf32>, vector<32x64xf32>, vector<32x32xf32> -> vector<32x32xf32>
    %cst_68 = arith.constant -1.000000e+30 : f32
    "tpu.trace_stop"() : () -> ()
    %127 = vector.broadcast %cst_68 : f32 to vector<32x32xf32>
    %128 = arith.select %5, %126, %127 : vector<32x32xi1>, vector<32x32xf32>
    %cst_69 = arith.constant dense<0xFF800000> : vector<32xf32>
    %129 = vector.multi_reduction <maximumf>, %128, %cst_69 [1] : vector<32x32xf32> to vector<32xf32>
    %130 = vector.shape_cast %129 : vector<32xf32> to vector<32x1xf32>
    %131 = vector.broadcast %130 : vector<32x1xf32> to vector<32x32xf32>
    %132 = arith.subf %128, %131 : vector<32x32xf32>
    %133 = math.exp %132 : vector<32x32xf32>
    %cst_70 = arith.constant dense<0.000000e+00> : vector<32xf32>
    %134 = vector.multi_reduction <add>, %133, %cst_70 [1] : vector<32x32xf32> to vector<32xf32>
    %135 = vector.shape_cast %134 : vector<32xf32> to vector<32x1xf32>
    %136 = vector.broadcast %135 : vector<32x1xf32> to vector<32x32xf32>
    %137 = arith.divf %133, %136 : vector<32x32xf32>
    %138 = vector.extract_strided_slice %115 {offsets = [0, 0], sizes = [32, 64], strides = [1, 1]} : vector<32x128xf32> to vector<32x64xf32>
    %cst_71 = arith.constant dense<0.000000e+00> : vector<32x64xf32>
    %139 = tpu.matmul %137, %138, %cst_71 {dimension_numbers = #tpu.dot_dimension_numbers<[1], [0], [0], [1], [0, 0, 1, 1], [], []>} : vector<32x32xf32>, vector<32x64xf32>, vector<32x64xf32> -> vector<32x64xf32>
    %140 = vector.extract_strided_slice %120 {offsets = [0, 0], sizes = [32, 64], strides = [1, 1]} : vector<32x128xf32> to vector<32x64xf32>
    %141 = arith.negf %140 : vector<32x64xf32>
    %142 = math.exp %141 : vector<32x64xf32>
    %cst_72 = arith.constant 1.000000e+00 : f32
    %143 = vector.broadcast %cst_72 : f32 to vector<32x64xf32>
    %144 = arith.addf %143, %142 : vector<32x64xf32>
    %145 = arith.divf %143, %144 : vector<32x64xf32>
    %146 = arith.mulf %139, %145 : vector<32x64xf32>
    %147 = vector.extract_strided_slice %122 {offsets = [0, 0], sizes = [64, 32], strides = [1, 1]} : vector<128x32xf32> to vector<64x32xf32>
    %cst_73 = arith.constant dense<0.000000e+00> : vector<32x32xf32>
    %148 = tpu.matmul %146, %147, %cst_73 {dimension_numbers = #tpu.dot_dimension_numbers<[1], [0], [0], [1], [0, 0, 1, 1], [], []>} : vector<32x64xf32>, vector<64x32xf32>, vector<32x32xf32> -> vector<32x32xf32>
    %149 = arith.addf %123, %148 : vector<32x32xf32>
    %150 = vector.extract_strided_slice %113 {offsets = [0, 64], sizes = [32, 64], strides = [1, 1]} : vector<32x128xf32> to vector<32x64xf32>
    %151 = vector.extract_strided_slice %114 {offsets = [0, 64], sizes = [32, 64], strides = [1, 1]} : vector<32x128xf32> to vector<32x64xf32>
    "tpu.trace_start"() <{level = 10 : i32, message = "id,jd->ij"}> : () -> ()
    %cst_74 = arith.constant dense<0.000000e+00> : vector<32x32xf32>
    %152 = tpu.matmul %150, %151, %cst_74 {dimension_numbers = #tpu.dot_dimension_numbers<[1], [1], [0], [0], [0, 0, 1, 0], [], []>} : vector<32x64xf32>, vector<32x64xf32>, vector<32x32xf32> -> vector<32x32xf32>
    %cst_75 = arith.constant -1.000000e+30 : f32
    "tpu.trace_stop"() : () -> ()
    %153 = vector.broadcast %cst_75 : f32 to vector<32x32xf32>
    %154 = arith.select %5, %152, %153 : vector<32x32xi1>, vector<32x32xf32>
    %cst_76 = arith.constant dense<0xFF800000> : vector<32xf32>
    %155 = vector.multi_reduction <maximumf>, %154, %cst_76 [1] : vector<32x32xf32> to vector<32xf32>
    %156 = vector.shape_cast %155 : vector<32xf32> to vector<32x1xf32>
    %157 = vector.broadcast %156 : vector<32x1xf32> to vector<32x32xf32>
    %158 = arith.subf %154, %157 : vector<32x32xf32>
    %159 = math.exp %158 : vector<32x32xf32>
    %cst_77 = arith.constant dense<0.000000e+00> : vector<32xf32>
    %160 = vector.multi_reduction <add>, %159, %cst_77 [1] : vector<32x32xf32> to vector<32xf32>
    %161 = vector.shape_cast %160 : vector<32xf32> to vector<32x1xf32>
    %162 = vector.broadcast %161 : vector<32x1xf32> to vector<32x32xf32>
    %163 = arith.divf %159, %162 : vector<32x32xf32>
    %164 = vector.extract_strided_slice %115 {offsets = [0, 64], sizes = [32, 64], strides = [1, 1]} : vector<32x128xf32> to vector<32x64xf32>
    %cst_78 = arith.constant dense<0.000000e+00> : vector<32x64xf32>
    %165 = tpu.matmul %163, %164, %cst_78 {dimension_numbers = #tpu.dot_dimension_numbers<[1], [0], [0], [1], [0, 0, 1, 1], [], []>} : vector<32x32xf32>, vector<32x64xf32>, vector<32x64xf32> -> vector<32x64xf32>
    %166 = vector.extract_strided_slice %120 {offsets = [0, 64], sizes = [32, 64], strides = [1, 1]} : vector<32x128xf32> to vector<32x64xf32>
    %167 = arith.negf %166 : vector<32x64xf32>
    %168 = math.exp %167 : vector<32x64xf32>
    %cst_79 = arith.constant 1.000000e+00 : f32
    %169 = vector.broadcast %cst_79 : f32 to vector<32x64xf32>
    %170 = arith.addf %169, %168 : vector<32x64xf32>
    %171 = arith.divf %169, %170 : vector<32x64xf32>
    %172 = arith.mulf %165, %171 : vector<32x64xf32>
    %173 = vector.extract_strided_slice %122 {offsets = [64, 0], sizes = [64, 32], strides = [1, 1]} : vector<128x32xf32> to vector<64x32xf32>
    %cst_80 = arith.constant dense<0.000000e+00> : vector<32x32xf32>
    %174 = tpu.matmul %172, %173, %cst_80 {dimension_numbers = #tpu.dot_dimension_numbers<[1], [0], [0], [1], [0, 0, 1, 1], [], []>} : vector<32x64xf32>, vector<64x32xf32>, vector<32x32xf32> -> vector<32x32xf32>
    %175 = arith.addf %149, %174 : vector<32x32xf32>
    %c0_81 = arith.constant 0 : index
    %c0_82 = arith.constant 0 : index
    %c0_83 = arith.constant 0 : index
    %176 = vector.load %arg17[%c0_81, %c0_82, %c0_83] : memref<2x1x32xf32, #tpu.memory_space<vmem>>, vector<1x1x32xf32>
    %177 = vector.shape_cast %176 : vector<1x1x32xf32> to vector<1x32xf32>
    %178 = vector.broadcast %177 : vector<1x32xf32> to vector<32x32xf32>
    %179 = arith.addf %175, %178 : vector<32x32xf32>
    %180 = arith.addf %107, %179 : vector<32x32xf32>
    %c0_84 = arith.constant 0 : index
    %c0_85 = arith.constant 0 : index
    %c0_86 = arith.constant 0 : index
    %181 = vector.load %arg18[%c0_84, %c0_85, %c0_86] : memref<2x1x32xf32, #tpu.memory_space<vmem>>, vector<1x1x32xf32>
    %182 = vector.shape_cast %181 : vector<1x1x32xf32> to vector<1x32xf32>
    %c0_87 = arith.constant 0 : index
    %c0_88 = arith.constant 0 : index
    %c0_89 = arith.constant 0 : index
    %183 = vector.load %arg19[%c0_87, %c0_88, %c0_89] : memref<2x1x32xf32, #tpu.memory_space<vmem>>, vector<1x1x32xf32>
    %184 = vector.shape_cast %183 : vector<1x1x32xf32> to vector<1x32xf32>
    %cst_90 = arith.constant dense<0.000000e+00> : vector<32xf32>
    %185 = vector.multi_reduction <add>, %180, %cst_90 [1] : vector<32x32xf32> to vector<32xf32>
    %186 = vector.shape_cast %185 : vector<32xf32> to vector<32x1xf32>
    %cst_91 = arith.constant 3.200000e+01 : f32
    %187 = vector.broadcast %cst_91 : f32 to vector<32x1xf32>
    %188 = arith.divf %186, %187 : vector<32x1xf32>
    %189 = vector.broadcast %188 : vector<32x1xf32> to vector<32x32xf32>
    %190 = arith.subf %180, %189 : vector<32x32xf32>
    %191 = arith.mulf %190, %190 : vector<32x32xf32>
    %cst_92 = arith.constant dense<0.000000e+00> : vector<32xf32>
    %192 = vector.multi_reduction <add>, %191, %cst_92 [1] : vector<32x32xf32> to vector<32xf32>
    %193 = vector.shape_cast %192 : vector<32xf32> to vector<32x1xf32>
    %cst_93 = arith.constant 3.200000e+01 : f32
    %194 = vector.broadcast %cst_93 : f32 to vector<32x1xf32>
    %195 = arith.divf %193, %194 : vector<32x1xf32>
    %196 = vector.broadcast %188 : vector<32x1xf32> to vector<32x32xf32>
    %197 = arith.subf %180, %196 : vector<32x32xf32>
    %cst_94 = arith.constant 9.99999974E-6 : f32
    %198 = vector.broadcast %cst_94 : f32 to vector<32x1xf32>
    %199 = arith.addf %195, %198 : vector<32x1xf32>
    %200 = math.rsqrt %199 : vector<32x1xf32>
    %201 = vector.broadcast %200 : vector<32x1xf32> to vector<32x32xf32>
    %202 = arith.mulf %197, %201 : vector<32x32xf32>
    %203 = vector.broadcast %182 : vector<1x32xf32> to vector<32x32xf32>
    %204 = arith.mulf %202, %203 : vector<32x32xf32>
    %205 = vector.broadcast %184 : vector<1x32xf32> to vector<32x32xf32>
    %206 = arith.addf %204, %205 : vector<32x32xf32>
    %207 = arith.addf %206, %1 : vector<32x32xf32>
    %c0_95 = arith.constant 0 : index
    %c0_96 = arith.constant 0 : index
    %c0_97 = arith.constant 0 : index
    %208 = vector.load %arg20[%c0_95, %c0_96, %c0_97] : memref<2x1x32xf32, #tpu.memory_space<vmem>>, vector<1x1x32xf32>
    %209 = vector.shape_cast %208 : vector<1x1x32xf32> to vector<1x32xf32>
    %c0_98 = arith.constant 0 : index
    %c0_99 = arith.constant 0 : index
    %c0_100 = arith.constant 0 : index
    %210 = vector.load %arg21[%c0_98, %c0_99, %c0_100] : memref<2x1x32xf32, #tpu.memory_space<vmem>>, vector<1x1x32xf32>
    %211 = vector.shape_cast %210 : vector<1x1x32xf32> to vector<1x32xf32>
    %cst_101 = arith.constant dense<0.000000e+00> : vector<32xf32>
    %212 = vector.multi_reduction <add>, %207, %cst_101 [1] : vector<32x32xf32> to vector<32xf32>
    %213 = vector.shape_cast %212 : vector<32xf32> to vector<32x1xf32>
    %cst_102 = arith.constant 3.200000e+01 : f32
    %214 = vector.broadcast %cst_102 : f32 to vector<32x1xf32>
    %215 = arith.divf %213, %214 : vector<32x1xf32>
    %216 = vector.broadcast %215 : vector<32x1xf32> to vector<32x32xf32>
    %217 = arith.subf %207, %216 : vector<32x32xf32>
    %218 = arith.mulf %217, %217 : vector<32x32xf32>
    %cst_103 = arith.constant dense<0.000000e+00> : vector<32xf32>
    %219 = vector.multi_reduction <add>, %218, %cst_103 [1] : vector<32x32xf32> to vector<32xf32>
    %220 = vector.shape_cast %219 : vector<32xf32> to vector<32x1xf32>
    %cst_104 = arith.constant 3.200000e+01 : f32
    %221 = vector.broadcast %cst_104 : f32 to vector<32x1xf32>
    %222 = arith.divf %220, %221 : vector<32x1xf32>
    %223 = vector.broadcast %215 : vector<32x1xf32> to vector<32x32xf32>
    %224 = arith.subf %207, %223 : vector<32x32xf32>
    %cst_105 = arith.constant 9.99999974E-6 : f32
    %225 = vector.broadcast %cst_105 : f32 to vector<32x1xf32>
    %226 = arith.addf %222, %225 : vector<32x1xf32>
    %227 = math.rsqrt %226 : vector<32x1xf32>
    %228 = vector.broadcast %227 : vector<32x1xf32> to vector<32x32xf32>
    %229 = arith.mulf %224, %228 : vector<32x32xf32>
    %230 = vector.broadcast %209 : vector<1x32xf32> to vector<32x32xf32>
    %231 = arith.mulf %229, %230 : vector<32x32xf32>
    %232 = vector.broadcast %211 : vector<1x32xf32> to vector<32x32xf32>
    %233 = arith.addf %231, %232 : vector<32x32xf32>
    %c1 = arith.constant 1 : index
    %c0_106 = arith.constant 0 : index
    %c0_107 = arith.constant 0 : index
    %234 = vector.load %arg4[%c1, %c0_106, %c0_107] : memref<2x1x32xf32, #tpu.memory_space<vmem>>, vector<1x1x32xf32>
    %235 = vector.shape_cast %234 : vector<1x1x32xf32> to vector<1x32xf32>
    %c1_108 = arith.constant 1 : index
    %c0_109 = arith.constant 0 : index
    %c0_110 = arith.constant 0 : index
    %236 = vector.load %arg5[%c1_108, %c0_109, %c0_110] : memref<2x1x32xf32, #tpu.memory_space<vmem>>, vector<1x1x32xf32>
    %237 = vector.shape_cast %236 : vector<1x1x32xf32> to vector<1x32xf32>
    %cst_111 = arith.constant dense<0.000000e+00> : vector<32xf32>
    %238 = vector.multi_reduction <add>, %233, %cst_111 [1] : vector<32x32xf32> to vector<32xf32>
    %239 = vector.shape_cast %238 : vector<32xf32> to vector<32x1xf32>
    %cst_112 = arith.constant 3.200000e+01 : f32
    %240 = vector.broadcast %cst_112 : f32 to vector<32x1xf32>
    %241 = arith.divf %239, %240 : vector<32x1xf32>
    %242 = vector.broadcast %241 : vector<32x1xf32> to vector<32x32xf32>
    %243 = arith.subf %233, %242 : vector<32x32xf32>
    %244 = arith.mulf %243, %243 : vector<32x32xf32>
    %cst_113 = arith.constant dense<0.000000e+00> : vector<32xf32>
    %245 = vector.multi_reduction <add>, %244, %cst_113 [1] : vector<32x32xf32> to vector<32xf32>
    %246 = vector.shape_cast %245 : vector<32xf32> to vector<32x1xf32>
    %cst_114 = arith.constant 3.200000e+01 : f32
    %247 = vector.broadcast %cst_114 : f32 to vector<32x1xf32>
    %248 = arith.divf %246, %247 : vector<32x1xf32>
    %249 = vector.broadcast %241 : vector<32x1xf32> to vector<32x32xf32>
    %250 = arith.subf %233, %249 : vector<32x32xf32>
    %cst_115 = arith.constant 9.99999974E-6 : f32
    %251 = vector.broadcast %cst_115 : f32 to vector<32x1xf32>
    %252 = arith.addf %248, %251 : vector<32x1xf32>
    %253 = math.rsqrt %252 : vector<32x1xf32>
    %254 = vector.broadcast %253 : vector<32x1xf32> to vector<32x32xf32>
    %255 = arith.mulf %250, %254 : vector<32x32xf32>
    %256 = vector.broadcast %235 : vector<1x32xf32> to vector<32x32xf32>
    %257 = arith.mulf %255, %256 : vector<32x32xf32>
    %258 = vector.broadcast %237 : vector<1x32xf32> to vector<32x32xf32>
    %259 = arith.addf %257, %258 : vector<32x32xf32>
    %c1_116 = arith.constant 1 : index
    %c0_117 = arith.constant 0 : index
    %c0_118 = arith.constant 0 : index
    %260 = vector.load %arg6[%c1_116, %c0_117, %c0_118] : memref<2x32x256xf32, #tpu.memory_space<vmem>>, vector<1x32x256xf32>
    %261 = vector.shape_cast %260 : vector<1x32x256xf32> to vector<32x256xf32>
    %cst_119 = arith.constant dense<0.000000e+00> : vector<32x256xf32>
    %262 = tpu.matmul %259, %261, %cst_119 {dimension_numbers = #tpu.dot_dimension_numbers<[1], [0], [0], [1], [0, 0, 1, 1], [], []>} : vector<32x32xf32>, vector<32x256xf32>, vector<32x256xf32> -> vector<32x256xf32>
    %263 = vector.extract_strided_slice %262 {offsets = [0, 0], sizes = [32, 128], strides = [1, 1]} : vector<32x256xf32> to vector<32x128xf32>
    %264 = vector.extract_strided_slice %262 {offsets = [0, 128], sizes = [32, 128], strides = [1, 1]} : vector<32x256xf32> to vector<32x128xf32>
    %c1_120 = arith.constant 1 : index
    %c0_121 = arith.constant 0 : index
    %c0_122 = arith.constant 0 : index
    %265 = vector.load %arg7[%c1_120, %c0_121, %c0_122] : memref<2x1x128xf32, #tpu.memory_space<vmem>>, vector<1x1x128xf32>
    %266 = vector.shape_cast %265 : vector<1x1x128xf32> to vector<1x128xf32>
    %267 = vector.broadcast %266 : vector<1x128xf32> to vector<32x128xf32>
    %268 = arith.addf %264, %267 : vector<32x128xf32>
    %cst_123 = arith.constant dense<0.000000e+00> : vector<32x128xf32>
    %269 = tpu.matmul %2, %263, %cst_123 {dimension_numbers = #tpu.dot_dimension_numbers<[1], [0], [0], [1], [0, 0, 1, 1], [], []>} : vector<32x32xf32>, vector<32x128xf32>, vector<32x128xf32> -> vector<32x128xf32>
    %270 = arith.negf %268 : vector<32x128xf32>
    %271 = math.exp %270 : vector<32x128xf32>
    %cst_124 = arith.constant 1.000000e+00 : f32
    %272 = vector.broadcast %cst_124 : f32 to vector<32x128xf32>
    %273 = arith.addf %272, %271 : vector<32x128xf32>
    %274 = arith.divf %272, %273 : vector<32x128xf32>
    %275 = arith.mulf %269, %274 : vector<32x128xf32>
    %c1_125 = arith.constant 1 : index
    %c0_126 = arith.constant 0 : index
    %c0_127 = arith.constant 0 : index
    %276 = vector.load %arg8[%c1_125, %c0_126, %c0_127] : memref<2x128x32xf32, #tpu.memory_space<vmem>>, vector<1x128x32xf32>
    %277 = vector.shape_cast %276 : vector<1x128x32xf32> to vector<128x32xf32>
    %cst_128 = arith.constant dense<0.000000e+00> : vector<32x32xf32>
    %278 = tpu.matmul %275, %277, %cst_128 {dimension_numbers = #tpu.dot_dimension_numbers<[1], [0], [0], [1], [0, 0, 1, 1], [], []>} : vector<32x128xf32>, vector<128x32xf32>, vector<32x32xf32> -> vector<32x32xf32>
    %c1_129 = arith.constant 1 : index
    %c0_130 = arith.constant 0 : index
    %c0_131 = arith.constant 0 : index
    %279 = vector.load %arg9[%c1_129, %c0_130, %c0_131] : memref<2x1x32xf32, #tpu.memory_space<vmem>>, vector<1x1x32xf32>
    %280 = vector.shape_cast %279 : vector<1x1x32xf32> to vector<1x32xf32>
    %281 = vector.broadcast %280 : vector<1x32xf32> to vector<32x32xf32>
    %282 = arith.addf %278, %281 : vector<32x32xf32>
    %283 = arith.addf %259, %282 : vector<32x32xf32>
    %c1_132 = arith.constant 1 : index
    %c0_133 = arith.constant 0 : index
    %c0_134 = arith.constant 0 : index
    %284 = vector.load %arg10[%c1_132, %c0_133, %c0_134] : memref<2x1x32xf32, #tpu.memory_space<vmem>>, vector<1x1x32xf32>
    %285 = vector.shape_cast %284 : vector<1x1x32xf32> to vector<1x32xf32>
    %c1_135 = arith.constant 1 : index
    %c0_136 = arith.constant 0 : index
    %c0_137 = arith.constant 0 : index
    %286 = vector.load %arg11[%c1_135, %c0_136, %c0_137] : memref<2x1x32xf32, #tpu.memory_space<vmem>>, vector<1x1x32xf32>
    %287 = vector.shape_cast %286 : vector<1x1x32xf32> to vector<1x32xf32>
    %cst_138 = arith.constant dense<0.000000e+00> : vector<32xf32>
    %288 = vector.multi_reduction <add>, %283, %cst_138 [1] : vector<32x32xf32> to vector<32xf32>
    %289 = vector.shape_cast %288 : vector<32xf32> to vector<32x1xf32>
    %cst_139 = arith.constant 3.200000e+01 : f32
    %290 = vector.broadcast %cst_139 : f32 to vector<32x1xf32>
    %291 = arith.divf %289, %290 : vector<32x1xf32>
    %292 = vector.broadcast %291 : vector<32x1xf32> to vector<32x32xf32>
    %293 = arith.subf %283, %292 : vector<32x32xf32>
    %294 = arith.mulf %293, %293 : vector<32x32xf32>
    %cst_140 = arith.constant dense<0.000000e+00> : vector<32xf32>
    %295 = vector.multi_reduction <add>, %294, %cst_140 [1] : vector<32x32xf32> to vector<32xf32>
    %296 = vector.shape_cast %295 : vector<32xf32> to vector<32x1xf32>
    %cst_141 = arith.constant 3.200000e+01 : f32
    %297 = vector.broadcast %cst_141 : f32 to vector<32x1xf32>
    %298 = arith.divf %296, %297 : vector<32x1xf32>
    %299 = vector.broadcast %291 : vector<32x1xf32> to vector<32x32xf32>
    %300 = arith.subf %283, %299 : vector<32x32xf32>
    %cst_142 = arith.constant 9.99999974E-6 : f32
    %301 = vector.broadcast %cst_142 : f32 to vector<32x1xf32>
    %302 = arith.addf %298, %301 : vector<32x1xf32>
    %303 = math.rsqrt %302 : vector<32x1xf32>
    %304 = vector.broadcast %303 : vector<32x1xf32> to vector<32x32xf32>
    %305 = arith.mulf %300, %304 : vector<32x32xf32>
    %306 = vector.broadcast %285 : vector<1x32xf32> to vector<32x32xf32>
    %307 = arith.mulf %305, %306 : vector<32x32xf32>
    %308 = vector.broadcast %287 : vector<1x32xf32> to vector<32x32xf32>
    %309 = arith.addf %307, %308 : vector<32x32xf32>
    %c1_143 = arith.constant 1 : index
    %c0_144 = arith.constant 0 : index
    %c0_145 = arith.constant 0 : index
    %310 = vector.load %arg12[%c1_143, %c0_144, %c0_145] : memref<2x1x32xf32, #tpu.memory_space<vmem>>, vector<1x1x32xf32>
    %311 = vector.shape_cast %310 : vector<1x1x32xf32> to vector<1x32xf32>
    %c1_146 = arith.constant 1 : index
    %c0_147 = arith.constant 0 : index
    %c0_148 = arith.constant 0 : index
    %312 = vector.load %arg13[%c1_146, %c0_147, %c0_148] : memref<2x1x32xf32, #tpu.memory_space<vmem>>, vector<1x1x32xf32>
    %313 = vector.shape_cast %312 : vector<1x1x32xf32> to vector<1x32xf32>
    %cst_149 = arith.constant dense<0.000000e+00> : vector<32xf32>
    %314 = vector.multi_reduction <add>, %309, %cst_149 [1] : vector<32x32xf32> to vector<32xf32>
    %315 = vector.shape_cast %314 : vector<32xf32> to vector<32x1xf32>
    %cst_150 = arith.constant 3.200000e+01 : f32
    %316 = vector.broadcast %cst_150 : f32 to vector<32x1xf32>
    %317 = arith.divf %315, %316 : vector<32x1xf32>
    %318 = vector.broadcast %317 : vector<32x1xf32> to vector<32x32xf32>
    %319 = arith.subf %309, %318 : vector<32x32xf32>
    %320 = arith.mulf %319, %319 : vector<32x32xf32>
    %cst_151 = arith.constant dense<0.000000e+00> : vector<32xf32>
    %321 = vector.multi_reduction <add>, %320, %cst_151 [1] : vector<32x32xf32> to vector<32xf32>
    %322 = vector.shape_cast %321 : vector<32xf32> to vector<32x1xf32>
    %cst_152 = arith.constant 3.200000e+01 : f32
    %323 = vector.broadcast %cst_152 : f32 to vector<32x1xf32>
    %324 = arith.divf %322, %323 : vector<32x1xf32>
    %325 = vector.broadcast %317 : vector<32x1xf32> to vector<32x32xf32>
    %326 = arith.subf %309, %325 : vector<32x32xf32>
    %cst_153 = arith.constant 9.99999974E-6 : f32
    %327 = vector.broadcast %cst_153 : f32 to vector<32x1xf32>
    %328 = arith.addf %324, %327 : vector<32x1xf32>
    %329 = math.rsqrt %328 : vector<32x1xf32>
    %330 = vector.broadcast %329 : vector<32x1xf32> to vector<32x32xf32>
    %331 = arith.mulf %326, %330 : vector<32x32xf32>
    %332 = vector.broadcast %311 : vector<1x32xf32> to vector<32x32xf32>
    %333 = arith.mulf %331, %332 : vector<32x32xf32>
    %334 = vector.broadcast %313 : vector<1x32xf32> to vector<32x32xf32>
    %335 = arith.addf %333, %334 : vector<32x32xf32>
    %c1_154 = arith.constant 1 : index
    %c0_155 = arith.constant 0 : index
    %c0_156 = arith.constant 0 : index
    %336 = vector.load %arg14[%c1_154, %c0_155, %c0_156] : memref<2x32x512xf32, #tpu.memory_space<vmem>>, vector<1x32x512xf32>
    %337 = vector.shape_cast %336 : vector<1x32x512xf32> to vector<32x512xf32>
    %cst_157 = arith.constant dense<0.000000e+00> : vector<32x512xf32>
    %338 = tpu.matmul %335, %337, %cst_157 {dimension_numbers = #tpu.dot_dimension_numbers<[1], [0], [0], [1], [0, 0, 1, 1], [], []>} : vector<32x32xf32>, vector<32x512xf32>, vector<32x512xf32> -> vector<32x512xf32>
    %339 = vector.extract_strided_slice %338 {offsets = [0, 0], sizes = [32, 128], strides = [1, 1]} : vector<32x512xf32> to vector<32x128xf32>
    %cst_158 = arith.constant 1.250000e-01 : f32
    %340 = vector.broadcast %cst_158 : f32 to vector<32x128xf32>
    %341 = arith.mulf %339, %340 : vector<32x128xf32>
    %342 = vector.extract_strided_slice %338 {offsets = [0, 128], sizes = [32, 128], strides = [1, 1]} : vector<32x512xf32> to vector<32x128xf32>
    %343 = vector.extract_strided_slice %338 {offsets = [0, 256], sizes = [32, 128], strides = [1, 1]} : vector<32x512xf32> to vector<32x128xf32>
    %344 = vector.extract_strided_slice %338 {offsets = [0, 384], sizes = [32, 128], strides = [1, 1]} : vector<32x512xf32> to vector<32x128xf32>
    %c1_159 = arith.constant 1 : index
    %c0_160 = arith.constant 0 : index
    %c0_161 = arith.constant 0 : index
    %345 = vector.load %arg15[%c1_159, %c0_160, %c0_161] : memref<2x1x128xf32, #tpu.memory_space<vmem>>, vector<1x1x128xf32>
    %346 = vector.shape_cast %345 : vector<1x1x128xf32> to vector<1x128xf32>
    %347 = vector.broadcast %346 : vector<1x128xf32> to vector<32x128xf32>
    %348 = arith.addf %344, %347 : vector<32x128xf32>
    %c1_162 = arith.constant 1 : index
    %c0_163 = arith.constant 0 : index
    %c0_164 = arith.constant 0 : index
    %349 = vector.load %arg16[%c1_162, %c0_163, %c0_164] : memref<2x128x32xf32, #tpu.memory_space<vmem>>, vector<1x128x32xf32>
    %350 = vector.shape_cast %349 : vector<1x128x32xf32> to vector<128x32xf32>
    %cst_165 = arith.constant 0.000000e+00 : f32
    %351 = vector.broadcast %cst_165 : f32 to vector<32x32xf32>
    %352 = vector.extract_strided_slice %341 {offsets = [0, 0], sizes = [32, 64], strides = [1, 1]} : vector<32x128xf32> to vector<32x64xf32>
    %353 = vector.extract_strided_slice %342 {offsets = [0, 0], sizes = [32, 64], strides = [1, 1]} : vector<32x128xf32> to vector<32x64xf32>
    "tpu.trace_start"() <{level = 10 : i32, message = "id,jd->ij"}> : () -> ()
    %cst_166 = arith.constant dense<0.000000e+00> : vector<32x32xf32>
    %354 = tpu.matmul %352, %353, %cst_166 {dimension_numbers = #tpu.dot_dimension_numbers<[1], [1], [0], [0], [0, 0, 1, 0], [], []>} : vector<32x64xf32>, vector<32x64xf32>, vector<32x32xf32> -> vector<32x32xf32>
    %cst_167 = arith.constant -1.000000e+30 : f32
    "tpu.trace_stop"() : () -> ()
    %355 = vector.broadcast %cst_167 : f32 to vector<32x32xf32>
    %356 = arith.select %5, %354, %355 : vector<32x32xi1>, vector<32x32xf32>
    %cst_168 = arith.constant dense<0xFF800000> : vector<32xf32>
    %357 = vector.multi_reduction <maximumf>, %356, %cst_168 [1] : vector<32x32xf32> to vector<32xf32>
    %358 = vector.shape_cast %357 : vector<32xf32> to vector<32x1xf32>
    %359 = vector.broadcast %358 : vector<32x1xf32> to vector<32x32xf32>
    %360 = arith.subf %356, %359 : vector<32x32xf32>
    %361 = math.exp %360 : vector<32x32xf32>
    %cst_169 = arith.constant dense<0.000000e+00> : vector<32xf32>
    %362 = vector.multi_reduction <add>, %361, %cst_169 [1] : vector<32x32xf32> to vector<32xf32>
    %363 = vector.shape_cast %362 : vector<32xf32> to vector<32x1xf32>
    %364 = vector.broadcast %363 : vector<32x1xf32> to vector<32x32xf32>
    %365 = arith.divf %361, %364 : vector<32x32xf32>
    %366 = vector.extract_strided_slice %343 {offsets = [0, 0], sizes = [32, 64], strides = [1, 1]} : vector<32x128xf32> to vector<32x64xf32>
    %cst_170 = arith.constant dense<0.000000e+00> : vector<32x64xf32>
    %367 = tpu.matmul %365, %366, %cst_170 {dimension_numbers = #tpu.dot_dimension_numbers<[1], [0], [0], [1], [0, 0, 1, 1], [], []>} : vector<32x32xf32>, vector<32x64xf32>, vector<32x64xf32> -> vector<32x64xf32>
    %368 = vector.extract_strided_slice %348 {offsets = [0, 0], sizes = [32, 64], strides = [1, 1]} : vector<32x128xf32> to vector<32x64xf32>
    %369 = arith.negf %368 : vector<32x64xf32>
    %370 = math.exp %369 : vector<32x64xf32>
    %cst_171 = arith.constant 1.000000e+00 : f32
    %371 = vector.broadcast %cst_171 : f32 to vector<32x64xf32>
    %372 = arith.addf %371, %370 : vector<32x64xf32>
    %373 = arith.divf %371, %372 : vector<32x64xf32>
    %374 = arith.mulf %367, %373 : vector<32x64xf32>
    %375 = vector.extract_strided_slice %350 {offsets = [0, 0], sizes = [64, 32], strides = [1, 1]} : vector<128x32xf32> to vector<64x32xf32>
    %cst_172 = arith.constant dense<0.000000e+00> : vector<32x32xf32>
    %376 = tpu.matmul %374, %375, %cst_172 {dimension_numbers = #tpu.dot_dimension_numbers<[1], [0], [0], [1], [0, 0, 1, 1], [], []>} : vector<32x64xf32>, vector<64x32xf32>, vector<32x32xf32> -> vector<32x32xf32>
    %377 = arith.addf %351, %376 : vector<32x32xf32>
    %378 = vector.extract_strided_slice %341 {offsets = [0, 64], sizes = [32, 64], strides = [1, 1]} : vector<32x128xf32> to vector<32x64xf32>
    %379 = vector.extract_strided_slice %342 {offsets = [0, 64], sizes = [32, 64], strides = [1, 1]} : vector<32x128xf32> to vector<32x64xf32>
    "tpu.trace_start"() <{level = 10 : i32, message = "id,jd->ij"}> : () -> ()
    %cst_173 = arith.constant dense<0.000000e+00> : vector<32x32xf32>
    %380 = tpu.matmul %378, %379, %cst_173 {dimension_numbers = #tpu.dot_dimension_numbers<[1], [1], [0], [0], [0, 0, 1, 0], [], []>} : vector<32x64xf32>, vector<32x64xf32>, vector<32x32xf32> -> vector<32x32xf32>
    %cst_174 = arith.constant -1.000000e+30 : f32
    "tpu.trace_stop"() : () -> ()
    %381 = vector.broadcast %cst_174 : f32 to vector<32x32xf32>
    %382 = arith.select %5, %380, %381 : vector<32x32xi1>, vector<32x32xf32>
    %cst_175 = arith.constant dense<0xFF800000> : vector<32xf32>
    %383 = vector.multi_reduction <maximumf>, %382, %cst_175 [1] : vector<32x32xf32> to vector<32xf32>
    %384 = vector.shape_cast %383 : vector<32xf32> to vector<32x1xf32>
    %385 = vector.broadcast %384 : vector<32x1xf32> to vector<32x32xf32>
    %386 = arith.subf %382, %385 : vector<32x32xf32>
    %387 = math.exp %386 : vector<32x32xf32>
    %cst_176 = arith.constant dense<0.000000e+00> : vector<32xf32>
    %388 = vector.multi_reduction <add>, %387, %cst_176 [1] : vector<32x32xf32> to vector<32xf32>
    %389 = vector.shape_cast %388 : vector<32xf32> to vector<32x1xf32>
    %390 = vector.broadcast %389 : vector<32x1xf32> to vector<32x32xf32>
    %391 = arith.divf %387, %390 : vector<32x32xf32>
    %392 = vector.extract_strided_slice %343 {offsets = [0, 64], sizes = [32, 64], strides = [1, 1]} : vector<32x128xf32> to vector<32x64xf32>
    %cst_177 = arith.constant dense<0.000000e+00> : vector<32x64xf32>
    %393 = tpu.matmul %391, %392, %cst_177 {dimension_numbers = #tpu.dot_dimension_numbers<[1], [0], [0], [1], [0, 0, 1, 1], [], []>} : vector<32x32xf32>, vector<32x64xf32>, vector<32x64xf32> -> vector<32x64xf32>
    %394 = vector.extract_strided_slice %348 {offsets = [0, 64], sizes = [32, 64], strides = [1, 1]} : vector<32x128xf32> to vector<32x64xf32>
    %395 = arith.negf %394 : vector<32x64xf32>
    %396 = math.exp %395 : vector<32x64xf32>
    %cst_178 = arith.constant 1.000000e+00 : f32
    %397 = vector.broadcast %cst_178 : f32 to vector<32x64xf32>
    %398 = arith.addf %397, %396 : vector<32x64xf32>
    %399 = arith.divf %397, %398 : vector<32x64xf32>
    %400 = arith.mulf %393, %399 : vector<32x64xf32>
    %401 = vector.extract_strided_slice %350 {offsets = [64, 0], sizes = [64, 32], strides = [1, 1]} : vector<128x32xf32> to vector<64x32xf32>
    %cst_179 = arith.constant dense<0.000000e+00> : vector<32x32xf32>
    %402 = tpu.matmul %400, %401, %cst_179 {dimension_numbers = #tpu.dot_dimension_numbers<[1], [0], [0], [1], [0, 0, 1, 1], [], []>} : vector<32x64xf32>, vector<64x32xf32>, vector<32x32xf32> -> vector<32x32xf32>
    %403 = arith.addf %377, %402 : vector<32x32xf32>
    %c1_180 = arith.constant 1 : index
    %c0_181 = arith.constant 0 : index
    %c0_182 = arith.constant 0 : index
    %404 = vector.load %arg17[%c1_180, %c0_181, %c0_182] : memref<2x1x32xf32, #tpu.memory_space<vmem>>, vector<1x1x32xf32>
    %405 = vector.shape_cast %404 : vector<1x1x32xf32> to vector<1x32xf32>
    %406 = vector.broadcast %405 : vector<1x32xf32> to vector<32x32xf32>
    %407 = arith.addf %403, %406 : vector<32x32xf32>
    %408 = arith.addf %335, %407 : vector<32x32xf32>
    %c1_183 = arith.constant 1 : index
    %c0_184 = arith.constant 0 : index
    %c0_185 = arith.constant 0 : index
    %409 = vector.load %arg18[%c1_183, %c0_184, %c0_185] : memref<2x1x32xf32, #tpu.memory_space<vmem>>, vector<1x1x32xf32>
    %410 = vector.shape_cast %409 : vector<1x1x32xf32> to vector<1x32xf32>
    %c1_186 = arith.constant 1 : index
    %c0_187 = arith.constant 0 : index
    %c0_188 = arith.constant 0 : index
    %411 = vector.load %arg19[%c1_186, %c0_187, %c0_188] : memref<2x1x32xf32, #tpu.memory_space<vmem>>, vector<1x1x32xf32>
    %412 = vector.shape_cast %411 : vector<1x1x32xf32> to vector<1x32xf32>
    %cst_189 = arith.constant dense<0.000000e+00> : vector<32xf32>
    %413 = vector.multi_reduction <add>, %408, %cst_189 [1] : vector<32x32xf32> to vector<32xf32>
    %414 = vector.shape_cast %413 : vector<32xf32> to vector<32x1xf32>
    %cst_190 = arith.constant 3.200000e+01 : f32
    %415 = vector.broadcast %cst_190 : f32 to vector<32x1xf32>
    %416 = arith.divf %414, %415 : vector<32x1xf32>
    %417 = vector.broadcast %416 : vector<32x1xf32> to vector<32x32xf32>
    %418 = arith.subf %408, %417 : vector<32x32xf32>
    %419 = arith.mulf %418, %418 : vector<32x32xf32>
    %cst_191 = arith.constant dense<0.000000e+00> : vector<32xf32>
    %420 = vector.multi_reduction <add>, %419, %cst_191 [1] : vector<32x32xf32> to vector<32xf32>
    %421 = vector.shape_cast %420 : vector<32xf32> to vector<32x1xf32>
    %cst_192 = arith.constant 3.200000e+01 : f32
    %422 = vector.broadcast %cst_192 : f32 to vector<32x1xf32>
    %423 = arith.divf %421, %422 : vector<32x1xf32>
    %424 = vector.broadcast %416 : vector<32x1xf32> to vector<32x32xf32>
    %425 = arith.subf %408, %424 : vector<32x32xf32>
    %cst_193 = arith.constant 9.99999974E-6 : f32
    %426 = vector.broadcast %cst_193 : f32 to vector<32x1xf32>
    %427 = arith.addf %423, %426 : vector<32x1xf32>
    %428 = math.rsqrt %427 : vector<32x1xf32>
    %429 = vector.broadcast %428 : vector<32x1xf32> to vector<32x32xf32>
    %430 = arith.mulf %425, %429 : vector<32x32xf32>
    %431 = vector.broadcast %410 : vector<1x32xf32> to vector<32x32xf32>
    %432 = arith.mulf %430, %431 : vector<32x32xf32>
    %433 = vector.broadcast %412 : vector<1x32xf32> to vector<32x32xf32>
    %434 = arith.addf %432, %433 : vector<32x32xf32>
    %435 = arith.addf %434, %233 : vector<32x32xf32>
    %c1_194 = arith.constant 1 : index
    %c0_195 = arith.constant 0 : index
    %c0_196 = arith.constant 0 : index
    %436 = vector.load %arg20[%c1_194, %c0_195, %c0_196] : memref<2x1x32xf32, #tpu.memory_space<vmem>>, vector<1x1x32xf32>
    %437 = vector.shape_cast %436 : vector<1x1x32xf32> to vector<1x32xf32>
    %c1_197 = arith.constant 1 : index
    %c0_198 = arith.constant 0 : index
    %c0_199 = arith.constant 0 : index
    %438 = vector.load %arg21[%c1_197, %c0_198, %c0_199] : memref<2x1x32xf32, #tpu.memory_space<vmem>>, vector<1x1x32xf32>
    %439 = vector.shape_cast %438 : vector<1x1x32xf32> to vector<1x32xf32>
    %cst_200 = arith.constant dense<0.000000e+00> : vector<32xf32>
    %440 = vector.multi_reduction <add>, %435, %cst_200 [1] : vector<32x32xf32> to vector<32xf32>
    %441 = vector.shape_cast %440 : vector<32xf32> to vector<32x1xf32>
    %cst_201 = arith.constant 3.200000e+01 : f32
    %442 = vector.broadcast %cst_201 : f32 to vector<32x1xf32>
    %443 = arith.divf %441, %442 : vector<32x1xf32>
    %444 = vector.broadcast %443 : vector<32x1xf32> to vector<32x32xf32>
    %445 = arith.subf %435, %444 : vector<32x32xf32>
    %446 = arith.mulf %445, %445 : vector<32x32xf32>
    %cst_202 = arith.constant dense<0.000000e+00> : vector<32xf32>
    %447 = vector.multi_reduction <add>, %446, %cst_202 [1] : vector<32x32xf32> to vector<32xf32>
    %448 = vector.shape_cast %447 : vector<32xf32> to vector<32x1xf32>
    %cst_203 = arith.constant 3.200000e+01 : f32
    %449 = vector.broadcast %cst_203 : f32 to vector<32x1xf32>
    %450 = arith.divf %448, %449 : vector<32x1xf32>
    %451 = vector.broadcast %443 : vector<32x1xf32> to vector<32x32xf32>
    %452 = arith.subf %435, %451 : vector<32x32xf32>
    %cst_204 = arith.constant 9.99999974E-6 : f32
    %453 = vector.broadcast %cst_204 : f32 to vector<32x1xf32>
    %454 = arith.addf %450, %453 : vector<32x1xf32>
    %455 = math.rsqrt %454 : vector<32x1xf32>
    %456 = vector.broadcast %455 : vector<32x1xf32> to vector<32x32xf32>
    %457 = arith.mulf %452, %456 : vector<32x32xf32>
    %458 = vector.broadcast %437 : vector<1x32xf32> to vector<32x32xf32>
    %459 = arith.mulf %457, %458 : vector<32x32xf32>
    %460 = vector.broadcast %439 : vector<1x32xf32> to vector<32x32xf32>
    %461 = arith.addf %459, %460 : vector<32x32xf32>
    %462 = vector.shape_cast %461 : vector<32x32xf32> to vector<1x32x32xf32>
    %c0_205 = arith.constant 0 : index
    %c0_206 = arith.constant 0 : index
    %c0_207 = arith.constant 0 : index
    %463 = vector.load %arg22[%c0_205, %c0_206, %c0_207] : memref<1x32x32xf32, #tpu.memory_space<vmem>>, vector<1x32x32xf32>
    tpu.vector_store %arg22[%c0_205, %c0_206, %c0_207], %462 {strides = array<i32>} : memref<1x32x32xf32, #tpu.memory_space<vmem>>, vector<1x32x32xf32>,
    return
  }
  func.func @transform_0(%arg0: i32) -> (i32, i32, i32) {
    %c0_i32 = arith.constant 0 : i32
    %c0_i32_0 = arith.constant 0 : i32
    %c0_i32_1 = arith.constant 0 : i32
    return %arg0, %c0_i32, %c0_i32_0 : i32, i32, i32
  }
  func.func @transform_1(%arg0: i32) -> (i32, i32) {
    %c0_i32 = arith.constant 0 : i32
    %c0_i32_0 = arith.constant 0 : i32
    %c0_i32_1 = arith.constant 0 : i32
    return %c0_i32, %c0_i32_0 : i32, i32
  }
  func.func @transform_2(%arg0: i32) -> (i32, i32) {
    %c0_i32 = arith.constant 0 : i32
    %c0_i32_0 = arith.constant 0 : i32
    %c0_i32_1 = arith.constant 0 : i32
    return %c0_i32, %c0_i32_0 : i32, i32
  }
  func.func @transform_3(%arg0: i32) -> (i32, i32, i32) {
    %c0_i32 = arith.constant 0 : i32
    %c0_i32_0 = arith.constant 0 : i32
    %c0_i32_1 = arith.constant 0 : i32
    %c0_i32_2 = arith.constant 0 : i32
    return %c0_i32, %c0_i32_0, %c0_i32_1 : i32, i32, i32
  }
  func.func @transform_4(%arg0: i32) -> (i32, i32, i32) {
    %c0_i32 = arith.constant 0 : i32
    %c0_i32_0 = arith.constant 0 : i32
    %c0_i32_1 = arith.constant 0 : i32
    %c0_i32_2 = arith.constant 0 : i32
    return %c0_i32, %c0_i32_0, %c0_i32_1 : i32, i32, i32
  }
  func.func @transform_5(%arg0: i32) -> (i32, i32, i32) {
    %c0_i32 = arith.constant 0 : i32
    %c0_i32_0 = arith.constant 0 : i32
    %c0_i32_1 = arith.constant 0 : i32
    %c0_i32_2 = arith.constant 0 : i32
    return %c0_i32, %c0_i32_0, %c0_i32_1 : i32, i32, i32
  }
  func.func @transform_6(%arg0: i32) -> (i32, i32, i32) {
    %c0_i32 = arith.constant 0 : i32
    %c0_i32_0 = arith.constant 0 : i32
    %c0_i32_1 = arith.constant 0 : i32
    %c0_i32_2 = arith.constant 0 : i32
    return %c0_i32, %c0_i32_0, %c0_i32_1 : i32, i32, i32
  }
  func.func @transform_7(%arg0: i32) -> (i32, i32, i32) {
    %c0_i32 = arith.constant 0 : i32
    %c0_i32_0 = arith.constant 0 : i32
    %c0_i32_1 = arith.constant 0 : i32
    %c0_i32_2 = arith.constant 0 : i32
    return %c0_i32, %c0_i32_0, %c0_i32_1 : i32, i32, i32
  }
  func.func @transform_8(%arg0: i32) -> (i32, i32, i32) {
    %c0_i32 = arith.constant 0 : i32
    %c0_i32_0 = arith.constant 0 : i32
    %c0_i32_1 = arith.constant 0 : i32
    %c0_i32_2 = arith.constant 0 : i32
    return %c0_i32, %c0_i32_0, %c0_i32_1 : i32, i32, i32
  }
  func.func @transform_9(%arg0: i32) -> (i32, i32, i32) {
    %c0_i32 = arith.constant 0 : i32
    %c0_i32_0 = arith.constant 0 : i32
    %c0_i32_1 = arith.constant 0 : i32
    %c0_i32_2 = arith.constant 0 : i32
    return %c0_i32, %c0_i32_0, %c0_i32_1 : i32, i32, i32
  }
  func.func @transform_10(%arg0: i32) -> (i32, i32, i32) {
    %c0_i32 = arith.constant 0 : i32
    %c0_i32_0 = arith.constant 0 : i32
    %c0_i32_1 = arith.constant 0 : i32
    %c0_i32_2 = arith.constant 0 : i32
    return %c0_i32, %c0_i32_0, %c0_i32_1 : i32, i32, i32
  }
  func.func @transform_11(%arg0: i32) -> (i32, i32, i32) {
    %c0_i32 = arith.constant 0 : i32
    %c0_i32_0 = arith.constant 0 : i32
    %c0_i32_1 = arith.constant 0 : i32
    %c0_i32_2 = arith.constant 0 : i32
    return %c0_i32, %c0_i32_0, %c0_i32_1 : i32, i32, i32
  }
  func.func @transform_12(%arg0: i32) -> (i32, i32, i32) {
    %c0_i32 = arith.constant 0 : i32
    %c0_i32_0 = arith.constant 0 : i32
    %c0_i32_1 = arith.constant 0 : i32
    %c0_i32_2 = arith.constant 0 : i32
    return %c0_i32, %c0_i32_0, %c0_i32_1 : i32, i32, i32
  }
  func.func @transform_13(%arg0: i32) -> (i32, i32, i32) {
    %c0_i32 = arith.constant 0 : i32
    %c0_i32_0 = arith.constant 0 : i32
    %c0_i32_1 = arith.constant 0 : i32
    %c0_i32_2 = arith.constant 0 : i32
    return %c0_i32, %c0_i32_0, %c0_i32_1 : i32, i32, i32
  }
  func.func @transform_14(%arg0: i32) -> (i32, i32, i32) {
    %c0_i32 = arith.constant 0 : i32
    %c0_i32_0 = arith.constant 0 : i32
    %c0_i32_1 = arith.constant 0 : i32
    %c0_i32_2 = arith.constant 0 : i32
    return %c0_i32, %c0_i32_0, %c0_i32_1 : i32, i32, i32
  }
  func.func @transform_15(%arg0: i32) -> (i32, i32, i32) {
    %c0_i32 = arith.constant 0 : i32
    %c0_i32_0 = arith.constant 0 : i32
    %c0_i32_1 = arith.constant 0 : i32
    %c0_i32_2 = arith.constant 0 : i32
    return %c0_i32, %c0_i32_0, %c0_i32_1 : i32, i32, i32
  }
  func.func @transform_16(%arg0: i32) -> (i32, i32, i32) {
    %c0_i32 = arith.constant 0 : i32
    %c0_i32_0 = arith.constant 0 : i32
    %c0_i32_1 = arith.constant 0 : i32
    %c0_i32_2 = arith.constant 0 : i32
    return %c0_i32, %c0_i32_0, %c0_i32_1 : i32, i32, i32
  }
  func.func @transform_17(%arg0: i32) -> (i32, i32, i32) {
    %c0_i32 = arith.constant 0 : i32
    %c0_i32_0 = arith.constant 0 : i32
    %c0_i32_1 = arith.constant 0 : i32
    %c0_i32_2 = arith.constant 0 : i32
    return %c0_i32, %c0_i32_0, %c0_i32_1 : i32, i32, i32
  }
  func.func @transform_18(%arg0: i32) -> (i32, i32, i32) {
    %c0_i32 = arith.constant 0 : i32
    %c0_i32_0 = arith.constant 0 : i32
    %c0_i32_1 = arith.constant 0 : i32
    %c0_i32_2 = arith.constant 0 : i32
    return %c0_i32, %c0_i32_0, %c0_i32_1 : i32, i32, i32
  }
  func.func @transform_19(%arg0: i32) -> (i32, i32, i32) {
    %c0_i32 = arith.constant 0 : i32
    %c0_i32_0 = arith.constant 0 : i32
    %c0_i32_1 = arith.constant 0 : i32
    %c0_i32_2 = arith.constant 0 : i32
    return %c0_i32, %c0_i32_0, %c0_i32_1 : i32, i32, i32
  }
  func.func @transform_20(%arg0: i32) -> (i32, i32, i32) {
    %c0_i32 = arith.constant 0 : i32
    %c0_i32_0 = arith.constant 0 : i32
    %c0_i32_1 = arith.constant 0 : i32
    %c0_i32_2 = arith.constant 0 : i32
    return %c0_i32, %c0_i32_0, %c0_i32_1 : i32, i32, i32
  }
  func.func @transform_21(%arg0: i32) -> (i32, i32, i32) {
    %c0_i32 = arith.constant 0 : i32
    %c0_i32_0 = arith.constant 0 : i32
    %c0_i32_1 = arith.constant 0 : i32
    return %arg0, %c0_i32, %c0_i32_0 : i32, i32, i32
  }
}

</mosaic_0001>

<bundles_post_ra>
// kernel: core_model_forward.1
= control target key start
LH: loop header
LB: loop body
LE: loop exit
PB: predicated region body
PF: predicated region fallthrough
CT: control target
= control target key end

     0   :  { %s6946_s0 = inlined_call_operand.vmem [shape: f32[2,32,32], index: 0, kind: input, shape index: {}]   ;;  %s6947_s1 = inlined_call_operand.vmem [shape: f32[32,32], index: 1, kind: input, shape index: {}]   ;;  %s6948_s2 = inlined_call_operand.vmem [shape: f32[32,32], index: 2, kind: input, shape index: {}]   ;;  %s6949_s3 = inlined_call_operand.vmem [shape: f32[2,1,32], index: 3, kind: input, shape index: {}]   ;;  %s6950_s4 = inlined_call_operand.vmem [shape: f32[2,1,32], index: 4, kind: input, shape index: {}]   ;;  %s6951_s5 = inlined_call_operand.vmem [shape: f32[2,32,256], index: 5, kind: input, shape index: {}]   ;;  %s6952_s6 = inlined_call_operand.vmem [shape: f32[2,1,128], index: 6, kind: input, shape index: {}]   ;;  %s6953_s7 = inlined_call_operand.vmem [shape: f32[2,128,32], index: 7, kind: input, shape index: {}]   ;;  %s6954_s8 = inlined_call_operand.vmem [shape: f32[2,1,32], index: 8, kind: input, shape index: {}]   ;;  %s6955_s9 = inlined_call_operand.vmem [shape: f32[2,1,32], index: 9, kind: input, shape index: {}]   ;;  %s6956_s10 = inlined_call_operand.vmem [shape: f32[2,1,32], index: 10, kind: input, shape index: {}]   ;;  %s6957_s11 = inlined_call_operand.vmem [shape: f32[2,1,32], index: 11, kind: input, shape index: {}]   ;;  %s6958_s12 = inlined_call_operand.vmem [shape: f32[2,1,32], index: 12, kind: input, shape index: {}]   ;;  %s6959_s13 = inlined_call_operand.vmem [shape: f32[2,32,512], index: 13, kind: input, shape index: {}]   ;;  %s6960_s14 = inlined_call_operand.vmem [shape: f32[2,1,128], index: 14, kind: input, shape index: {}]   ;;  %s6961_s15 = inlined_call_operand.vmem [shape: f32[2,128,32], index: 15, kind: input, shape index: {}]   ;;  %s6962_s16 = inlined_call_operand.vmem [shape: f32[2,1,32], index: 16, kind: input, shape index: {}]   ;;  %s6963_s17 = inlined_call_operand.vmem [shape: f32[2,1,32], index: 17, kind: input, shape index: {}]   ;;  %s6964_s18 = inlined_call_operand.vmem [shape: f32[2,1,32], index: 18, kind: input, shape index: {}]   ;;  %s6965_s19 = inlined_call_operand.vmem [shape: f32[2,1,32], index: 19, kind: input, shape index: {}]   ;;  %s6966_s20 = inlined_call_operand.vmem [shape: f32[2,1,32], index: 20, kind: input, shape index: {}]   ;;  %s6967_s21 = inlined_call_operand.hbm [shape: f32[2,32,32], index: 21, kind: output, shape index: {}]  }
   0x1   :  { %6988 = sst [smem:[#allocation14_spill]] %s6946_s0 }
   0x2   :  { %6989 = sst [smem:[#allocation15_spill]] %s6947_s1 }
   0x3   :  { %6990 = sst [smem:[#allocation16_spill]] %s6948_s2 }
   0x4   :  { %6991 = sst [smem:[#allocation17_spill]] %s6949_s3 }
   0x5   :  { %6992 = sst [smem:[#allocation18_spill]] %s6950_s4 }
   0x6   :  { %6993 = sst [smem:[#allocation19_spill]] %s6951_s5 }
   0x7   :  { %6994 = sst [smem:[#allocation20_spill]] %s6952_s6 }
   0x8   :  { %6995 = sst [smem:[#allocation21_spill]] %s6967_s21 }
   0x9   :  { %26 = vsyncpa [#allocation3], 0 }
   0xa   :  { %28 = vsyncpa [#allocation3 + $0x1], 0  ;;  %s5728_s2 = smov 0   ;;  %s5730_s25 = smov 0  }
   0xb   :  { %s5732_s26 = smov 0   ;;  %s5734_s27 = smov 0  }
   0xc LB: > { %6996 = sst [smem:[#allocation5_spill]] %s5599_s2  ;;  %s5749_s3 = sadd.s32 4294967295, %s5611_s27   ;;  %s5611_s27 = sphi %s5734_s27, %s7025_s27   ;;  %s5607_s26 = sphi %s5732_s26, %s7028_s26   ;;  %s5603_s25 = sphi %s5730_s25, %s7027_s25   ;;  %s5599_s2 = sphi %s5728_s2, %s7026_s2  }
   0xd   : > { %6997 = sst [smem:[#allocation6_spill]] %s5603_s25  ;;  %s4274_s28 = sadd.s32 4294967294, %s5611_s27  }
   0xe   : > { %6998 = sst [smem:[#allocation7_spill]] %s5607_s26  ;;  %s5753_s29 = sadd.s32 1, %s5611_s27  }
   0xf   : > { %6999 = sst [smem:[#allocation8_spill]] %s5611_s27  ;;  %s487_s0 = sadd.s32 1, %s5607_s26 }
  0x10   : > { %7000 = sst [smem:[#allocation9_spill]] %s5749_s3  ;;  %s484_s4 = ssub.s32 %s5611_s27, %s5753_s29 }
  0x11   : > { %7001 = sst [smem:[#allocation10_spill]] %s5753_s29  ;;  %p497_p0 = scmp.ne.s32.totalorder %s5607_s26, %s5603_s25 }
  0x12   : > { %p485_p1 = scmp.eq.s32.totalorder %s484_s4, 0  ;;  %p498_p2 = scmp.eq.s32.totalorder %s5749_s3, 1 }
  0x13   : > { %p503_p3 = scmp.ne.s32.totalorder %s5603_s25, %s5599_s2  ;;  %p504_p4 = scmp.eq.s32.totalorder %s4274_s28, 1 }
  0x14   : > { %s5764_s30 = scalar_select %p485_p1, %s5607_s26, %s487_s0  }
  0x15   : > { %p5766_p5 = por %p498_p2, %p497_p0  ;;  %p5770_p6 = por %p504_p4, %p503_p3 }
  0x16   : > { %7002 = sst [smem:[#allocation11_spill]] %s5764_s30  ;;  %p4277_p7 = scmp.ge.s32.totalorder %s5611_s27, 1 }
  0x17   : > { %s7003_s5 = scalar_select %p5766_p5, 1, 0 }
  0x18   : > { %s7005_s22 = scalar_select %p5770_p6, 1, 0 }
  0x19   : > { %7004 = sst [smem:[#allocation12_spill]] %s7003_s5  ;;  %p590_p8 = scmp.lt.s32.totalorder %s5611_s27, 3 }
  0x1a   : > { %7006 = sst [smem:[#allocation13_spill]] %s7005_s22 }
  0x1b   : > { %p591_p9 = pnand %p4277_p7, %p590_p8 }
  0x1c   : > { %p650_p10 = scmp.lt.s32.totalorder (!%p591_p9), %s5749_s3, 1  ;;  %vm673_vm0 = vcmask (!%p591_p9), 261120   ;;  %s7007_s0 = sld [smem:[#allocation14_spill]] (!%p591_p9)  ;;  %v5613_v38 = vmov (!%p591_p9), 0.0   ;;  %vm1489_vm1 = vcmask (!%p591_p9), 523264  }
  0x1d   : > { %594 = sbr.rel (%p591_p9) target bundleno = 8052 (0x1f74), region = 104  ;;  %s7008_s24 = sld [smem:[#allocation19_spill]] (!%p591_p9)  ;;  %831 = vmatprep.mubr.f32.mxu0 (!%p591_p9), %v5613_v38  ;;  %1344 = vmatprep.mubr.f32.mxu1 (!%p591_p9), %v5613_v38  ;;  %vm6047_vm2 = vmpackc.low (!%p591_p9), %vm1489_vm1, %vm1489_vm1 }
  0x1e   : > { %s7009_s27 = sld [smem:[#allocation17_spill]] (!%p591_p9)  ;;  %s7013_s6 = sld [smem:[#allocation20_spill]] (!%p591_p9) }
  0x1f   : > { %s7016_s5 = sld [smem:[#allocation16_spill]] (!%p591_p9)  ;;  %s5614_s28 = smov (!%p591_p9), 64  }
  0x20   : > { %s7017_s22 = sld [smem:[#allocation6_spill]] (!%p591_p9)  ;;  %s7018_s25 = sld [smem:[#allocation9_spill]] (!%p591_p9) }
  0x23   : > { %v748_v28 = vld [vmem:[%s7008_s24 + $0x8] sm:$0xff] (!%p591_p9)  ;;  %v750_v29 = vld [vmem:[%s7008_s24 + $0x18] sm:$0xff] (!%p591_p9)  ;;  %v747_v31 = vld [vmem:[%s7008_s24] sm:$0xff] (!%p591_p9) }
  0x24   : > { %s651_s23 = scalar_select %p650_p10, %s5749_s3, 1  ;;  %v4970_v30 = vpack.c.bf16 %v750_v29, %v748_v28  ;;  %v749_v32 = vld [vmem:[%s7008_s24 + $0x10] sm:$0xff]  ;;  %v752_v33 = vld [vmem:[%s7008_s24 + $0x28] sm:$0xff]  ;;  %v754_v35 = vld [vmem:[%s7008_s24 + $0x38] sm:$0xff] }
  0x25   : > { %v4972_v34 = vpack.c.bf16 %v749_v32, %v747_v31  ;;  %v751_v36 = vld [vmem:[%s7008_s24 + $0x20] sm:$0xff]  ;;  %v753_v37 = vld [vmem:[%s7008_s24 + $0x30] sm:$0xff]  ;;  %v4974_v39 = vpack.c.bf16 %v754_v35, %v752_v33  ;;  %s7010_s29 = smov %s7009_s27  ;;  %v999_v31 = vld [vmem:[%s6953_s7 + $0x38] sm:$0xff] }
  0x26   : > { %s4496_s1 = sshll.u32 %s651_s23, 5  ;;  %4971 = vmatprep.subr.bf16.mxu0 %v4970_v30  ;;  %v4976_v40 = vpack.c.bf16 %v753_v37, %v751_v36  ;;  %v4281_v54 = vld [vmem:[%s7009_s27] ss:$0 sm:$0xff]  ;;  %s7011_s23 = sld [smem:[#allocation18_spill]]  ;;  %v998_v30 = vld [vmem:[%s6953_s7 + $0x30] sm:$0xff]  ;;  %v1003_v37 = vld [vmem:[%s6953_s7 + $0x58] sm:$0xff] }
  0x27   : > { %s5781_s4 = scalar_lea.vmem %s7007_s0, %s4496_s1  ;;  %4973 = vmatpush1.bf16.msra.mxu0 %v4972_v34  ;;  %s7012_s0 = sld [smem:[#allocation15_spill]]  ;;  %v4998_v32 = vpack.c.bf16 %v999_v31, %v998_v30  ;;  %v1000_v33 = vld [vmem:[%s6953_s7 + $0x40] sm:$0xff]  ;;  %v1001_v34 = vld [vmem:[%s6953_s7 + $0x48] sm:$0xff]  ;;  %v1002_v36 = vld [vmem:[%s6953_s7 + $0x50] sm:$0xff] }
  0x28   : > { %v655_v0 = vld [vmem:[%s5781_s4] sm:$0xff]  ;;  %v657_v1 = vld [vmem:[%s5781_s4 + $0x10] sm:$0xff]  ;;  %v656_v2 = vld [vmem:[%s5781_s4 + $0x8] sm:$0xff]  ;;  %4975 = vmatprep.subr.bf16.mxu0 %v4974_v39  ;;  %v5002_v35 = vpack.c.bf16 %v1001_v34, %v1000_v33  ;;  %v5006_v39 = vpack.c.bf16 %v1003_v37, %v1002_v36  ;;  %s6985_s1 = sand.u32 1, %s7017_s22   ;;  %s4497_s30 = sshll.u32 %s7018_s25, 9 }
  0x29   : > { %v674_v3 = vsel %vm673_vm0, %v655_v0, 0.0  ;;  %v680_v4 = vsel %vm673_vm0, %v657_v1, 0.0  ;;  %v658_v5 = vld [vmem:[%s5781_s4 + $0x18] sm:$0xff]  ;;  %v677_v6 = vsel %vm673_vm0, %v656_v2, 0.0  ;;  %s4278_s3 = sshll.u32 %s6985_s1, 5 }
  0x2a   : > { %675 = vadd.xlane.f32.xlu0 %v674_v3  ;;  %681 = vadd.xlane.f32.xlu1 %v680_v4  ;;  %v683_v7 = vsel %vm673_vm0, %v658_v5, 0.0 }
  0x2b   : > { %4977 = vmatpush1.bf16.msra.mxu0 %v4976_v40  ;;  %v1004_v40 = vld [vmem:[%s6953_s7 + $0x60] sm:$0xff] }
  0x2c   : > { %v4282_v56 = vld [vmem:[%s7011_s23] ss:$0 sm:$0xff] }
  0x2d   : > { %v662_v28 = vld [vmem:[%s7012_s0 + $0x18] sm:$0xff] }
  0x2e   : > { %678 = vadd.xlane.f32.xlu0 %v677_v6  ;;  %684 = vadd.xlane.f32.xlu1 %v683_v7  ;;  %v659_v7 = vld [vmem:[%s7012_s0] sm:$0xff] }
  0xb7   : > { %v676_v8 = vpop.xlane.xlu0 %675  ;;  %v682_v9 = vpop.xlane.xlu1 %681 }
  0xb8   : > { %v687_v10 = vmul.f32 0.03125, %v676_v8  ;;  %v689_v11 = vmul.f32 0.03125, %v682_v9 }
  0xba   : > { %v691_v12 = vsub.f32 %v655_v0, %v687_v10  ;;  %v5791_v13 = vsub.f32 %v657_v1, %v689_v11 }
  0xbb   : > { %v679_v14 = vpop.xlane.xlu0 %678  ;;  %v685_v15 = vpop.xlane.xlu1 %684 }
  0xbc   : > { %v688_v16 = vmul.f32 0.03125, %v679_v14  ;;  %v690_v17 = vmul.f32 0.03125, %v685_v15  ;;  %v695_v18 = vmul.f32 %v691_v12, %v691_v12  ;;  %v697_v19 = vmul.f32 %v5791_v13, %v5791_v13  ;;  %v992_v15 = vld [vmem:[%s6953_s7] sm:$0xff] }
  0xbe   : > { %v692_v20 = vsub.f32 %v656_v2, %v688_v16  ;;  %v694_v21 = vsub.f32 %v658_v5, %v690_v17  ;;  %v699_v22 = vsel %vm673_vm0, %v695_v18, 0.0  ;;  %v705_v23 = vsel %vm673_vm0, %v697_v19, 0.0  ;;  %v993_v16 = vld [vmem:[%s6953_s7 + $0x8] sm:$0xff] }
  0xbf   : > { %700 = vadd.xlane.f32.xlu0 %v699_v22  ;;  %v995_v22 = vld [vmem:[%s6953_s7 + $0x18] sm:$0xff] }
  0xc0   : > { %v696_v24 = vmul.f32 %v692_v20, %v692_v20  ;;  %v698_v25 = vmul.f32 %v694_v21, %v694_v21 }
  0xc2   : > { %v702_v26 = vsel %vm673_vm0, %v696_v24, 0.0  ;;  %v708_v27 = vsel %vm673_vm0, %v698_v25, 0.0  ;;  %v661_v24 = vld [vmem:[%s7012_s0 + $0x10] sm:$0xff] }
  0xc3   : > { %706 = vadd.xlane.f32.xlu0 %v705_v23  ;;  %703 = vadd.xlane.f32.xlu1 %v702_v26  ;;  %v660_v23 = vld [vmem:[%s7012_s0 + $0x8] sm:$0xff]  ;;  %v996_v26 = vld [vmem:[%s6953_s7 + $0x20] sm:$0xff] }
  0xc7   : > { %709 = vadd.xlane.f32.xlu1 %v708_v27  ;;  %v997_v27 = vld [vmem:[%s6953_s7 + $0x28] sm:$0xff] }
  0xc8   : > { %v4994_v29 = vpack.c.bf16 %v997_v27, %v996_v26 }
 0x14c   : > { %v701_v41 = vpop.xlane.xlu0 %700 }
 0x14d   : > { %v711_v42 = vmul.f32 0.03125, %v701_v41  ;;  %v1005_v41 = vld [vmem:[%s6953_s7 + $0x68] sm:$0xff] }
 0x14f   : > { %v715_v43 = vadd.f32 1e-05, %v711_v42  ;;  %v5010_v42 = vpack.c.bf16 %v1005_v41, %v1004_v40 }
 0x150   : > { %v704_v44 = vpop.xlane.xlu1 %703  ;;  %v707_v45 = vpop.xlane.xlu0 %706 }
 0x151   : > { %5333 = vrsqrt.f32 %v715_v43  ;;  %v712_v46 = vmul.f32 0.03125, %v704_v44  ;;  %v713_v47 = vmul.f32 0.03125, %v707_v45  ;;  %v1006_v43 = vld [vmem:[%s6953_s7 + $0x70] sm:$0xff]  ;;  %v1007_v44 = vld [vmem:[%s6953_s7 + $0x78] sm:$0xff] }
 0x152   : > { %v5014_v45 = vpack.c.bf16 %v1007_v44, %v1006_v43 }
 0x153   : > { %v716_v48 = vadd.f32 1e-05, %v712_v46  ;;  %v717_v49 = vadd.f32 1e-05, %v713_v47  ;;  %v4287_v46 = vld [vmem:[%s7013_s6] ss:$0 sm:$0xff] }
 0x154   : > { %v710_v50 = vpop.xlane.xlu1 %709 }
 0x155   : > { %5335 = vrsqrt.f32 %v716_v48  ;;  %v714_v51 = vmul.f32 0.03125, %v710_v50 }
 0x156   : > { %5337 = vrsqrt.f32 %v717_v49 }
 0x157   : > { %v718_v52 = vadd.f32 1e-05, %v714_v51 }
 0x159   : > { %5339 = vrsqrt.f32 %v718_v52 }
 0x15b   : > { %v5334_v53 = vpop.eup %5333 }
 0x15c   : > { %v723_v55 = vmul.f32 %v5334_v53, %v691_v12 }
 0x15e   : > { %v733_v57 = vmul.f32 %v4281_v54, %v723_v55 }
 0x15f   : > { %v5336_v58 = vpop.eup %5335 }
 0x160   : > { %v5338_v59 = vpop.eup %5337  ;;  %v5831_v60 = vadd.f32 %v4282_v56, %v733_v57  ;;  %v724_v61 = vmul.f32 %v5336_v58, %v692_v20  ;;  %v4986_v20 = vpack.c.bf16 %v993_v16, %v992_v15  ;;  %v4296_v15 = vld [vmem:[%s6954_s8] ss:$0 sm:$0xff] }
 0x161   : > { %v725_v62 = vmul.f32 %v5338_v59, %v5791_v13 }
 0x162   : > { %4283 = vmatmul.mubr.msk.f32.vlgmr.msra.gmra.mrb[0].mxu0 %vm673_vm0, %v5831_v60  ;;  %v734_v63 = vmul.f32 %v4281_v54, %v724_v61 }
 0x163   : > { %v5340_v0 = vpop.eup %5339  ;;  %837 = vmatprep.mubr.f32.mxu0 %v5613_v38  ;;  %v735_v2 = vmul.f32 %v4281_v54, %v725_v62 }
 0x164   : > { %v5837_v1 = vadd.f32 %v4282_v56, %v734_v63  ;;  %v726_v3 = vmul.f32 %v5340_v0, %v694_v21  ;;  %v994_v21 = vld [vmem:[%s6953_s7 + $0x10] sm:$0xff] }
 0x165   : > { %v5842_v4 = vadd.f32 %v4282_v56, %v735_v2  ;;  %v4990_v25 = vpack.c.bf16 %v995_v22, %v994_v21 }
 0x166   : > { %4284 = vmatmul.mubr.msk.f32.gmra.mrb[2].mxu0 %vm673_vm0, %v5837_v1  ;;  %v736_v5 = vmul.f32 %v4281_v54, %v726_v3 }
 0x167   : > { %843 = vmatprep.mubr.f32.mxu0 %v5613_v38 }
 0x168   : > { %v5847_v6 = vadd.f32 %v4282_v56, %v736_v5 }
 0x16a   : > { %4285 = vmatmul.mubr.msk.f32.gmra.mrb[4].mxu0 %vm673_vm0, %v5842_v4 }
 0x16b   : > { %849 = vmatprep.mubr.f32.mxu0 %v5613_v38 }
 0x16e   : > { %4286 = vmatmul.mubr.msk.f32.gmra.mrb[6].mxu0 %vm673_vm0, %v5847_v6 }
 0x16f   : > { %4674 = vmatprep.mubr.msk.f32.mxu0 %vm673_vm0, %v659_v7 }
 0x235   : > { %v833_v8 = vpop.f32.mrb[0].mxu0 }
 0x236   : > { %v835_v9 = vpop.f32.mrb[1].mxu0 }
 0x237   : > { %v863_v48 = vadd.f32 %v4287_v46, %v835_v9 }
 0x239   : > { %v839_v10 = vpop.f32.mrb[2].mxu0  ;;  %v4292_v51 = vmul.f32 -1.442695, %v863_v48 }
 0x23a   : > { %v4978_v11 = vpack.c.bf16 %v839_v10, %v833_v8  ;;  %v841_v12 = vpop.f32.mrb[3].mxu0 }
 0x23b   : > { %v864_v47 = vadd.f32 %v4287_v46, %v841_v12 }
 0x23c   : > { %4979 = vmatprep.subr.bf16.mxu0 %v4978_v11 }
 0x23d   : > { %v845_v13 = vpop.f32.mrb[4].mxu0  ;;  %4981 = vmatpush3.bf16.msra.mxu0 %v4978_v11  ;;  %v4293_v49 = vmul.f32 -1.442695, %v864_v47 }
 0x23e   : > { %v847_v14 = vpop.f32.mrb[5].mxu0 }
 0x23f   : > { %v865_v52 = vadd.f32 %v4287_v46, %v847_v14  ;;  %5341 = vpow2.f32 %v4293_v49 }
 0x240   : > { %5343 = vpow2.f32 %v4292_v51 }
 0x241   : > { %v851_v17 = vpop.f32.mrb[6].mxu0  ;;  %v4294_v54 = vmul.f32 -1.442695, %v865_v52 }
 0x242   : > { %v4982_v18 = vpack.c.bf16 %v851_v17, %v845_v13  ;;  %v853_v19 = vpop.f32.mrb[7].mxu0 }
 0x243   : > { %v866_v50 = vadd.f32 %v4287_v46, %v853_v19 }
 0x244   : > { %4983 = vmatprep.subr.bf16.mxu0 %v4982_v18 }
 0x245   : > { %4985 = vmatpush3.bf16.msra.mxu0 %v4982_v18  ;;  %v4295_v53 = vmul.f32 -1.442695, %v866_v50 }
 0x246   : > { %4987 = vmatprep.subr.bf16.mxu0 %v4986_v20 }
 0x247   : > { %5345 = vpow2.f32 %v4295_v53 }
 0x248   : > { %4675 = vmatmul.mubr.msk.f32.vlgmr.msra.gmra.mrb[8].mxu0 %vm673_vm0, %v660_v23  ;;  %5347 = vpow2.f32 %v4294_v54 }
 0x249   : > { %4677 = vmatprep.mubr.msk.f32.mxu0 %vm673_vm0, %v661_v24  ;;  %4989 = vmatpush3.bf16.msra.mxu0 %v4986_v20  ;;  %v5342_v55 = vpop.eup %5341 }
 0x24a   : > { %4991 = vmatprep.subr.bf16.mxu0 %v4990_v25  ;;  %v5344_v56 = vpop.eup %5343  ;;  %v977_v57 = vadd.f32 1.0, %v5342_v55 }
 0x24b   : > { %v976_v59 = vadd.f32 1.0, %v5344_v56 }
 0x24c   : > { %4678 = vmatmul.mubr.msk.f32.gmra.mrb[10].mxu0 %vm673_vm0, %v662_v28  ;;  %5349 = vrcp.f32 %v977_v57 }
 0x24d   : > { %4993 = vmatpush3.bf16.msra.mxu0 %v4990_v25  ;;  %5351 = vrcp.f32 %v976_v59 }
 0x24e   : > { %4995 = vmatprep.subr.bf16.mxu0 %v4994_v29 }
 0x251   : > { %4997 = vmatpush3.bf16.msra.mxu0 %v4994_v29  ;;  %v5346_v58 = vpop.eup %5345 }
 0x252   : > { %4999 = vmatprep.subr.bf16.mxu0 %v4998_v32  ;;  %v5348_v61 = vpop.eup %5347  ;;  %v979_v62 = vadd.f32 1.0, %v5346_v58 }
 0x253   : > { %v978_v63 = vadd.f32 1.0, %v5348_v61 }
 0x254   : > { %5353 = vrcp.f32 %v979_v62 }
 0x255   : > { %5001 = vmatpush3.bf16.msra.mxu0 %v4998_v32  ;;  %5355 = vrcp.f32 %v978_v63  ;;  %v4297_v63 = vld [vmem:[%s6955_s9] ss:$0 sm:$0xff] }
 0x256   : > { %5003 = vmatprep.subr.bf16.mxu0 %v5002_v35  ;;  %v5350_v0 = vpop.eup %5349 }
 0x257   : > { %v5352_v3 = vpop.eup %5351 }
 0x259   : > { %5005 = vmatpush3.bf16.msra.mxu0 %v5002_v35 }
 0x25a   : > { %5007 = vmatprep.subr.bf16.mxu0 %v5006_v39 }
 0x25d   : > { %5009 = vmatpush3.bf16.msra.mxu0 %v5006_v39 }
 0x25e   : > { %5011 = vmatprep.subr.bf16.mxu0 %v5010_v42  ;;  %v5354_v9 = vpop.eup %5353 }
 0x25f   : > { %v5356_v11 = vpop.eup %5355 }
 0x261   : > { %5013 = vmatpush3.bf16.msra.mxu0 %v5010_v42 }
 0x262   : > { %5015 = vmatprep.subr.bf16.mxu0 %v5014_v45 }
 0x265   : > { %5017 = vmatpush3.bf16.msra.mxu0 %v5014_v45 }
 0x31b   : > { %v4676_v2 = vpop.f32.mrb[8].mxu0 }
 0x31c   : > { %v989_v5 = vmul.f32 %v5350_v0, %v4676_v2  ;;  %v945_v7 = vpop.f32.mrb[9].mxu0 }
 0x31d   : > { %v988_v8 = vmul.f32 %v5352_v3, %v945_v7  ;;  %v4298_v3 = vld [vmem:[%s6956_s10] ss:$0 sm:$0xff] }
 0x31f   : > { %v4679_v10 = vpop.f32.mrb[10].mxu0  ;;  %4712 = vmatprep.mubr.f32.mxu0 %v988_v8 }
 0x320   : > { %v991_v12 = vmul.f32 %v5354_v9, %v4679_v10  ;;  %v955_v13 = vpop.f32.mrb[11].mxu0  ;;  %4713 = vmatmul.mubr.f32.vlgmr.msra.gmra.mrb[12].mxu0 %v989_v5 }
 0x321   : > { %v990_v14 = vmul.f32 %v5356_v11, %v955_v13 }
 0x323   : > { %4715 = vmatprep.mubr.f32.mxu0 %v990_v14 }
 0x324   : > { %4716 = vmatmul.mubr.f32.gmra.mrb[14].mxu0 %v991_v12 }
 0x3f3   : > { %v4714_v16 = vpop.f32.mrb[12].mxu0 }
 0x3f4   : > { %v1087_v17 = vadd.f32 %v4714_v16, %v4296_v15  ;;  %v1081_v18 = vpop.f32.mrb[13].mxu0 }
 0x3f5   : > { %v1082_v19 = vadd.f32 %v4296_v15, %v1081_v18 }
 0x3f6   : > { %v1101_v20 = vadd.f32 %v1087_v17, %v5837_v1 }
 0x3f7   : > { %v4717_v21 = vpop.f32.mrb[14].mxu0  ;;  %v1100_v22 = vadd.f32 %v1082_v19, %v5831_v60 }
 0x3f8   : > { %v1097_v23 = vadd.f32 %v4717_v21, %v4296_v15  ;;  %v1091_v24 = vpop.f32.mrb[15].mxu0  ;;  %v1109_v25 = vsel %vm673_vm0, %v1101_v20, 0.0 }
 0x3f9   : > { %v1092_v26 = vadd.f32 %v4296_v15, %v1091_v24  ;;  %1110 = vadd.xlane.f32.xlu1 %v1109_v25  ;;  %v1106_v27 = vsel %vm673_vm0, %v1100_v22, 0.0 }
 0x3fa   : > { %1107 = vadd.xlane.f32.xlu0 %v1106_v27  ;;  %v1103_v28 = vadd.f32 %v1097_v23, %v5847_v6 }
 0x3fb   : > { %v1102_v29 = vadd.f32 %v1092_v26, %v5842_v4 }
 0x3fc   : > { %v1115_v30 = vsel %vm673_vm0, %v1103_v28, 0.0 }
 0x3fd   : > { %1116 = vadd.xlane.f32.xlu1 %v1115_v30  ;;  %v1112_v1 = vsel %vm673_vm0, %v1102_v29, 0.0 }
 0x3fe   : > { %1113 = vadd.xlane.f32.xlu0 %v1112_v1 }
 0x486   : > { %v1111_v60 = vpop.xlane.xlu1 %1110 }
 0x487   : > { %v1119_v31 = vmul.f32 0.03125, %v1111_v60  ;;  %v1108_v32 = vpop.xlane.xlu0 %1107 }
 0x488   : > { %v1118_v33 = vmul.f32 0.03125, %v1108_v32 }
 0x489   : > { %v1123_v34 = vsub.f32 %v1101_v20, %v1119_v31 }
 0x48a   : > { %v1122_v35 = vsub.f32 %v1100_v22, %v1118_v33  ;;  %v1117_v36 = vpop.xlane.xlu1 %1116 }
 0x48b   : > { %v1121_v37 = vmul.f32 0.03125, %v1117_v36  ;;  %v1114_v39 = vpop.xlane.xlu0 %1113  ;;  %v1127_v40 = vmul.f32 %v1123_v34, %v1123_v34 }
 0x48c   : > { %v1120_v41 = vmul.f32 0.03125, %v1114_v39  ;;  %v1126_v6 = vmul.f32 %v1122_v35, %v1122_v35 }
 0x48d   : > { %v1125_v42 = vsub.f32 %v1103_v28, %v1121_v37  ;;  %v1133_v4 = vsel %vm673_vm0, %v1127_v40, 0.0 }
 0x48e   : > { %v1124_v43 = vsub.f32 %v1102_v29, %v1120_v41  ;;  %1134 = vadd.xlane.f32.xlu1 %v1133_v4  ;;  %v1130_v44 = vsel %vm673_vm0, %v1126_v6, 0.0  ;;  %v1253_v6 = vld [vmem:[%s6959_s13 + $0x8] sm:$0xff]  ;;  %v1252_v4 = vld [vmem:[%s6959_s13] sm:$0xff] }
 0x48f   : > { %1131 = vadd.xlane.f32.xlu0 %v1130_v44  ;;  %v1129_v45 = vmul.f32 %v1125_v42, %v1125_v42  ;;  %v1256_v44 = vld [vmem:[%s6959_s13 + $0x20] sm:$0xff] }
 0x490   : > { %v1128_v46 = vmul.f32 %v1124_v43, %v1124_v43 }
 0x491   : > { %v1139_v47 = vsel %vm673_vm0, %v1129_v45, 0.0  ;;  %v1261_v45 = vld [vmem:[%s6959_s13 + $0x48] sm:$0xff] }
 0x492   : > { %1140 = vadd.xlane.f32.xlu1 %v1139_v47  ;;  %v1136_v48 = vsel %vm673_vm0, %v1128_v46, 0.0  ;;  %v1265_v46 = vld [vmem:[%s6959_s13 + $0x68] sm:$0xff]  ;;  %v5020_v47 = vpack.c.bf16 %v1256_v44, %v1252_v4 }
 0x493   : > { %1137 = vadd.xlane.f32.xlu0 %v1136_v48  ;;  %v5022_v48 = vpack.c.bf16 %v1265_v46, %v1261_v45 }
 0x51b   : > { %v1135_v49 = vpop.xlane.xlu1 %1134 }
 0x51c   : > { %v1143_v50 = vmul.f32 0.03125, %v1135_v49  ;;  %v1132_v51 = vpop.xlane.xlu0 %1131  ;;  %v1260_v49 = vld [vmem:[%s6959_s13 + $0x40] sm:$0xff] }
 0x51d   : > { %v1142_v52 = vmul.f32 0.03125, %v1132_v51 }
 0x51e   : > { %v1147_v53 = vadd.f32 1e-05, %v1143_v50  ;;  %v1264_v50 = vld [vmem:[%s6959_s13 + $0x60] sm:$0xff] }
 0x51f   : > { %v1146_v54 = vadd.f32 1e-05, %v1142_v52  ;;  %v1141_v55 = vpop.xlane.xlu1 %1140  ;;  %v5024_v51 = vpack.c.bf16 %v1264_v50, %v1260_v49  ;;  %v1255_v52 = vld [vmem:[%s6959_s13 + $0x18] sm:$0xff] }
 0x520   : > { %5357 = vrsqrt.f32 %v1147_v53  ;;  %v1145_v56 = vmul.f32 0.03125, %v1141_v55  ;;  %v1138_v57 = vpop.xlane.xlu0 %1137  ;;  %v1259_v53 = vld [vmem:[%s6959_s13 + $0x38] sm:$0xff] }
 0x521   : > { %5359 = vrsqrt.f32 %v1146_v54  ;;  %v1144_v58 = vmul.f32 0.03125, %v1138_v57  ;;  %v5026_v54 = vpack.c.bf16 %v1259_v53, %v1255_v52 }
 0x522   : > { %v1149_v59 = vadd.f32 1e-05, %v1145_v56 }
 0x523   : > { %v1148_v61 = vadd.f32 1e-05, %v1144_v58 }
 0x524   : > { %5361 = vrsqrt.f32 %v1149_v59 }
 0x525   : > { %5363 = vrsqrt.f32 %v1148_v61 }
 0x52a   : > { %v5358_v62 = vpop.eup %5357 }
 0x52b   : > { %v5360_v0 = vpop.eup %5359  ;;  %v1155_v2 = vmul.f32 %v5358_v62, %v1123_v34 }
 0x52c   : > { %v1154_v5 = vmul.f32 %v5360_v0, %v1122_v35 }
 0x52d   : > { %v1165_v7 = vmul.f32 %v4297_v63, %v1155_v2 }
 0x52e   : > { %v5362_v8 = vpop.eup %5361  ;;  %v1164_v9 = vmul.f32 %v4297_v63, %v1154_v5 }
 0x52f   : > { %v5364_v10 = vpop.eup %5363  ;;  %v1175_v11 = vadd.f32 %v4298_v3, %v1165_v7  ;;  %v1157_v12 = vmul.f32 %v5362_v8, %v1125_v42  ;;  %v1257_v42 = vld [vmem:[%s6959_s13 + $0x28] sm:$0xff] }
 0x530   : > { %v1174_v13 = vadd.f32 %v4298_v3, %v1164_v9  ;;  %v1156_v14 = vmul.f32 %v5364_v10, %v1124_v43  ;;  %v5018_v43 = vpack.c.bf16 %v1257_v42, %v1253_v6  ;;  %v4299_v9 = vld [vmem:[%s6957_s11] ss:$0 sm:$0xff] }
 0x531   : > { %v1183_v15 = vsel %vm673_vm0, %v1175_v11, 0.0  ;;  %v1167_v16 = vmul.f32 %v4297_v63, %v1157_v12  ;;  %v1254_v12 = vld [vmem:[%s6959_s13 + $0x10] sm:$0xff] }
 0x532   : > { %1184 = vadd.xlane.f32.xlu1 %v1183_v15  ;;  %v1180_v17 = vsel %vm673_vm0, %v1174_v13, 0.0  ;;  %v1166_v18 = vmul.f32 %v4297_v63, %v1156_v14  ;;  %5019 = vmatprep.subr.bf16.mxu1 %v5018_v43  ;;  %v4300_v14 = vld [vmem:[%s6958_s12] ss:$0 sm:$0xff]  ;;  %v1263_v15 = vld [vmem:[%s6959_s13 + $0x58] sm:$0xff] }
 0x533   : > { %1181 = vadd.xlane.f32.xlu0 %v1180_v17  ;;  %v1177_v19 = vadd.f32 %v4298_v3, %v1167_v16  ;;  %5021 = vmatpush1.bf16.msra.mxu1 %v5020_v47  ;;  %v1267_v16 = vld [vmem:[%s6959_s13 + $0x78] sm:$0xff] }
 0x534   : > { %v1176_v20 = vadd.f32 %v4298_v3, %v1166_v18  ;;  %5023 = vmatprep.subr.bf16.mxu1 %v5022_v48 }
 0x535   : > { %v1189_v21 = vsel %vm673_vm0, %v1177_v19, 0.0 }
 0x536   : > { %1190 = vadd.xlane.f32.xlu1 %v1189_v21  ;;  %v1186_v22 = vsel %vm673_vm0, %v1176_v20, 0.0 }
 0x537   : > { %1187 = vadd.xlane.f32.xlu0 %v1186_v22  ;;  %5025 = vmatpush1.bf16.msra.mxu1 %v5024_v51 }
 0x538   : > { %5027 = vmatprep.subr.bf16.mxu1 %v5026_v54 }
 0x5bf   : > { %v1185_v23 = vpop.xlane.xlu1 %1184 }
 0x5c0   : > { %v1193_v24 = vmul.f32 0.03125, %v1185_v23  ;;  %v1182_v25 = vpop.xlane.xlu0 %1181  ;;  %v5030_v23 = vpack.c.bf16 %v1267_v16, %v1263_v15 }
 0x5c1   : > { %v1192_v26 = vmul.f32 0.03125, %v1182_v25  ;;  %v1266_v25 = vld [vmem:[%s6959_s13 + $0x70] sm:$0xff] }
 0x5c2   : > { %v1197_v27 = vsub.f32 %v1175_v11, %v1193_v24  ;;  %v1262_v24 = vld [vmem:[%s6959_s13 + $0x50] sm:$0xff] }
 0x5c3   : > { %v1196_v28 = vsub.f32 %v1174_v13, %v1192_v26  ;;  %v1191_v29 = vpop.xlane.xlu1 %1190  ;;  %v1258_v13 = vld [vmem:[%s6959_s13 + $0x30] sm:$0xff] }
 0x5c4   : > { %v1195_v30 = vmul.f32 0.03125, %v1191_v29  ;;  %v1188_v1 = vpop.xlane.xlu0 %1187  ;;  %v1201_v60 = vmul.f32 %v1197_v27, %v1197_v27 }
 0x5c5   : > { %v1194_v31 = vmul.f32 0.03125, %v1188_v1  ;;  %v1200_v32 = vmul.f32 %v1196_v28, %v1196_v28 }
 0x5c6   : > { %v5943_v33 = vsub.f32 %v1177_v19, %v1195_v30  ;;  %v1207_v34 = vsel %vm673_vm0, %v1201_v60, 0.0  ;;  %v5028_v19 = vpack.c.bf16 %v1258_v13, %v1254_v12 }
 0x5c7   : > { %v1198_v35 = vsub.f32 %v1176_v20, %v1194_v31  ;;  %1208 = vadd.xlane.f32.xlu1 %v1207_v34  ;;  %v1204_v36 = vsel %vm673_vm0, %v1200_v32, 0.0 }
 0x5c8   : > { %1205 = vadd.xlane.f32.xlu0 %v1204_v36  ;;  %v1203_v37 = vmul.f32 %v5943_v33, %v5943_v33 }
 0x5c9   : > { %v1202_v39 = vmul.f32 %v1198_v35, %v1198_v35 }
 0x5ca   : > { %v1213_v40 = vsel %vm673_vm0, %v1203_v37, 0.0 }
 0x5cb   : > { %1214 = vadd.xlane.f32.xlu1 %v1213_v40  ;;  %v1210_v41 = vsel %vm673_vm0, %v1202_v39, 0.0 }
 0x5cc   : > { %1211 = vadd.xlane.f32.xlu0 %v1210_v41 }
 0x654   : > { %v1209_v55 = vpop.xlane.xlu1 %1208 }
 0x655   : > { %v1217_v56 = vmul.f32 0.03125, %v1209_v55  ;;  %v1206_v57 = vpop.xlane.xlu0 %1205 }
 0x656   : > { %v1216_v58 = vmul.f32 0.03125, %v1206_v57 }
 0x657   : > { %v1221_v59 = vadd.f32 1e-05, %v1217_v56 }
 0x658   : > { %v1220_v61 = vadd.f32 1e-05, %v1216_v58  ;;  %v1215_v62 = vpop.xlane.xlu1 %1214 }
 0x659   : > { %5365 = vrsqrt.f32 %v1221_v59  ;;  %v1219_v63 = vmul.f32 0.03125, %v1215_v62  ;;  %v1212_v0 = vpop.xlane.xlu0 %1211  ;;  %v6115_v62 = vld [vmem:[%s7016_s5] sm:$0xff] }
 0x65a   : > { %5367 = vrsqrt.f32 %v1220_v61  ;;  %v1218_v2 = vmul.f32 0.03125, %v1212_v0  ;;  %v6110_v61 = vld [vmem:[%s7016_s5 + $0x8] sm:$0xff]  ;;  %vm667_vm4 = vcmp.gt.f32.partialorder %v6115_v62, 0.5 }
 0x65b   : > { %v1223_v3 = vadd.f32 1e-05, %v1219_v63  ;;  %vm668_vm3 = vcmp.gt.f32.partialorder %v6110_v61, 0.5  ;;  %v6122_v63 = vld [vmem:[%s7016_s5 + $0x18] sm:$0xff] }
 0x65c   : > { %v1222_v5 = vadd.f32 1e-05, %v1218_v2  ;;  %v6127_v2 = vld [vmem:[%s7016_s5 + $0x10] sm:$0xff]  ;;  %vm670_vm5 = vcmp.gt.f32.partialorder %v6122_v63, 0.5  ;;  %s5615_s5 = smov [#allocation2]  }
 0x65d   : > { %vm669_vm6 = vcmp.gt.f32.partialorder %v6127_v2, 0.5  ;;  %s5553_s21 = sshll.u32 %s5615_s5, 4  ;;  %s5554_s21 = int_to_ptr.vmem [resolvable:$false] %s5553_s21 }
 0x65e   : > { %5369 = vrsqrt.f32 %v1222_v5 }
 0x65f   : > { %5371 = vrsqrt.f32 %v1223_v3 }
 0x663   : > { %v5366_v7 = vpop.eup %5365 }
 0x664   : > { %v5368_v8 = vpop.eup %5367  ;;  %v1229_v11 = vmul.f32 %v5366_v7, %v1197_v27  ;;  %v5032_v27 = vpack.c.bf16 %v1266_v25, %v1262_v24 }
 0x665   : > { %v1228_v10 = vmul.f32 %v5368_v8, %v1196_v28 }
 0x666   : > { %v1239_v21 = vmul.f32 %v4299_v9, %v1229_v11 }
 0x667   : > { %v1238_v17 = vmul.f32 %v4299_v9, %v1228_v10 }
 0x668   : > { %v5370_v18 = vpop.eup %5369  ;;  %v6010_v28 = vadd.f32 %v4300_v14, %v1239_v21 }
 0x669   : > { %v5999_v20 = vadd.f32 %v4300_v14, %v1238_v17  ;;  %v1230_v22 = vmul.f32 %v5370_v18, %v1198_v35  ;;  %v5372_v26 = vpop.eup %5371 }
 0x66a   : > { %v1231_v30 = vmul.f32 %v5372_v26, %v5943_v33 }
 0x66b   : > { %4301 = vmatmul.mubr.msk.f32.vlgmr.msra.gmra.mrb[0].mxu1 %vm673_vm0, %v5999_v20  ;;  %v1240_v29 = vmul.f32 %v4299_v9, %v1230_v22 }
 0x66c   : > { %1350 = vmatprep.mubr.f32.mxu1 %v5613_v38  ;;  %5029 = vmatpush1.bf16.msra.mxu1 %v5028_v19  ;;  %v1241_v60 = vmul.f32 %v4299_v9, %v1231_v30 }
 0x66d   : > { %5031 = vmatprep.subr.bf16.mxu1 %v5030_v23  ;;  %v6016_v1 = vadd.f32 %v4300_v14, %v1240_v29 }
 0x66e   : > { %v6021_v31 = vadd.f32 %v4300_v14, %v1241_v60 }
 0x66f   : > { %4302 = vmatmul.mubr.msk.f32.gmra.mrb[2].mxu1 %vm673_vm0, %v6010_v28 }
 0x670   : > { %1356 = vmatprep.mubr.f32.mxu1 %v5613_v38  ;;  %5033 = vmatpush1.bf16.msra.mxu1 %v5032_v27 }
 0x673   : > { %4303 = vmatmul.mubr.msk.f32.gmra.mrb[4].mxu1 %vm673_vm0, %v6016_v1 }
 0x674   : > { %1362 = vmatprep.mubr.f32.mxu1 %v5613_v38 }
 0x677   : > { %4304 = vmatmul.mubr.msk.f32.gmra.mrb[6].mxu1 %vm673_vm0, %v6021_v31 }
 0x678   : > { %1433 = vmatprep.mubr.f32.mxu1 %v5613_v38 }
 0x67b   : > { %4305 = vmatmul.mubr.msk.f32.vlgmr.msra.gmra.mrb[8].mxu1 %vm673_vm0, %v5999_v20 }
 0x67c   : > { %1439 = vmatprep.mubr.f32.mxu1 %v5613_v38 }
 0x67f   : > { %4306 = vmatmul.mubr.msk.f32.gmra.mrb[10].mxu1 %vm673_vm0, %v6010_v28 }
 0x680   : > { %1445 = vmatprep.mubr.f32.mxu1 %v5613_v38 }
 0x683   : > { %4307 = vmatmul.mubr.msk.f32.gmra.mrb[12].mxu1 %vm673_vm0, %v6016_v1 }
 0x684   : > { %1451 = vmatprep.mubr.f32.mxu1 %v5613_v38 }
 0x687   : > { %4308 = vmatmul.mubr.msk.f32.gmra.mrb[14].mxu1 %vm673_vm0, %v6021_v31 }
 0x73e   : > { %v1346_v32 = vpop.f32.mrb[0].mxu1 }
 0x73f   : > { %v6037_v33 = vmul.f32 0.125, %v1346_v32  ;;  %v6039_v34 = vpop.f32.mrb[1].mxu1 }
 0x741   : > { %4726 = vmatprep.mubr.msk.f32.mxu1 %vm1489_vm1, %v6037_v33 }
 0x742   : > { %v1352_v35 = vpop.f32.mrb[2].mxu1 }
 0x743   : > { %v6043_v36 = vpop.f32.mrb[3].mxu1  ;;  %v6083_v51 = vmul.f32 0.125, %v1352_v35 }
 0x744   : > { %v5293_v39 = vpack.i.bf16 %v6043_v36, %v6039_v34  ;;  %v5034_v40 = vpack.c.bf16 %v6043_v36, %v6039_v34 }
 0x746   : > { %v1358_v41 = vpop.f32.mrb[4].mxu1  ;;  %5036 = vmatprep.subr.msk.bf16.mxu1 %vm6047_vm2, %v5034_v40 }
 0x747   : > { %v6057_v6 = vpop.f32.mrb[5].mxu1  ;;  %5039 = vmatpush3.bf16.xpose.msk.msra.mxu1 %vm6047_vm2, %v5034_v40  ;;  %v6085_v52 = vmul.f32 0.125, %v1358_v41 }
 0x74a   : > { %v1364_v42 = vpop.f32.mrb[6].mxu1 }
 0x74b   : > { %v6061_v4 = vpop.f32.mrb[7].mxu1  ;;  %v6095_v55 = vmul.f32 0.125, %v1364_v42 }
 0x74c   : > { %v5298_v43 = vpack.i.bf16 %v6061_v4, %v6057_v6  ;;  %v5040_v44 = vpack.c.bf16 %v6061_v4, %v6057_v6 }
 0x74e   : > { %v6067_v45 = vpop.f32.mrb[8].mxu1  ;;  %5042 = vmatprep.subr.msk.bf16.mxu1 %vm6047_vm2, %v5040_v44 }
 0x74f   : > { %v6071_v46 = vpop.f32.mrb[9].mxu1  ;;  %5045 = vmatpush3.bf16.xpose.msk.msra.mxu1 %vm6047_vm2, %v5040_v44 }
 0x752   : > { %v6075_v47 = vpop.f32.mrb[10].mxu1 }
 0x753   : > { %v5303_v48 = vpack.i.bf16 %v6075_v47, %v6067_v45  ;;  %v5046_v49 = vpack.c.bf16 %v6075_v47, %v6067_v45  ;;  %v6081_v50 = vpop.f32.mrb[11].mxu1 }
 0x755   : > { %5047 = vmatprep.subr.bf16.mxu0 %v5046_v49 }
 0x756   : > { %v6087_v53 = vpop.f32.mrb[12].mxu1  ;;  %4727 = vmatmul.mubr.msk.f32.vlgmr.msra.gmra.mrb[16].mxu1 %vm1489_vm1, %v6083_v51  ;;  %5049 = vmatpush3.bf16.msra.mxu0 %v5046_v49 }
 0x757   : > { %v6091_v54 = vpop.f32.mrb[13].mxu1  ;;  %4729 = vmatprep.mubr.msk.f32.mxu1 %vm1489_vm1, %v6085_v52 }
 0x75a   : > { %v6097_v56 = vpop.f32.mrb[14].mxu1  ;;  %4730 = vmatmul.mubr.msk.f32.gmra.mrb[18].mxu1 %vm1489_vm1, %v6095_v55 }
 0x75b   : > { %v5308_v57 = vpack.i.bf16 %v6097_v56, %v6087_v53  ;;  %v5050_v58 = vpack.c.bf16 %v6097_v56, %v6087_v53  ;;  %v6105_v59 = vpop.f32.mrb[15].mxu1 }
 0x75d   : > { %5051 = vmatprep.subr.bf16.mxu0 %v5050_v58 }
 0x75e   : > { %5053 = vmatpush3.bf16.msra.mxu0 %v5050_v58 }
 0x829   : > { %v4728_v0 = vpop.f32.mrb[16].mxu1 }
 0x82a   : > { %v1600_v3 = vsel %vm668_vm3, %v4728_v0, -1e+30  ;;  %v1580_v5 = vpop.f32.mrb[17].mxu1 }
 0x82b   : > { %v1599_v7 = vsel %vm667_vm4, %v1580_v5, -1e+30  ;;  %v1606_v8 = vsel %vm673_vm0, %v1600_v3, -inf }
 0x82c   : > { %1607 = vmax.xlane.f32.xlu1 %v1606_v8  ;;  %v1603_v9 = vsel %vm673_vm0, %v1599_v7, -inf }
 0x82d   : > { %1604 = vmax.xlane.f32.xlu0 %v1603_v9  ;;  %v4731_v10 = vpop.f32.mrb[18].mxu1 }
 0x82e   : > { %v1602_v11 = vsel %vm670_vm5, %v4731_v10, -1e+30  ;;  %v1590_v12 = vpop.f32.mrb[19].mxu1 }
 0x82f   : > { %v1601_v13 = vsel %vm669_vm6, %v1590_v12, -1e+30  ;;  %v1612_v14 = vsel %vm673_vm0, %v1602_v11, -inf }
 0x830   : > { %1613 = vmax.xlane.f32.xlu1 %v1612_v14  ;;  %v1609_v15 = vsel %vm673_vm0, %v1601_v13, -inf }
 0x831   : > { %1610 = vmax.xlane.f32.xlu0 %v1609_v15 }
 0x8b9   : > { %v1608_v16 = vpop.xlane.xlu1 %1607 }
 0x8ba   : > { %v1616_v17 = vsub.f32 %v1600_v3, %v1608_v16  ;;  %v1605_v18 = vpop.xlane.xlu0 %1604 }
 0x8bb   : > { %v1615_v19 = vsub.f32 %v1599_v7, %v1605_v18 }
 0x8bc   : > { %v1621_v21 = vmul.f32 1.442695, %v1616_v17 }
 0x8bd   : > { %v1619_v22 = vmul.f32 1.442695, %v1615_v19  ;;  %v1614_v23 = vpop.xlane.xlu1 %1613 }
 0x8be   : > { %5373 = vpow2.f32 %v1621_v21  ;;  %v1618_v24 = vsub.f32 %v1602_v11, %v1614_v23  ;;  %v1611_v25 = vpop.xlane.xlu0 %1610 }
 0x8bf   : > { %5375 = vpow2.f32 %v1619_v22  ;;  %v1617_v26 = vsub.f32 %v1601_v13, %v1611_v25 }
 0x8c0   : > { %v1625_v27 = vmul.f32 1.442695, %v1618_v24 }
 0x8c1   : > { %v1623_v29 = vmul.f32 1.442695, %v1617_v26 }
 0x8c2   : > { %5377 = vpow2.f32 %v1625_v27 }
 0x8c3   : > { %5379 = vpow2.f32 %v1623_v29 }
 0x8c8   : > { %v5374_v30 = vpop.eup %5373 }
 0x8c9   : > { %v5376_v60 = vpop.eup %5375  ;;  %v1630_v32 = vsel %vm673_vm0, %v5374_v30, 0.0 }
 0x8ca   : > { %1631 = vadd.xlane.f32.xlu1 %v1630_v32  ;;  %v1627_v35 = vsel %vm673_vm0, %v5376_v60, 0.0 }
 0x8cb   : > { %1628 = vadd.xlane.f32.xlu0 %v1627_v35 }
 0x8cc   : > { %v5378_v40 = vpop.eup %5377 }
 0x8cd   : > { %v5380_v41 = vpop.eup %5379  ;;  %v1636_v42 = vsel %vm673_vm0, %v5378_v40, 0.0 }
 0x8ce   : > { %1637 = vadd.xlane.f32.xlu1 %v1636_v42  ;;  %v1633_v44 = vsel %vm673_vm0, %v5380_v41, 0.0 }
 0x8cf   : > { %1634 = vadd.xlane.f32.xlu0 %v1633_v44 }
 0x8df   : > { %5299 = vrot.lane.b32.xlu1 %v5298_v43, %s5614_s28 }
 0x8e3   : > { %1772 = vrot.lane.b32.xlu1 %v6037_v33, %s5614_s28 }
 0x8e5   : > { %5294 = vrot.lane.b32.xlu0 %v5293_v39, %s5614_s28 }
 0x8e7   : > { %1774 = vrot.lane.b32.xlu1 %v6083_v51, %s5614_s28 }
 0x8e9   : > { %1776 = vrot.lane.b32.xlu0 %v6085_v52, %s5614_s28 }
 0x8eb   : > { %1778 = vrot.lane.b32.xlu1 %v6095_v55, %s5614_s28 }
 0x957   : > { %v1632_v49 = vpop.xlane.xlu1 %1631 }
 0x958   : > { %5381 = vrcp.f32 %v1632_v49  ;;  %v1629_v6 = vpop.xlane.xlu0 %1628 }
 0x959   : > { %5383 = vrcp.f32 %v1629_v6 }
 0x95b   : > { %v1638_v4 = vpop.xlane.xlu1 %1637 }
 0x95c   : > { %5385 = vrcp.f32 %v1638_v4  ;;  %v1635_v33 = vpop.xlane.xlu0 %1634 }
 0x95d   : > { %5387 = vrcp.f32 %v1635_v33 }
 0x95f   : > { %v5300_v43 = vpop.permute.xlu1 %5299 }
 0x960   : > { %v5295_v34 = vpop.permute.xlu0 %5294  ;;  %v5302_v0 = vunpack.i.h.bf16 %v5300_v43  ;;  %v5301_v3 = vunpack.i.l.bf16 %v5300_v43  ;;  %v4309_v43 = vld [vmem:[%s6960_s14] ss:$0 sm:$0xff] }
 0x961   : > { %v5297_v36 = vunpack.i.h.bf16 %v5295_v34  ;;  %v5296_v39 = vunpack.i.l.bf16 %v5295_v34 }
 0x962   : > { %v5382_v58 = vpop.eup %5381  ;;  %v5060_v9 = vpack.c.bf16 %v5302_v0, %v5301_v3 }
 0x963   : > { %v5384_v51 = vpop.eup %5383  ;;  %v5054_v52 = vpack.c.bf16 %v5297_v36, %v5296_v39  ;;  %v1642_v7 = vmul.f32 %v5382_v58, %v5374_v30  ;;  %v1773_v12 = vpop.permute.xlu1 %1772  ;;  %v1469_v58 = vadd.f32 %v4309_v43, %v6071_v46 }
 0x964   : > { %v1640_v5 = vmul.f32 %v5384_v51, %v5376_v60  ;;  %v1777_v14 = vpop.permute.xlu0 %1776  ;;  %v1471_v51 = vadd.f32 %v4309_v43, %v6091_v54  ;;  %v1472_v54 = vadd.f32 %v4309_v43, %v6105_v59 }
 0x965   : > { %5056 = vmatprep.subr.msk.bf16.mxu0 %vm6047_vm2, %v5054_v52 }
 0x966   : > { %v5386_v55 = vpop.eup %5385  ;;  %4740 = vmatprep.mubr.msk.f32.mxu0 %vm673_vm0, %v1640_v5  ;;  %v1470_v5 = vadd.f32 %v4309_v43, %v6081_v50  ;;  %v4325_v50 = vmul.f32 -1.442695, %v1472_v54  ;;  %v1473_v54 = vld [vmem:[%s6961_s15] sm:$0xff] }
 0x967   : > { %v5388_v8 = vpop.eup %5387  ;;  %4741 = vmatmul.mubr.msk.f32.vlgmr.msra.gmra.mrb[16].mxu0 %vm673_vm0, %v1642_v7  ;;  %v1646_v11 = vmul.f32 %v5386_v55, %v5378_v40  ;;  %v1775_v13 = vpop.permute.xlu1 %1774  ;;  %v4324_v55 = vmul.f32 -1.442695, %v1471_v51 }
 0x968   : > { %5059 = vmatpush3.bf16.xpose.msk.msra.mxu0 %vm6047_vm2, %v5054_v52  ;;  %v1644_v10 = vmul.f32 %v5388_v8, %v5380_v41  ;;  %v4322_v52 = vmul.f32 -1.442695, %v1469_v58  ;;  %v4323_v46 = vmul.f32 -1.442695, %v1470_v5  ;;  %v1485_v5 = vld [vmem:[%s6961_s15 + $0x60] sm:$0xff] }
 0x969   : > { %5062 = vmatprep.subr.msk.bf16.mxu0 %vm6047_vm2, %v5060_v9 }
 0x96a   : > { %4743 = vmatprep.mubr.msk.f32.mxu0 %vm673_vm0, %v1644_v10 }
 0x96b   : > { %4744 = vmatmul.mubr.msk.f32.gmra.mrb[18].mxu0 %vm673_vm0, %v1646_v11  ;;  %v1779_v15 = vpop.permute.xlu1 %1778 }
 0x96c   : > { %4754 = vmatprep.mubr.msk.f32.mxu0 %vm1489_vm1, %v1773_v12 }
 0x970   : > { %5065 = vmatpush3.bf16.xpose.msk.msra.mxu0 %vm6047_vm2, %v5060_v9 }
 0x977   : > { %4755 = vmatmul.mubr.msk.f32.vlgmr.msra.gmra.mrb[20].mxu0 %vm1489_vm1, %v1775_v13 }
 0x978   : > { %4757 = vmatprep.mubr.msk.f32.mxu0 %vm1489_vm1, %v1777_v14 }
 0x97b   : > { %4758 = vmatmul.mubr.msk.f32.gmra.mrb[22].mxu0 %vm1489_vm1, %v1779_v15 }
 0x97c   : > { %2592 = vmatprep.mubr.f32.mxu0 %v5613_v38 }
 0xa3a   : > { %v6180_v16 = vpop.f32.mrb[16].mxu0 }
 0xa3b   : > { %v6182_v17 = vpop.f32.mrb[17].mxu0 }
 0xa3e   : > { %v6184_v18 = vpop.f32.mrb[18].mxu0 }
 0xa3f   : > { %v6186_v19 = vpop.f32.mrb[19].mxu0 }
 0xa4a   : > { %v4756_v21 = vpop.f32.mrb[20].mxu0 }
 0xa4b   : > { %v1890_v22 = vsel %vm668_vm3, %v4756_v21, -1e+30  ;;  %v1870_v23 = vpop.f32.mrb[21].mxu0 }
 0xa4c   : > { %v1889_v24 = vsel %vm667_vm4, %v1870_v23, -1e+30  ;;  %v1896_v25 = vsel %vm673_vm0, %v1890_v22, -inf }
 0xa4d   : > { %1897 = vmax.xlane.f32.xlu1 %v1896_v25  ;;  %v1893_v26 = vsel %vm673_vm0, %v1889_v24, -inf }
 0xa4e   : > { %1894 = vmax.xlane.f32.xlu0 %v1893_v26  ;;  %v4759_v27 = vpop.f32.mrb[22].mxu0 }
 0xa4f   : > { %v1880_v29 = vpop.f32.mrb[23].mxu0  ;;  %v1892_v32 = vsel %vm670_vm5, %v4759_v27, -1e+30 }
 0xa50   : > { %v1891_v30 = vsel %vm669_vm6, %v1880_v29, -1e+30  ;;  %v1902_v35 = vsel %vm673_vm0, %v1892_v32, -inf }
 0xa51   : > { %v1899_v60 = vsel %vm673_vm0, %v1891_v30, -inf }
 0xa52   : > { %1900 = vmax.xlane.f32.xlu0 %v1899_v60 }
 0xa56   : > { %1903 = vmax.xlane.f32.xlu0 %v1902_v35 }
 0xada   : > { %v1898_v40 = vpop.xlane.xlu1 %1897 }
 0xadb   : > { %v1906_v41 = vsub.f32 %v1890_v22, %v1898_v40  ;;  %v1895_v42 = vpop.xlane.xlu0 %1894 }
 0xadc   : > { %v1905_v44 = vsub.f32 %v1889_v24, %v1895_v42  ;;  %v1481_v42 = vld [vmem:[%s6961_s15 + $0x40] sm:$0xff] }
 0xadd   : > { %v1911_v49 = vmul.f32 1.442695, %v1906_v41 }
 0xade   : > { %v1909_v6 = vmul.f32 1.442695, %v1905_v44  ;;  %v1482_v44 = vld [vmem:[%s6961_s15 + $0x48] sm:$0xff] }
 0xadf   : > { %5389 = vpow2.f32 %v1911_v49  ;;  %v1901_v4 = vpop.xlane.xlu0 %1900 }
 0xae0   : > { %5391 = vpow2.f32 %v1909_v6  ;;  %v1907_v33 = vsub.f32 %v1891_v30, %v1901_v4 }
 0xae2   : > { %v1913_v34 = vmul.f32 1.442695, %v1907_v33  ;;  %v5074_v33 = vpack.c.bf16 %v1482_v44, %v1481_v42  ;;  %v4346_v44 = vld [vmem:[%s6962_s16] ss:$0 sm:$0xff] }
 0xae3   : > { %v1904_v36 = vpop.xlane.xlu0 %1903 }
 0xae4   : > { %5393 = vpow2.f32 %v1913_v34  ;;  %v1908_v39 = vsub.f32 %v1892_v32, %v1904_v36  ;;  %v1483_v34 = vld [vmem:[%s6961_s15 + $0x50] sm:$0xff]  ;;  %v1484_v36 = vld [vmem:[%s6961_s15 + $0x58] sm:$0xff] }
 0xae5   : > { %v5078_v51 = vpack.c.bf16 %v1484_v36, %v1483_v34 }
 0xae6   : > { %v1915_v0 = vmul.f32 1.442695, %v1908_v39 }
 0xae8   : > { %5395 = vpow2.f32 %v1915_v0 }
 0xae9   : > { %v6205_v3 = vpop.eup %5389  ;;  %5397 = vpow2.f32 %v4322_v52 }
 0xaea   : > { %v5392_v7 = vpop.eup %5391  ;;  %v1920_v8 = vsel %vm673_vm0, %v6205_v3, 0.0  ;;  %5399 = vpow2.f32 %v4324_v55 }
 0xaeb   : > { %1921 = vadd.xlane.f32.xlu1 %v1920_v8  ;;  %v1917_v9 = vsel %vm673_vm0, %v5392_v7, 0.0  ;;  %5401 = vpow2.f32 %v4323_v46  ;;  %v1487_v8 = vld [vmem:[%s6961_s15 + $0x70] sm:$0xff] }
 0xaec   : > { %1918 = vadd.xlane.f32.xlu0 %v1917_v9  ;;  %5403 = vpow2.f32 %v4325_v50  ;;  %v1488_v9 = vld [vmem:[%s6961_s15 + $0x78] sm:$0xff] }
 0xaed   : > { %v5086_v46 = vpack.c.bf16 %v1488_v9, %v1487_v8 }
 0xaee   : > { %v6212_v10 = vpop.eup %5393 }
 0xaef   : > { %v1923_v11 = vsel %vm673_vm0, %v6212_v10, 0.0 }
 0xaf0   : > { %1924 = vadd.xlane.f32.xlu0 %v1923_v11 }
 0xaf2   : > { %v6216_v12 = vpop.eup %5395 }
 0xaf3   : > { %v1926_v13 = vsel %vm673_vm0, %v6216_v12, 0.0  ;;  %v5398_v14 = vpop.eup %5397 }
 0xaf4   : > { %1927 = vadd.xlane.f32.xlu1 %v1926_v13  ;;  %v5400_v15 = vpop.eup %5399  ;;  %v1756_v21 = vadd.f32 1.0, %v5398_v14  ;;  %v1475_v14 = vld [vmem:[%s6961_s15 + $0x10] sm:$0xff] }
 0xaf5   : > { %v5402_v59 = vpop.eup %5401  ;;  %v1758_v22 = vadd.f32 1.0, %v5400_v15  ;;  %v1476_v15 = vld [vmem:[%s6961_s15 + $0x18] sm:$0xff] }
 0xaf6   : > { %5405 = vrcp.f32 %v1756_v21  ;;  %v1757_v23 = vadd.f32 1.0, %v5402_v59  ;;  %v5404_v24 = vpop.eup %5403 }
 0xaf7   : > { %5407 = vrcp.f32 %v1758_v22  ;;  %v1759_v25 = vadd.f32 1.0, %v5404_v24 }
 0xaf8   : > { %5409 = vrcp.f32 %v1757_v23  ;;  %v5094_v23 = vpack.c.bf16 %v1476_v15, %v1475_v14 }
 0xaf9   : > { %5411 = vrcp.f32 %v1759_v25  ;;  %v1477_v25 = vld [vmem:[%s6961_s15 + $0x20] sm:$0xff] }
 0xb00   : > { %v6228_v26 = vpop.eup %5405 }
 0xb01   : > { %v6230_v27 = vpop.eup %5407 }
 0xb02   : > { %v6236_v29 = vpop.eup %5409 }
 0xb03   : > { %v6240_v53 = vpop.eup %5411 }
 0xb04   : > { %v1771_v42 = vmul.f32 %v6240_v53, %v6184_v18 }
 0xb05   : > { %5309 = vrot.lane.b32.xlu1 %v5308_v57, %s5614_s28 }
 0xb06   : > { %5304 = vrot.lane.b32.xlu0 %v5303_v48, %s5614_s28 }
 0xb09   : > { %2054 = vrot.lane.b32.xlu1 %v6228_v26, %s5614_s28 }
 0xb0a   : > { %2058 = vrot.lane.b32.xlu0 %v6230_v27, %s5614_s28 }
 0xb0d   : > { %2056 = vrot.lane.b32.xlu1 %v6236_v29, %s5614_s28 }
 0xb11   : > { %2060 = vrot.lane.b32.xlu1 %v6240_v53, %s5614_s28 }
 0xb78   : > { %v1922_v47 = vpop.xlane.xlu1 %1921 }
 0xb79   : > { %v1919_v45 = vpop.xlane.xlu0 %1918 }
 0xb7a   : > { %5413 = vrcp.f32 %v1919_v45  ;;  %v1478_v45 = vld [vmem:[%s6961_s15 + $0x28] sm:$0xff] }
 0xb7b   : > { %5415 = vrcp.f32 %v1922_v47 }
 0xb7d   : > { %v1925_v48 = vpop.xlane.xlu0 %1924 }
 0xb7e   : > { %5417 = vrcp.f32 %v1925_v48 }
 0xb81   : > { %v1928_v56 = vpop.xlane.xlu1 %1927  ;;  %v5305_v57 = vpop.permute.xlu0 %5304 }
 0xb82   : > { %v5307_v30 = vunpack.i.h.bf16 %v5305_v57  ;;  %v5306_v60 = vunpack.i.l.bf16 %v5305_v57  ;;  %5419 = vrcp.f32 %v1928_v56 }
 0xb84   : > { %v5414_v32 = vpop.eup %5413  ;;  %v5066_v35 = vpack.c.bf16 %v5307_v30, %v5306_v60  ;;  %v5098_v60 = vpack.c.bf16 %v1478_v45, %v1477_v25 }
 0xb85   : > { %v5310_v40 = vpop.permute.xlu1 %5309  ;;  %v1930_v41 = vmul.f32 %v5414_v32, %v5392_v7  ;;  %v5416_v43 = vpop.eup %5415  ;;  %v1486_v7 = vld [vmem:[%s6961_s15 + $0x68] sm:$0xff]  ;;  %v1768_v32 = vmul.f32 %v6228_v26, %v6182_v17  ;;  %v1769_v17 = vmul.f32 %v6236_v29, %v6180_v16  ;;  %v1770_v26 = vmul.f32 %v6230_v27, %v6186_v19 }
 0xb86   : > { %v5312_v49 = vunpack.i.h.bf16 %v5310_v40  ;;  %v5311_v6 = vunpack.i.l.bf16 %v5310_v40  ;;  %5067 = vmatprep.subr.bf16.mxu1 %v5066_v35  ;;  %v1932_v58 = vmul.f32 %v5416_v43, %v6205_v3  ;;  %v5082_v55 = vpack.c.bf16 %v1486_v7, %v1485_v5  ;;  %v2059_v47 = vpop.permute.xlu0 %2058  ;;  %v1480_v40 = vld [vmem:[%s6961_s15 + $0x38] sm:$0xff] }
 0xb87   : > { %5069 = vmatpush3.bf16.msra.mxu1 %v5066_v35  ;;  %4768 = vmatprep.mubr.msk.f32.mxu1 %vm673_vm0, %v1930_v41  ;;  %v1479_v35 = vld [vmem:[%s6961_s15 + $0x30] sm:$0xff] }
 0xb88   : > { %v5070_v4 = vpack.c.bf16 %v5312_v49, %v5311_v6  ;;  %v5418_v39 = vpop.eup %5417  ;;  %v5102_v41 = vpack.c.bf16 %v1480_v40, %v1479_v35  ;;  %v4348_v40 = vld [vmem:[%s6964_s18] ss:$0 sm:$0xff] }
 0xb89   : > { %v1934_v52 = vmul.f32 %v5418_v39, %v6212_v10  ;;  %v1474_v10 = vld [vmem:[%s6961_s15 + $0x8] sm:$0xff]  ;;  %v2055_v50 = vpop.permute.xlu1 %2054 }
 0xb8a   : > { %5071 = vmatprep.subr.bf16.mxu1 %v5070_v4  ;;  %v5090_v11 = vpack.c.bf16 %v1474_v10, %v1473_v54 }
 0xb8b   : > { %5073 = vmatpush3.bf16.msra.mxu1 %v5070_v4 }
 0xb8c   : > { %5075 = vmatprep.subr.bf16.mxu1 %v5074_v33  ;;  %v5420_v0 = vpop.eup %5419 }
 0xb8d   : > { %v1936_v3 = vmul.f32 %v5420_v0, %v6216_v12  ;;  %v2057_v12 = vpop.permute.xlu1 %2056 }
 0xb8e   : > { %4769 = vmatmul.mubr.msk.f32.vlgmr.msra.gmra.mrb[20].mxu1 %vm673_vm0, %v1932_v58 }
 0xb8f   : > { %4771 = vmatprep.mubr.msk.f32.mxu1 %vm673_vm0, %v1934_v52  ;;  %5077 = vmatpush3.bf16.msra.mxu1 %v5074_v33 }
 0xb90   : > { %5079 = vmatprep.subr.bf16.mxu1 %v5078_v51 }
 0xb91   : > { %v2061_v56 = vpop.permute.xlu1 %2060 }
 0xb92   : > { %4772 = vmatmul.mubr.msk.f32.gmra.mrb[22].mxu1 %vm673_vm0, %v1936_v3 }
 0xb93   : > { %5081 = vmatpush3.bf16.msra.mxu1 %v5078_v51 }
 0xb94   : > { %5083 = vmatprep.subr.bf16.mxu1 %v5082_v55 }
 0xb97   : > { %5085 = vmatpush3.bf16.msra.mxu1 %v5082_v55 }
 0xb98   : > { %5087 = vmatprep.subr.bf16.mxu1 %v5086_v46 }
 0xb9b   : > { %5089 = vmatpush3.bf16.msra.mxu1 %v5086_v46 }
 0xb9c   : > { %5091 = vmatprep.subr.bf16.mxu1 %v5090_v11 }
 0xc61   : > { %v4770_v13 = vpop.f32.mrb[20].mxu1 }
 0xc62   : > { %v2031_v21 = vpop.f32.mrb[21].mxu1  ;;  %v2067_v22 = vmul.f32 %v4770_v13, %v2057_v12 }
 0xc63   : > { %v2066_v59 = vmul.f32 %v2055_v50, %v2031_v21 }
 0xc65   : > { %v4773_v24 = vpop.f32.mrb[22].mxu1  ;;  %4790 = vmatprep.mubr.msk.f32.mxu1 %vm1489_vm1, %v2066_v59 }
 0xc66   : > { %v2041_v48 = vpop.f32.mrb[23].mxu1  ;;  %4791 = vmatmul.mubr.msk.f32.vlgmr.msra.gmra.mrb[24].mxu1 %vm1489_vm1, %v2067_v22  ;;  %v2069_v30 = vmul.f32 %v4773_v24, %v2061_v56 }
 0xc67   : > { %v2068_v57 = vmul.f32 %v2059_v47, %v2041_v48  ;;  %5093 = vmatpush3.bf16.msra.mxu1 %v5090_v11 }
 0xc68   : > { %5095 = vmatprep.subr.bf16.mxu1 %v5094_v23 }
 0xc69   : > { %4793 = vmatprep.mubr.msk.f32.mxu1 %vm1489_vm1, %v2068_v57 }
 0xc6a   : > { %4794 = vmatmul.mubr.msk.f32.gmra.mrb[26].mxu1 %vm1489_vm1, %v2069_v30 }
 0xc6b   : > { %5097 = vmatpush3.bf16.msra.mxu1 %v5094_v23  ;;  %4812 = vmatprep.mubr.msk.f32.mxu1 %vm1489_vm1, %v1768_v32 }
 0xc6c   : > { %5099 = vmatprep.subr.bf16.mxu1 %v5098_v60 }
 0xc6f   : > { %5101 = vmatpush3.bf16.msra.mxu1 %v5098_v60  ;;  %v4347_v60 = vld [vmem:[%s6963_s17] ss:$0 sm:$0xff] }
 0xc70   : > { %5103 = vmatprep.subr.bf16.mxu1 %v5102_v41 }
 0xc73   : > { %5105 = vmatpush3.bf16.msra.mxu1 %v5102_v41 }
 0xc76   : > { %4813 = vmatmul.mubr.msk.f32.vlgmr.msra.gmra.mrb[24].mxu1 %vm1489_vm1, %v1769_v17 }
 0xc77   : > { %4815 = vmatprep.mubr.msk.f32.mxu1 %vm1489_vm1, %v1770_v26 }
 0xc7a   : > { %4816 = vmatmul.mubr.msk.f32.gmra.mrb[26].mxu1 %vm1489_vm1, %v1771_v42 }
 0xc7b   : > { %3101 = vmatprep.mubr.f32.mxu1 %v5613_v38 }
 0xd49   : > { %v4814_v49 = vpop.f32.mrb[24].mxu1 }
 0xd4a   : > { %v2272_v16 = vadd.f32 %v4814_v49, %v4346_v44  ;;  %v2245_v29 = vpop.f32.mrb[25].mxu1 }
 0xd4b   : > { %v2271_v6 = vadd.f32 %v4346_v44, %v2245_v29  ;;  %v5541_v29 = vld [vmem:[%s5781_s4 + $0x8] sm:$0xff] }
 0xd4c   : > { %v2276_v19 = vadd.f32 %v2272_v16, %v6010_v28 }
 0xd4d   : > { %v4817_v27 = vpop.f32.mrb[26].mxu1  ;;  %v2275_v4 = vadd.f32 %v2271_v6, %v5999_v20 }
 0xd4e   : > { %v2255_v33 = vpop.f32.mrb[27].mxu1  ;;  %v2284_v18 = vsel %vm673_vm0, %v2276_v19, 0.0  ;;  %v2274_v53 = vadd.f32 %v4817_v27, %v4346_v44 }
 0xd4f   : > { %v2273_v43 = vadd.f32 %v4346_v44, %v2255_v33  ;;  %2285 = vadd.xlane.f32.xlu1 %v2284_v18  ;;  %v2281_v34 = vsel %vm673_vm0, %v2275_v4, 0.0 }
 0xd50   : > { %2282 = vadd.xlane.f32.xlu0 %v2281_v34  ;;  %v2278_v58 = vadd.f32 %v2274_v53, %v6021_v31 }
 0xd51   : > { %v2277_v36 = vadd.f32 %v2273_v43, %v6016_v1 }
 0xd52   : > { %v2290_v28 = vsel %vm673_vm0, %v2278_v58, 0.0 }
 0xd53   : > { %v2287_v39 = vsel %vm673_vm0, %v2277_v36, 0.0 }
 0xd54   : > { %2288 = vadd.xlane.f32.xlu0 %v2287_v39 }
 0xd58   : > { %2291 = vadd.xlane.f32.xlu0 %v2290_v28 }
 0xddc   : > { %v2286_v20 = vpop.xlane.xlu1 %2285 }
 0xddd   : > { %v2294_v51 = vmul.f32 0.03125, %v2286_v20  ;;  %v2283_v0 = vpop.xlane.xlu0 %2282 }
 0xdde   : > { %v2293_v52 = vmul.f32 0.03125, %v2283_v0 }
 0xddf   : > { %v2298_v5 = vsub.f32 %v2276_v19, %v2294_v51  ;;  %v5542_v19 = vld [vmem:[%s5781_s4] sm:$0xff]  ;;  %v5544_v51 = vld [vmem:[%s5781_s4 + $0x18] sm:$0xff] }
 0xde0   : > { %v2297_v7 = vsub.f32 %v2275_v4, %v2293_v52 }
 0xde1   : > { %v2289_v3 = vpop.xlane.xlu0 %2288  ;;  %v2302_v55 = vmul.f32 %v2298_v5, %v2298_v5 }
 0xde2   : > { %v2295_v8 = vmul.f32 0.03125, %v2289_v3  ;;  %v2301_v9 = vmul.f32 %v2297_v7, %v2297_v7 }
 0xde3   : > { %v2308_v1 = vsel %vm673_vm0, %v2302_v55, 0.0 }
 0xde4   : > { %v2299_v46 = vsub.f32 %v2277_v36, %v2295_v8  ;;  %2309 = vadd.xlane.f32.xlu1 %v2308_v1  ;;  %v2305_v31 = vsel %vm673_vm0, %v2301_v9, 0.0  ;;  %v5543_v36 = vld [vmem:[%s5781_s4 + $0x10] sm:$0xff]  ;;  %s7020_s4 = sld [smem:[#allocation21_spill]] }
 0xde5   : > { %2306 = vadd.xlane.f32.xlu0 %v2305_v31  ;;  %v2292_v54 = vpop.xlane.xlu0 %2291 }
 0xde6   : > { %v2296_v10 = vmul.f32 0.03125, %v2292_v54  ;;  %v2303_v11 = vmul.f32 %v2299_v46, %v2299_v46 }
 0xde8   : > { %v2300_v50 = vsub.f32 %v2278_v58, %v2296_v10  ;;  %v2311_v12 = vsel %vm673_vm0, %v2303_v11, 0.0 }
 0xde9   : > { %2312 = vadd.xlane.f32.xlu0 %v2311_v12 }
 0xdea   : > { %v2304_v13 = vmul.f32 %v2300_v50, %v2300_v50  ;;  %s6898_s1 = scalar_lea.hbm %s7020_s4, %s4497_s30  ;;  %s5555_s30 = scalar_lea.vmem %s5554_s21, 1024 }
 0xdec   : > { %v2314_v14 = vsel %vm673_vm0, %v2304_v13, 0.0 }
 0xded   : > { %2315 = vadd.xlane.f32.xlu1 %v2314_v14 }
 0xe71   : > { %v2310_v15 = vpop.xlane.xlu1 %2309 }
 0xe72   : > { %v2318_v21 = vmul.f32 0.03125, %v2310_v15  ;;  %v2307_v59 = vpop.xlane.xlu0 %2306 }
 0xe73   : > { %v2317_v22 = vmul.f32 0.03125, %v2307_v59 }
 0xe74   : > { %v2322_v23 = vadd.f32 1e-05, %v2318_v21 }
 0xe75   : > { %v2321_v24 = vadd.f32 1e-05, %v2317_v22 }
 0xe76   : > { %5421 = vrsqrt.f32 %v2322_v23  ;;  %v2313_v25 = vpop.xlane.xlu0 %2312 }
 0xe77   : > { %5423 = vrsqrt.f32 %v2321_v24  ;;  %v2319_v45 = vmul.f32 0.03125, %v2313_v25 }
 0xe79   : > { %v2323_v47 = vadd.f32 1e-05, %v2319_v45 }
 0xe7a   : > { %v2316_v48 = vpop.xlane.xlu1 %2315 }
 0xe7b   : > { %5425 = vrsqrt.f32 %v2323_v47  ;;  %v2320_v56 = vmul.f32 0.03125, %v2316_v48 }
 0xe7d   : > { %v2324_v57 = vadd.f32 1e-05, %v2320_v56 }
 0xe7f   : > { %5427 = vrsqrt.f32 %v2324_v57 }
 0xe80   : > { %v5422_v30 = vpop.eup %5421 }
 0xe81   : > { %v5424_v32 = vpop.eup %5423  ;;  %v2330_v35 = vmul.f32 %v5422_v30, %v2298_v5 }
 0xe82   : > { %v2329_v41 = vmul.f32 %v5424_v32, %v2297_v7 }
 0xe83   : > { %v2340_v17 = vmul.f32 %v4347_v60, %v2330_v35 }
 0xe84   : > { %v2339_v26 = vmul.f32 %v4347_v60, %v2329_v41  ;;  %v4349_v41 = vld [vmem:[%s6965_s19] ss:$0 sm:$0xff] }
 0xe85   : > { %v5426_v42 = vpop.eup %5425  ;;  %v2350_v44 = vadd.f32 %v4348_v40, %v2340_v17 }
 0xe86   : > { %v2349_v49 = vadd.f32 %v4348_v40, %v2339_v26  ;;  %v2331_v16 = vmul.f32 %v5426_v42, %v2299_v46  ;;  %v4350_v42 = vld [vmem:[%s6966_s20] ss:$0 sm:$0xff] }
 0xe87   : > { %v2354_v6 = vadd.f32 %v5541_v29, %v2350_v44 }
 0xe88   : > { %v2353_v27 = vadd.f32 %v5542_v19, %v2349_v49  ;;  %v2341_v4 = vmul.f32 %v4347_v60, %v2331_v16 }
 0xe89   : > { %v5428_v33 = vpop.eup %5427  ;;  %v2362_v18 = vsel %vm673_vm0, %v2354_v6, 0.0 }
 0xe8a   : > { %2363 = vadd.xlane.f32.xlu1 %v2362_v18  ;;  %v2359_v53 = vsel %vm673_vm0, %v2353_v27, 0.0  ;;  %v2351_v43 = vadd.f32 %v4348_v40, %v2341_v4  ;;  %v2332_v34 = vmul.f32 %v5428_v33, %v2300_v50 }
 0xe8b   : > { %2360 = vadd.xlane.f32.xlu0 %v2359_v53 }
 0xe8c   : > { %v2355_v39 = vadd.f32 %v5543_v36, %v2351_v43  ;;  %v2342_v58 = vmul.f32 %v4347_v60, %v2332_v34 }
 0xe8e   : > { %v2365_v28 = vsel %vm673_vm0, %v2355_v39, 0.0  ;;  %v2352_v20 = vadd.f32 %v4348_v40, %v2342_v58 }
 0xe8f   : > { %2366 = vadd.xlane.f32.xlu0 %v2365_v28 }
 0xe90   : > { %v2356_v0 = vadd.f32 %v5544_v51, %v2352_v20 }
 0xe92   : > { %v2368_v52 = vsel %vm673_vm0, %v2356_v0, 0.0 }
 0xe93   : > { %2369 = vadd.xlane.f32.xlu1 %v2368_v52 }
 0xf17   : > { %v2364_v5 = vpop.xlane.xlu1 %2363 }
 0xf18   : > { %v2372_v7 = vmul.f32 0.03125, %v2364_v5  ;;  %v2361_v3 = vpop.xlane.xlu0 %2360 }
 0xf19   : > { %v2371_v55 = vmul.f32 0.03125, %v2361_v3 }
 0xf1a   : > { %v2376_v8 = vsub.f32 %v2354_v6, %v2372_v7 }
 0xf1b   : > { %v2375_v9 = vsub.f32 %v2353_v27, %v2371_v55 }
 0xf1c   : > { %v2367_v1 = vpop.xlane.xlu0 %2366  ;;  %v2380_v46 = vmul.f32 %v2376_v8, %v2376_v8 }
 0xf1d   : > { %v2373_v31 = vmul.f32 0.03125, %v2367_v1  ;;  %v2379_v54 = vmul.f32 %v2375_v9, %v2375_v9 }
 0xf1e   : > { %v2386_v10 = vsel %vm673_vm0, %v2380_v46, 0.0 }
 0xf1f   : > { %v2377_v11 = vsub.f32 %v2355_v39, %v2373_v31  ;;  %2387 = vadd.xlane.f32.xlu1 %v2386_v10  ;;  %v2383_v50 = vsel %vm673_vm0, %v2379_v54, 0.0 }
 0xf20   : > { %v2370_v12 = vpop.xlane.xlu1 %2369  ;;  %2384 = vadd.xlane.f32.xlu0 %v2383_v50 }
 0xf21   : > { %v2374_v13 = vmul.f32 0.03125, %v2370_v12  ;;  %v2381_v14 = vmul.f32 %v2377_v11, %v2377_v11 }
 0xf23   : > { %v2378_v15 = vsub.f32 %v2356_v0, %v2374_v13  ;;  %v2389_v21 = vsel %vm673_vm0, %v2381_v14, 0.0 }
 0xf24   : > { %2390 = vadd.xlane.f32.xlu0 %v2389_v21  ;;  %v4358_v21 = vld [vmem:[%s7008_s24 + $0x58] sm:$0xff] }
 0xf25   : > { %v2382_v59 = vmul.f32 %v2378_v15, %v2378_v15 }
 0xf27   : > { %v2392_v22 = vsel %vm673_vm0, %v2382_v59, 0.0 }
 0xf28   : > { %2393 = vadd.xlane.f32.xlu1 %v2392_v22  ;;  %v4355_v22 = vld [vmem:[%s7008_s24 + $0x40] sm:$0xff] }
 0xfac   : > { %v2388_v23 = vpop.xlane.xlu1 %2387 }
 0xfad   : > { %v2396_v24 = vmul.f32 0.03125, %v2388_v23  ;;  %v2385_v25 = vpop.xlane.xlu0 %2384  ;;  %v4357_v23 = vld [vmem:[%s7008_s24 + $0x50] sm:$0xff] }
 0xfae   : > { %v2395_v45 = vmul.f32 0.03125, %v2385_v25  ;;  %v4360_v25 = vld [vmem:[%s7008_s24 + $0x68] sm:$0xff] }
 0xfaf   : > { %v2400_v47 = vadd.f32 1e-05, %v2396_v24  ;;  %v5108_v24 = vpack.c.bf16 %v4357_v23, %v4355_v22  ;;  %v4380_v22 = vld [vmem:[%s6953_s7 + $0x98] sm:$0xff] }
 0xfb0   : > { %v2399_v48 = vadd.f32 1e-05, %v2395_v45  ;;  %v4362_v45 = vld [vmem:[%s7008_s24 + $0x78] sm:$0xff] }
 0xfb1   : > { %5429 = vrsqrt.f32 %v2400_v47  ;;  %v2391_v56 = vpop.xlane.xlu0 %2390  ;;  %v5110_v47 = vpack.c.bf16 %v4362_v45, %v4360_v25  ;;  %v4382_v25 = vld [vmem:[%s6953_s7 + $0xa8] sm:$0xff] }
 0xfb2   : > { %5431 = vrsqrt.f32 %v2399_v48  ;;  %v2397_v57 = vmul.f32 0.03125, %v2391_v56  ;;  %v4359_v48 = vld [vmem:[%s7008_s24 + $0x60] sm:$0xff]  ;;  %v4361_v56 = vld [vmem:[%s7008_s24 + $0x70] sm:$0xff]  ;;  %v5546_v45 = vld [vmem:[%s7012_s0 + $0x8] sm:$0xff] }
 0xfb4   : > { %v2401_v30 = vadd.f32 1e-05, %v2397_v57  ;;  %v5112_v57 = vpack.c.bf16 %v4361_v56, %v4359_v48  ;;  %v4383_v56 = vld [vmem:[%s6953_s7 + $0xb0] sm:$0xff] }
 0xfb5   : > { %v2394_v60 = vpop.xlane.xlu1 %2393 }
 0xfb6   : > { %5433 = vrsqrt.f32 %v2401_v30  ;;  %v2398_v32 = vmul.f32 0.03125, %v2394_v60 }
 0xfb8   : > { %v2402_v35 = vadd.f32 1e-05, %v2398_v32 }
 0xfba   : > { %5435 = vrsqrt.f32 %v2402_v35 }
 0xfbb   : > { %v5430_v40 = vpop.eup %5429 }
 0xfbc   : > { %v5432_v17 = vpop.eup %5431  ;;  %v2408_v26 = vmul.f32 %v5430_v40, %v2376_v8 }
 0xfbd   : > { %v2407_v44 = vmul.f32 %v5432_v17, %v2375_v9 }
 0xfbe   : > { %v2418_v49 = vmul.f32 %v4349_v41, %v2408_v26 }
 0xfbf   : > { %v2417_v16 = vmul.f32 %v4349_v41, %v2407_v44 }
 0xfc0   : > { %v5434_v29 = vpop.eup %5433  ;;  %v6355_v6 = vadd.f32 %v4350_v42, %v2418_v49 }
 0xfc1   : > { %v6357_v19 = vadd.f32 %v4350_v42, %v2417_v16  ;;  %v2409_v27 = vmul.f32 %v5434_v29, %v2377_v11 }
 0xfc2   : > { %v2438_v4 = vsel %vm673_vm0, %v6355_v6, 0.0 }
 0xfc3   : > { %2439 = vadd.xlane.f32.xlu1 %v2438_v4  ;;  %v2435_v33 = vsel %vm673_vm0, %v6357_v19, 0.0  ;;  %v2419_v18 = vmul.f32 %v4349_v41, %v2409_v27  ;;  %v4353_v4 = vld [vmem:[%s7010_s29 + $0x1] ss:$0 sm:$0xff] }
 0xfc4   : > { %v5436_v53 = vpop.eup %5435  ;;  %2436 = vadd.xlane.f32.xlu0 %v2435_v33 }
 0xfc5   : > { %v6363_v43 = vadd.f32 %v4350_v42, %v2419_v18  ;;  %v2410_v34 = vmul.f32 %v5436_v53, %v2378_v15  ;;  %v4356_v15 = vld [vmem:[%s7008_s24 + $0x48] sm:$0xff]  ;;  %v4354_v53 = vld [vmem:[%s7011_s23 + $0x1] ss:$0 sm:$0xff] }
 0xfc6   : > { %v5106_v59 = vpack.c.bf16 %v4358_v21, %v4356_v15 }
 0xfc7   : > { %v2441_v36 = vsel %vm673_vm0, %v6363_v43, 0.0  ;;  %v2420_v39 = vmul.f32 %v4349_v41, %v2410_v34 }
 0xfc8   : > { %2442 = vadd.xlane.f32.xlu0 %v2441_v36  ;;  %5107 = vmatprep.subr.bf16.mxu0 %v5106_v59  ;;  %v4379_v59 = vld [vmem:[%s6953_s7 + $0x90] sm:$0xff] }
 0xfc9   : > { %v6367_v58 = vadd.f32 %v4350_v42, %v2420_v39  ;;  %5109 = vmatpush1.bf16.msra.mxu0 %v5108_v24  ;;  %v5126_v23 = vpack.c.bf16 %v4380_v22, %v4379_v59  ;;  %v4381_v24 = vld [vmem:[%s6953_s7 + $0xa0] sm:$0xff] }
 0xfca   : > { %5111 = vmatprep.subr.bf16.mxu0 %v5110_v47  ;;  %v5547_v47 = vld [vmem:[%s7012_s0 + $0x10] sm:$0xff]  ;;  %v5130_v48 = vpack.c.bf16 %v4382_v25, %v4381_v24  ;;  %v4394_v24 = vld [vmem:[%s6954_s8 + $0x1] ss:$0 sm:$0xff] }
 0xfcb   : > { %v2444_v28 = vsel %vm673_vm0, %v6367_v58, 0.0 }
 0xfcc   : > { %2445 = vadd.xlane.f32.xlu1 %v2444_v28 }
 0xfcd   : > { %5113 = vmatpush1.bf16.msra.mxu0 %v5112_v57  ;;  %v4384_v57 = vld [vmem:[%s6953_s7 + $0xb8] sm:$0xff] }
0x1050   : > { %v2440_v20 = vpop.xlane.xlu1 %2439 }
0x1051   : > { %v2448_v51 = vmul.f32 0.03125, %v2440_v20  ;;  %v2437_v0 = vpop.xlane.xlu0 %2436 }
0x1052   : > { %v2447_v52 = vmul.f32 0.03125, %v2437_v0 }
0x1053   : > { %v2452_v5 = vsub.f32 %v6355_v6, %v2448_v51 }
0x1054   : > { %v2451_v7 = vsub.f32 %v6357_v19, %v2447_v52 }
0x1055   : > { %v2443_v3 = vpop.xlane.xlu0 %2442  ;;  %v2456_v55 = vmul.f32 %v2452_v5, %v2452_v5 }
0x1056   : > { %v2449_v8 = vmul.f32 0.03125, %v2443_v3  ;;  %v2455_v9 = vmul.f32 %v2451_v7, %v2451_v7 }
0x1057   : > { %v2462_v1 = vsel %vm673_vm0, %v2456_v55, 0.0 }
0x1058   : > { %v2453_v46 = vsub.f32 %v6363_v43, %v2449_v8  ;;  %2463 = vadd.xlane.f32.xlu1 %v2462_v1  ;;  %v2459_v31 = vsel %vm673_vm0, %v2455_v9, 0.0  ;;  %v5545_v8 = vld [vmem:[%s7012_s0] sm:$0xff] }
0x1059   : > { %v2446_v54 = vpop.xlane.xlu1 %2445  ;;  %2460 = vadd.xlane.f32.xlu0 %v2459_v31 }
0x105a   : > { %v2450_v10 = vmul.f32 0.03125, %v2446_v54  ;;  %v2457_v11 = vmul.f32 %v2453_v46, %v2453_v46 }
0x105c   : > { %v2454_v50 = vsub.f32 %v6367_v58, %v2450_v10  ;;  %v2465_v12 = vsel %vm673_vm0, %v2457_v11, 0.0 }
0x105d   : > { %2466 = vadd.xlane.f32.xlu0 %v2465_v12  ;;  %v4378_v12 = vld [vmem:[%s6953_s7 + $0x88] sm:$0xff] }
0x105e   : > { %v2458_v13 = vmul.f32 %v2454_v50, %v2454_v50 }
0x1060   : > { %v2468_v14 = vsel %vm673_vm0, %v2458_v13, 0.0 }
0x1061   : > { %2469 = vadd.xlane.f32.xlu1 %v2468_v14 }
0x10e5   : > { %v2464_v30 = vpop.xlane.xlu1 %2463 }
0x10e6   : > { %v2472_v60 = vmul.f32 0.03125, %v2464_v30  ;;  %v2461_v32 = vpop.xlane.xlu0 %2460  ;;  %v5548_v30 = vld [vmem:[%s7012_s0 + $0x18] sm:$0xff] }
0x10e7   : > { %v2471_v35 = vmul.f32 0.03125, %v2461_v32  ;;  %v4385_v32 = vld [vmem:[%s6953_s7 + $0xc0] sm:$0xff] }
0x10e8   : > { %v2476_v40 = vadd.f32 1e-05, %v2472_v60  ;;  %v5134_v60 = vpack.c.bf16 %v4384_v57, %v4383_v56 }
0x10e9   : > { %v2475_v41 = vadd.f32 1e-05, %v2471_v35  ;;  %v4386_v35 = vld [vmem:[%s6953_s7 + $0xc8] sm:$0xff] }
0x10ea   : > { %5437 = vrsqrt.f32 %v2476_v40  ;;  %v2467_v17 = vpop.xlane.xlu0 %2466  ;;  %v5138_v40 = vpack.c.bf16 %v4386_v35, %v4385_v32 }
0x10eb   : > { %5439 = vrsqrt.f32 %v2475_v41  ;;  %v2473_v26 = vmul.f32 0.03125, %v2467_v17  ;;  %v4387_v41 = vld [vmem:[%s6953_s7 + $0xd0] sm:$0xff]  ;;  %v4388_v17 = vld [vmem:[%s6953_s7 + $0xd8] sm:$0xff] }
0x10ed   : > { %v2477_v42 = vadd.f32 1e-05, %v2473_v26  ;;  %v5142_v26 = vpack.c.bf16 %v4388_v17, %v4387_v41 }
0x10ee   : > { %v2470_v44 = vpop.xlane.xlu1 %2469 }
0x10ef   : > { %5441 = vrsqrt.f32 %v2477_v42  ;;  %v2474_v49 = vmul.f32 0.03125, %v2470_v44  ;;  %v4389_v42 = vld [vmem:[%s6953_s7 + $0xe0] sm:$0xff]  ;;  %v4390_v44 = vld [vmem:[%s6953_s7 + $0xe8] sm:$0xff] }
0x10f1   : > { %v2478_v16 = vadd.f32 1e-05, %v2474_v49  ;;  %v5146_v49 = vpack.c.bf16 %v4390_v44, %v4389_v42 }
0x10f3   : > { %5443 = vrsqrt.f32 %v2478_v16  ;;  %v4391_v16 = vld [vmem:[%s6953_s7 + $0xf0] sm:$0xff] }
0x10f4   : > { %v5438_v29 = vpop.eup %5437 }
0x10f5   : > { %v5440_v27 = vpop.eup %5439  ;;  %v2484_v18 = vmul.f32 %v5438_v29, %v2452_v5  ;;  %v4392_v29 = vld [vmem:[%s6953_s7 + $0xf8] sm:$0xff] }
0x10f6   : > { %v2483_v33 = vmul.f32 %v5440_v27, %v2451_v7  ;;  %v5150_v27 = vpack.c.bf16 %v4392_v29, %v4391_v16 }
0x10f7   : > { %v2494_v28 = vmul.f32 %v4353_v4, %v2484_v18 }
0x10f8   : > { %v2493_v34 = vmul.f32 %v4353_v4, %v2483_v33 }
0x10f9   : > { %v5442_v36 = vpop.eup %5441  ;;  %v6414_v0 = vadd.f32 %v4354_v53, %v2494_v28 }
0x10fa   : > { %v6409_v39 = vadd.f32 %v4354_v53, %v2493_v34  ;;  %v2485_v20 = vmul.f32 %v5442_v36, %v2453_v46 }
0x10fc   : > { %4363 = vmatmul.mubr.msk.f32.vlgmr.msra.gmra.mrb[24].mxu0 %vm673_vm0, %v6409_v39  ;;  %v2495_v52 = vmul.f32 %v4353_v4, %v2485_v20 }
0x10fd   : > { %v5444_v51 = vpop.eup %5443  ;;  %2598 = vmatprep.mubr.f32.mxu0 %v5613_v38 }
0x10fe   : > { %v2486_v5 = vmul.f32 %v5444_v51, %v2454_v50  ;;  %v6419_v7 = vadd.f32 %v4354_v53, %v2495_v52  ;;  %v4377_v50 = vld [vmem:[%s6953_s7 + $0x80] sm:$0xff] }
0x10ff   : > { %v5122_v21 = vpack.c.bf16 %v4378_v12, %v4377_v50 }
0x1100   : > { %4364 = vmatmul.mubr.msk.f32.gmra.mrb[26].mxu0 %vm673_vm0, %v6414_v0  ;;  %v2496_v3 = vmul.f32 %v4353_v4, %v2486_v5  ;;  %v4368_v4 = vld [vmem:[%s7013_s6 + $0x1] ss:$0 sm:$0xff] }
0x1101   : > { %2604 = vmatprep.mubr.f32.mxu0 %v5613_v38 }
0x1102   : > { %v6424_v55 = vadd.f32 %v4354_v53, %v2496_v3 }
0x1104   : > { %4365 = vmatmul.mubr.msk.f32.gmra.mrb[28].mxu0 %vm673_vm0, %v6419_v7 }
0x1105   : > { %2610 = vmatprep.mubr.f32.mxu0 %v5613_v38 }
0x1108   : > { %4366 = vmatmul.mubr.msk.f32.gmra.mrb[30].mxu0 %vm673_vm0, %v6424_v55 }
0x1109   : > { %4826 = vmatprep.mubr.msk.f32.mxu0 %vm673_vm0, %v5545_v8 }
0x11cf   : > { %v2594_v9 = vpop.f32.mrb[24].mxu0 }
0x11d0   : > { %v2596_v1 = vpop.f32.mrb[25].mxu0 }
0x11d1   : > { %v2625_v18 = vadd.f32 %v4368_v4, %v2596_v1 }
0x11d3   : > { %v2600_v46 = vpop.f32.mrb[26].mxu0  ;;  %v4373_v36 = vmul.f32 -1.442695, %v2625_v18 }
0x11d4   : > { %v5114_v31 = vpack.c.bf16 %v2600_v46, %v2594_v9  ;;  %v2602_v54 = vpop.f32.mrb[27].mxu0 }
0x11d5   : > { %v2626_v33 = vadd.f32 %v4368_v4, %v2602_v54 }
0x11d6   : > { %5115 = vmatprep.subr.bf16.mxu0 %v5114_v31 }
0x11d7   : > { %v2606_v10 = vpop.f32.mrb[28].mxu0  ;;  %5117 = vmatpush3.bf16.msra.mxu0 %v5114_v31  ;;  %v4374_v53 = vmul.f32 -1.442695, %v2626_v33 }
0x11d8   : > { %v2608_v11 = vpop.f32.mrb[29].mxu0 }
0x11d9   : > { %v2627_v28 = vadd.f32 %v4368_v4, %v2608_v11  ;;  %5445 = vpow2.f32 %v4374_v53 }
0x11da   : > { %5447 = vpow2.f32 %v4373_v36 }
0x11db   : > { %v2612_v13 = vpop.f32.mrb[30].mxu0  ;;  %v4375_v51 = vmul.f32 -1.442695, %v2627_v28 }
0x11dc   : > { %v5118_v14 = vpack.c.bf16 %v2612_v13, %v2606_v10  ;;  %v2614_v15 = vpop.f32.mrb[31].mxu0 }
0x11dd   : > { %v2628_v34 = vadd.f32 %v4368_v4, %v2614_v15 }
0x11de   : > { %5119 = vmatprep.subr.bf16.mxu0 %v5118_v14 }
0x11df   : > { %5121 = vmatpush3.bf16.msra.mxu0 %v5118_v14  ;;  %v4376_v20 = vmul.f32 -1.442695, %v2628_v34 }
0x11e0   : > { %5123 = vmatprep.subr.bf16.mxu0 %v5122_v21 }
0x11e1   : > { %5449 = vpow2.f32 %v4376_v20 }
0x11e2   : > { %4827 = vmatmul.mubr.msk.f32.vlgmr.msra.gmra.mrb[32].mxu0 %vm673_vm0, %v5546_v45  ;;  %5451 = vpow2.f32 %v4375_v51 }
0x11e3   : > { %4829 = vmatprep.mubr.msk.f32.mxu0 %vm673_vm0, %v5547_v47  ;;  %5125 = vmatpush3.bf16.msra.mxu0 %v5122_v21  ;;  %v5446_v52 = vpop.eup %5445 }
0x11e4   : > { %5127 = vmatprep.subr.bf16.mxu0 %v5126_v23  ;;  %v5448_v5 = vpop.eup %5447  ;;  %v2727_v3 = vadd.f32 1.0, %v5446_v52 }
0x11e5   : > { %v2726_v9 = vadd.f32 1.0, %v5448_v5 }
0x11e6   : > { %4830 = vmatmul.mubr.msk.f32.gmra.mrb[34].mxu0 %vm673_vm0, %v5548_v30  ;;  %5453 = vrcp.f32 %v2727_v3 }
0x11e7   : > { %5129 = vmatpush3.bf16.msra.mxu0 %v5126_v23  ;;  %5455 = vrcp.f32 %v2726_v9 }
0x11e8   : > { %5131 = vmatprep.subr.bf16.mxu0 %v5130_v48 }
0x11eb   : > { %5133 = vmatpush3.bf16.msra.mxu0 %v5130_v48  ;;  %v5450_v8 = vpop.eup %5449 }
0x11ec   : > { %5135 = vmatprep.subr.bf16.mxu0 %v5134_v60  ;;  %v5452_v46 = vpop.eup %5451  ;;  %v2729_v31 = vadd.f32 1.0, %v5450_v8 }
0x11ed   : > { %v2728_v1 = vadd.f32 1.0, %v5452_v46 }
0x11ee   : > { %5457 = vrcp.f32 %v2729_v31 }
0x11ef   : > { %5137 = vmatpush3.bf16.msra.mxu0 %v5134_v60  ;;  %5459 = vrcp.f32 %v2728_v1 }
0x11f0   : > { %5139 = vmatprep.subr.bf16.mxu0 %v5138_v40  ;;  %v5454_v54 = vpop.eup %5453 }
0x11f1   : > { %v5456_v11 = vpop.eup %5455 }
0x11f3   : > { %5141 = vmatpush3.bf16.msra.mxu0 %v5138_v40 }
0x11f4   : > { %5143 = vmatprep.subr.bf16.mxu0 %v5142_v26 }
0x11f7   : > { %5145 = vmatpush3.bf16.msra.mxu0 %v5142_v26 }
0x11f8   : > { %5147 = vmatprep.subr.bf16.mxu0 %v5146_v49  ;;  %v5458_v14 = vpop.eup %5457 }
0x11f9   : > { %v5460_v21 = vpop.eup %5459 }
0x11fb   : > { %5149 = vmatpush3.bf16.msra.mxu0 %v5146_v49 }
0x11fc   : > { %5151 = vmatprep.subr.bf16.mxu0 %v5150_v27 }
0x11ff   : > { %5153 = vmatpush3.bf16.msra.mxu0 %v5150_v27 }
0x12b5   : > { %v4828_v10 = vpop.f32.mrb[32].mxu0 }
0x12b6   : > { %v2739_v50 = vmul.f32 %v5454_v54, %v4828_v10  ;;  %v2695_v12 = vpop.f32.mrb[33].mxu0 }
0x12b7   : > { %v2738_v13 = vmul.f32 %v5456_v11, %v2695_v12 }
0x12b9   : > { %v4831_v15 = vpop.f32.mrb[34].mxu0  ;;  %4864 = vmatprep.mubr.f32.mxu0 %v2738_v13 }
0x12ba   : > { %v2741_v59 = vmul.f32 %v5458_v14, %v4831_v15  ;;  %v2705_v22 = vpop.f32.mrb[35].mxu0  ;;  %4865 = vmatmul.mubr.f32.vlgmr.msra.gmra.mrb[36].mxu0 %v2739_v50 }
0x12bb   : > { %v2740_v23 = vmul.f32 %v5460_v21, %v2705_v22  ;;  %v4397_v21 = vld [vmem:[%s6955_s9 + $0x1] ss:$0 sm:$0xff] }
0x12bd   : > { %4867 = vmatprep.mubr.f32.mxu0 %v2740_v23  ;;  %v4398_v23 = vld [vmem:[%s6956_s10 + $0x1] ss:$0 sm:$0xff] }
0x12be   : > { %4868 = vmatmul.mubr.f32.gmra.mrb[38].mxu0 %v2741_v59 }
0x138d   : > { %v4866_v25 = vpop.f32.mrb[36].mxu0 }
0x138e   : > { %v2839_v45 = vadd.f32 %v4866_v25, %v4394_v24  ;;  %v2833_v47 = vpop.f32.mrb[37].mxu0 }
0x138f   : > { %v2834_v48 = vadd.f32 %v4394_v24, %v2833_v47 }
0x1390   : > { %v2853_v56 = vadd.f32 %v2839_v45, %v6414_v0 }
0x1391   : > { %v4869_v57 = vpop.f32.mrb[38].mxu0  ;;  %v2852_v30 = vadd.f32 %v2834_v48, %v6409_v39 }
0x1392   : > { %v2849_v60 = vadd.f32 %v4869_v57, %v4394_v24  ;;  %v2843_v32 = vpop.f32.mrb[39].mxu0  ;;  %v2863_v35 = vsel %vm673_vm0, %v2853_v56, 0.0 }
0x1393   : > { %v2844_v40 = vadd.f32 %v4394_v24, %v2843_v32  ;;  %2864 = vadd.xlane.f32.xlu1 %v2863_v35  ;;  %v2860_v41 = vsel %vm673_vm0, %v2852_v30, 0.0 }
0x1394   : > { %2861 = vadd.xlane.f32.xlu0 %v2860_v41  ;;  %v2855_v17 = vadd.f32 %v2849_v60, %v6424_v55 }
0x1395   : > { %v2854_v26 = vadd.f32 %v2844_v40, %v6419_v7 }
0x1396   : > { %v2869_v42 = vsel %vm673_vm0, %v2855_v17, 0.0 }
0x1397   : > { %2870 = vadd.xlane.f32.xlu1 %v2869_v42  ;;  %v2866_v0 = vsel %vm673_vm0, %v2854_v26, 0.0 }
0x1398   : > { %2867 = vadd.xlane.f32.xlu0 %v2866_v0 }
0x1420   : > { %v2865_v39 = vpop.xlane.xlu1 %2864 }
0x1421   : > { %v2873_v44 = vmul.f32 0.03125, %v2865_v39  ;;  %v2862_v49 = vpop.xlane.xlu0 %2861 }
0x1422   : > { %v2872_v16 = vmul.f32 0.03125, %v2862_v49 }
0x1423   : > { %v2877_v29 = vsub.f32 %v2853_v56, %v2873_v44 }
0x1424   : > { %v2876_v27 = vsub.f32 %v2852_v30, %v2872_v16  ;;  %v2871_v4 = vpop.xlane.xlu1 %2870 }
0x1425   : > { %v2875_v33 = vmul.f32 0.03125, %v2871_v4  ;;  %v2868_v18 = vpop.xlane.xlu0 %2867  ;;  %v2881_v53 = vmul.f32 %v2877_v29, %v2877_v29 }
0x1426   : > { %v2874_v34 = vmul.f32 0.03125, %v2868_v18  ;;  %v2880_v55 = vmul.f32 %v2876_v27, %v2876_v27 }
0x1427   : > { %v2879_v36 = vsub.f32 %v2855_v17, %v2875_v33  ;;  %v2887_v7 = vsel %vm673_vm0, %v2881_v53, 0.0 }
0x1428   : > { %v2878_v28 = vsub.f32 %v2854_v26, %v2874_v34  ;;  %2888 = vadd.xlane.f32.xlu1 %v2887_v7  ;;  %v2884_v20 = vsel %vm673_vm0, %v2880_v55, 0.0 }
0x1429   : > { %2885 = vadd.xlane.f32.xlu0 %v2884_v20  ;;  %v2883_v51 = vmul.f32 %v2879_v36, %v2879_v36 }
0x142a   : > { %v2882_v52 = vmul.f32 %v2878_v28, %v2878_v28 }
0x142b   : > { %v2893_v5 = vsel %vm673_vm0, %v2883_v51, 0.0 }
0x142c   : > { %2894 = vadd.xlane.f32.xlu1 %v2893_v5  ;;  %v2890_v3 = vsel %vm673_vm0, %v2882_v52, 0.0 }
0x142d   : > { %2891 = vadd.xlane.f32.xlu0 %v2890_v3 }
0x14b5   : > { %v2889_v8 = vpop.xlane.xlu1 %2888 }
0x14b6   : > { %v2897_v9 = vmul.f32 0.03125, %v2889_v8  ;;  %v2886_v46 = vpop.xlane.xlu0 %2885  ;;  %v4404_v8 = vld [vmem:[%s6959_s13 + $0x88] sm:$0xff] }
0x14b7   : > { %v2896_v31 = vmul.f32 0.03125, %v2886_v46 }
0x14b8   : > { %v2901_v1 = vadd.f32 1e-05, %v2897_v9  ;;  %v4408_v9 = vld [vmem:[%s6959_s13 + $0xa8] sm:$0xff] }
0x14b9   : > { %v2900_v54 = vadd.f32 1e-05, %v2896_v31  ;;  %v2895_v10 = vpop.xlane.xlu1 %2894  ;;  %v5154_v46 = vpack.c.bf16 %v4408_v9, %v4404_v8  ;;  %v4403_v31 = vld [vmem:[%s6959_s13 + $0x80] sm:$0xff] }
0x14ba   : > { %5461 = vrsqrt.f32 %v2901_v1  ;;  %v2899_v11 = vmul.f32 0.03125, %v2895_v10  ;;  %v2892_v50 = vpop.xlane.xlu0 %2891  ;;  %v4407_v1 = vld [vmem:[%s6959_s13 + $0xa0] sm:$0xff]  ;;  %v4412_v10 = vld [vmem:[%s6959_s13 + $0xc8] sm:$0xff] }
0x14bb   : > { %5463 = vrsqrt.f32 %v2900_v54  ;;  %v2898_v12 = vmul.f32 0.03125, %v2892_v50  ;;  %v5156_v54 = vpack.c.bf16 %v4407_v1, %v4403_v31  ;;  %5155 = vmatprep.subr.bf16.mxu1 %v5154_v46 }
0x14bc   : > { %v2903_v13 = vadd.f32 1e-05, %v2899_v11  ;;  %v4416_v11 = vld [vmem:[%s6959_s13 + $0xe8] sm:$0xff] }
0x14bd   : > { %v2902_v14 = vadd.f32 1e-05, %v2898_v12  ;;  %5157 = vmatpush1.bf16.msra.mxu1 %v5156_v54  ;;  %v5158_v50 = vpack.c.bf16 %v4416_v11, %v4412_v10  ;;  %v4411_v12 = vld [vmem:[%s6959_s13 + $0xc0] sm:$0xff] }
0x14be   : > { %5465 = vrsqrt.f32 %v2903_v13  ;;  %v4415_v13 = vld [vmem:[%s6959_s13 + $0xe0] sm:$0xff] }
0x14bf   : > { %5467 = vrsqrt.f32 %v2902_v14  ;;  %v5160_v14 = vpack.c.bf16 %v4415_v13, %v4411_v12  ;;  %5159 = vmatprep.subr.bf16.mxu1 %v5158_v50 }
0x14c1   : > { %5161 = vmatpush1.bf16.msra.mxu1 %v5160_v14 }
0x14c4   : > { %v5462_v15 = vpop.eup %5461 }
0x14c5   : > { %v5464_v59 = vpop.eup %5463  ;;  %v2909_v22 = vmul.f32 %v5462_v15, %v2877_v29  ;;  %v4406_v15 = vld [vmem:[%s6959_s13 + $0x98] sm:$0xff] }
0x14c6   : > { %v2908_v24 = vmul.f32 %v5464_v59, %v2876_v27 }
0x14c7   : > { %v2919_v25 = vmul.f32 %v4397_v21, %v2909_v22 }
0x14c8   : > { %v5466_v45 = vpop.eup %5465  ;;  %v2918_v47 = vmul.f32 %v4397_v21, %v2908_v24 }
0x14c9   : > { %v5468_v48 = vpop.eup %5467  ;;  %v2929_v56 = vadd.f32 %v4398_v23, %v2919_v25  ;;  %v2911_v57 = vmul.f32 %v5466_v45, %v2879_v36 }
0x14ca   : > { %v2928_v30 = vadd.f32 %v4398_v23, %v2918_v47  ;;  %v2910_v60 = vmul.f32 %v5468_v48, %v2878_v28 }
0x14cb   : > { %v2939_v32 = vsel %vm673_vm0, %v2929_v56, 0.0  ;;  %v2921_v35 = vmul.f32 %v4397_v21, %v2911_v57 }
0x14cc   : > { %2940 = vadd.xlane.f32.xlu1 %v2939_v32  ;;  %v2936_v40 = vsel %vm673_vm0, %v2928_v30, 0.0  ;;  %v2920_v41 = vmul.f32 %v4397_v21, %v2910_v60  ;;  %v4410_v21 = vld [vmem:[%s6959_s13 + $0xb8] sm:$0xff] }
0x14cd   : > { %2937 = vadd.xlane.f32.xlu0 %v2936_v40  ;;  %v2931_v17 = vadd.f32 %v4398_v23, %v2921_v35  ;;  %v5162_v59 = vpack.c.bf16 %v4410_v21, %v4406_v15 }
0x14ce   : > { %v2930_v26 = vadd.f32 %v4398_v23, %v2920_v41  ;;  %v4401_v41 = vld [vmem:[%s6957_s11 + $0x1] ss:$0 sm:$0xff] }
0x14cf   : > { %v2945_v42 = vsel %vm673_vm0, %v2931_v17, 0.0  ;;  %5163 = vmatprep.subr.bf16.mxu1 %v5162_v59 }
0x14d0   : > { %2946 = vadd.xlane.f32.xlu1 %v2945_v42  ;;  %v2942_v0 = vsel %vm673_vm0, %v2930_v26, 0.0  ;;  %v4405_v42 = vld [vmem:[%s6959_s13 + $0x90] sm:$0xff] }
0x14d1   : > { %2943 = vadd.xlane.f32.xlu0 %v2942_v0  ;;  %v4409_v0 = vld [vmem:[%s6959_s13 + $0xb0] sm:$0xff] }
0x1559   : > { %v2941_v39 = vpop.xlane.xlu1 %2940 }
0x155a   : > { %v2949_v44 = vmul.f32 0.03125, %v2941_v39  ;;  %v2938_v49 = vpop.xlane.xlu0 %2937  ;;  %v4402_v39 = vld [vmem:[%s6958_s12 + $0x1] ss:$0 sm:$0xff] }
0x155b   : > { %v2948_v16 = vmul.f32 0.03125, %v2938_v49  ;;  %v4418_v49 = vld [vmem:[%s6959_s13 + $0xf8] sm:$0xff] }
0x155c   : > { %v2953_v29 = vsub.f32 %v2929_v56, %v2949_v44  ;;  %v4414_v44 = vld [vmem:[%s6959_s13 + $0xd8] sm:$0xff] }
0x155d   : > { %v2952_v27 = vsub.f32 %v2928_v30, %v2948_v16  ;;  %v2947_v4 = vpop.xlane.xlu1 %2946 }
0x155e   : > { %v2951_v33 = vmul.f32 0.03125, %v2947_v4  ;;  %v2944_v18 = vpop.xlane.xlu0 %2943  ;;  %v2957_v53 = vmul.f32 %v2953_v29, %v2953_v29 }
0x155f   : > { %v2950_v34 = vmul.f32 0.03125, %v2944_v18  ;;  %v2956_v55 = vmul.f32 %v2952_v27, %v2952_v27 }
0x1560   : > { %v6520_v36 = vsub.f32 %v2931_v17, %v2951_v33  ;;  %v2963_v7 = vsel %vm673_vm0, %v2957_v53, 0.0  ;;  %v5166_v53 = vpack.c.bf16 %v4418_v49, %v4414_v44 }
0x1561   : > { %v2954_v28 = vsub.f32 %v2930_v26, %v2950_v34  ;;  %2964 = vadd.xlane.f32.xlu1 %v2963_v7  ;;  %v2960_v20 = vsel %vm673_vm0, %v2956_v55, 0.0  ;;  %v4413_v34 = vld [vmem:[%s6959_s13 + $0xd0] sm:$0xff] }
0x1562   : > { %2961 = vadd.xlane.f32.xlu0 %v2960_v20  ;;  %v2959_v51 = vmul.f32 %v6520_v36, %v6520_v36  ;;  %v4417_v55 = vld [vmem:[%s6959_s13 + $0xf0] sm:$0xff] }
0x1563   : > { %v2958_v52 = vmul.f32 %v2954_v28, %v2954_v28  ;;  %v5168_v20 = vpack.c.bf16 %v4417_v55, %v4413_v34 }
0x1564   : > { %v2969_v5 = vsel %vm673_vm0, %v2959_v51, 0.0 }
0x1565   : > { %2970 = vadd.xlane.f32.xlu1 %v2969_v5  ;;  %v2966_v3 = vsel %vm673_vm0, %v2958_v52, 0.0 }
0x1566   : > { %2967 = vadd.xlane.f32.xlu0 %v2966_v3 }
0x15ee   : > { %v2965_v22 = vpop.xlane.xlu1 %2964 }
0x15ef   : > { %v2973_v23 = vmul.f32 0.03125, %v2965_v22  ;;  %v2962_v24 = vpop.xlane.xlu0 %2961 }
0x15f0   : > { %v2972_v25 = vmul.f32 0.03125, %v2962_v24 }
0x15f1   : > { %v2977_v45 = vadd.f32 1e-05, %v2973_v23 }
0x15f2   : > { %v2976_v47 = vadd.f32 1e-05, %v2972_v25  ;;  %v2971_v48 = vpop.xlane.xlu1 %2970 }
0x15f3   : > { %5469 = vrsqrt.f32 %v2977_v45  ;;  %v2975_v56 = vmul.f32 0.03125, %v2971_v48  ;;  %v2968_v57 = vpop.xlane.xlu0 %2967 }
0x15f4   : > { %5471 = vrsqrt.f32 %v2976_v47  ;;  %v2974_v30 = vmul.f32 0.03125, %v2968_v57 }
0x15f5   : > { %v2979_v60 = vadd.f32 1e-05, %v2975_v56 }
0x15f6   : > { %v2978_v32 = vadd.f32 1e-05, %v2974_v30 }
0x15f8   : > { %5473 = vrsqrt.f32 %v2978_v32 }
0x15f9   : > { %5475 = vrsqrt.f32 %v2979_v60 }
0x15fd   : > { %v5470_v35 = vpop.eup %5469 }
0x15fe   : > { %v5472_v40 = vpop.eup %5471  ;;  %v2985_v26 = vmul.f32 %v5470_v35, %v2953_v29 }
0x15ff   : > { %v2984_v17 = vmul.f32 %v5472_v40, %v2952_v27  ;;  %v5164_v27 = vpack.c.bf16 %v4409_v0, %v4405_v42 }
0x1600   : > { %v2995_v33 = vmul.f32 %v4401_v41, %v2985_v26 }
0x1601   : > { %v2994_v16 = vmul.f32 %v4401_v41, %v2984_v17 }
0x1602   : > { %v5474_v29 = vpop.eup %5473  ;;  %v6587_v51 = vadd.f32 %v4402_v39, %v2995_v33 }
0x1603   : > { %v6576_v4 = vadd.f32 %v4402_v39, %v2994_v16  ;;  %v2986_v18 = vmul.f32 %v5474_v29, %v2954_v28  ;;  %v5476_v7 = vpop.eup %5475 }
0x1604   : > { %v2987_v52 = vmul.f32 %v5476_v7, %v6520_v36 }
0x1605   : > { %4419 = vmatmul.mubr.msk.f32.vlgmr.msra.gmra.mrb[28].mxu1 %vm673_vm0, %v6576_v4  ;;  %v2996_v28 = vmul.f32 %v4401_v41, %v2986_v18 }
0x1606   : > { %3107 = vmatprep.mubr.f32.mxu1 %v5613_v38  ;;  %5165 = vmatpush1.bf16.msra.mxu1 %v5164_v27  ;;  %v2997_v3 = vmul.f32 %v4401_v41, %v2987_v52 }
0x1607   : > { %5167 = vmatprep.subr.bf16.mxu1 %v5166_v53  ;;  %v6593_v5 = vadd.f32 %v4402_v39, %v2996_v28 }
0x1608   : > { %v6598_v8 = vadd.f32 %v4402_v39, %v2997_v3 }
0x1609   : > { %4420 = vmatmul.mubr.msk.f32.gmra.mrb[30].mxu1 %vm673_vm0, %v6587_v51 }
0x160a   : > { %3113 = vmatprep.mubr.f32.mxu1 %v5613_v38  ;;  %5169 = vmatpush1.bf16.msra.mxu1 %v5168_v20 }
0x160d   : > { %4421 = vmatmul.mubr.msk.f32.gmra.mrb[32].mxu1 %vm673_vm0, %v6593_v5 }
0x160e   : > { %3119 = vmatprep.mubr.f32.mxu1 %v5613_v38 }
0x1611   : > { %4422 = vmatmul.mubr.msk.f32.gmra.mrb[34].mxu1 %vm673_vm0, %v6598_v8 }
0x1612   : > { %3190 = vmatprep.mubr.f32.mxu1 %v5613_v38 }
0x1615   : > { %4423 = vmatmul.mubr.msk.f32.vlgmr.msra.gmra.mrb[36].mxu1 %vm673_vm0, %v6576_v4 }
0x1616   : > { %3196 = vmatprep.mubr.f32.mxu1 %v5613_v38 }
0x1619   : > { %4424 = vmatmul.mubr.msk.f32.gmra.mrb[38].mxu1 %vm673_vm0, %v6587_v51 }
0x161a   : > { %3202 = vmatprep.mubr.f32.mxu1 %v5613_v38 }
0x161d   : > { %4425 = vmatmul.mubr.msk.f32.gmra.mrb[40].mxu1 %vm673_vm0, %v6593_v5 }
0x161e   : > { %3208 = vmatprep.mubr.f32.mxu1 %v5613_v38 }
0x1621   : > { %4426 = vmatmul.mubr.msk.f32.gmra.mrb[42].mxu1 %vm673_vm0, %v6598_v8 }
0x16d8   : > { %v3103_v36 = vpop.f32.mrb[28].mxu1 }
0x16d9   : > { %v6614_v9 = vmul.f32 0.125, %v3103_v36  ;;  %v6616_v46 = vpop.f32.mrb[29].mxu1 }
0x16db   : > { %4878 = vmatprep.mubr.msk.f32.mxu1 %vm1489_vm1, %v6614_v9 }
0x16dc   : > { %v3109_v31 = vpop.f32.mrb[30].mxu1 }
0x16dd   : > { %v6620_v1 = vpop.f32.mrb[31].mxu1  ;;  %v3216_v25 = vmul.f32 0.125, %v3109_v31 }
0x16de   : > { %v5313_v54 = vpack.i.bf16 %v6620_v1, %v6616_v46  ;;  %v5170_v38 = vpack.c.bf16 %v6620_v1, %v6616_v46 }
0x16e0   : > { %v3115_v10 = vpop.f32.mrb[32].mxu1  ;;  %5172 = vmatprep.subr.msk.bf16.mxu1 %vm6047_vm2, %v5170_v38 }
0x16e1   : > { %v6628_v11 = vpop.f32.mrb[33].mxu1  ;;  %5175 = vmatpush3.bf16.xpose.msk.msra.mxu1 %vm6047_vm2, %v5170_v38  ;;  %v3217_v45 = vmul.f32 0.125, %v3115_v10 }
0x16e4   : > { %v3121_v50 = vpop.f32.mrb[34].mxu1 }
0x16e5   : > { %v6632_v12 = vpop.f32.mrb[35].mxu1  ;;  %v3218_v56 = vmul.f32 0.125, %v3121_v50 }
0x16e6   : > { %v5318_v13 = vpack.i.bf16 %v6632_v12, %v6628_v11  ;;  %v5176_v14 = vpack.c.bf16 %v6632_v12, %v6628_v11 }
0x16e8   : > { %v6638_v15 = vpop.f32.mrb[36].mxu1  ;;  %5178 = vmatprep.subr.msk.bf16.mxu1 %vm6047_vm2, %v5176_v14 }
0x16e9   : > { %v6642_v21 = vpop.f32.mrb[37].mxu1  ;;  %5181 = vmatpush3.bf16.xpose.msk.msra.mxu1 %vm6047_vm2, %v5176_v14 }
0x16ec   : > { %v6646_v59 = vpop.f32.mrb[38].mxu1 }
0x16ed   : > { %v5323_v22 = vpack.i.bf16 %v6646_v59, %v6638_v15  ;;  %v5182_v23 = vpack.c.bf16 %v6646_v59, %v6638_v15  ;;  %v6652_v24 = vpop.f32.mrb[39].mxu1 }
0x16ef   : > { %5183 = vmatprep.subr.bf16.mxu0 %v5182_v23 }
0x16f0   : > { %v6654_v47 = vpop.f32.mrb[40].mxu1  ;;  %4879 = vmatmul.mubr.msk.f32.vlgmr.msra.gmra.mrb[44].mxu1 %vm1489_vm1, %v3216_v25  ;;  %5185 = vmatpush3.bf16.msra.mxu0 %v5182_v23 }
0x16f1   : > { %v6657_v48 = vpop.f32.mrb[41].mxu1  ;;  %4881 = vmatprep.mubr.msk.f32.mxu1 %vm1489_vm1, %v3217_v45 }
0x16f4   : > { %v6660_v57 = vpop.f32.mrb[42].mxu1  ;;  %4882 = vmatmul.mubr.msk.f32.gmra.mrb[46].mxu1 %vm1489_vm1, %v3218_v56 }
0x16f5   : > { %v5328_v30 = vpack.i.bf16 %v6660_v57, %v6654_v47  ;;  %v5186_v60 = vpack.c.bf16 %v6660_v57, %v6654_v47  ;;  %v6667_v32 = vpop.f32.mrb[43].mxu1 }
0x16f7   : > { %5187 = vmatprep.subr.bf16.mxu0 %v5186_v60 }
0x16f8   : > { %5189 = vmatpush3.bf16.msra.mxu0 %v5186_v60 }
0x17c3   : > { %v4880_v35 = vpop.f32.mrb[44].mxu1 }
0x17c4   : > { %v3358_v40 = vsel %vm668_vm3, %v4880_v35, -1e+30  ;;  %v3338_v41 = vpop.f32.mrb[45].mxu1 }
0x17c5   : > { %v3357_v17 = vsel %vm667_vm4, %v3338_v41, -1e+30  ;;  %v3364_v26 = vsel %vm673_vm0, %v3358_v40, -inf }
0x17c6   : > { %3365 = vmax.xlane.f32.xlu1 %v3364_v26  ;;  %v3361_v42 = vsel %vm673_vm0, %v3357_v17, -inf }
0x17c7   : > { %3362 = vmax.xlane.f32.xlu0 %v3361_v42  ;;  %v4883_v0 = vpop.f32.mrb[46].mxu1 }
0x17c8   : > { %v3360_v39 = vsel %vm670_vm5, %v4883_v0, -1e+30  ;;  %v3348_v44 = vpop.f32.mrb[47].mxu1 }
0x17c9   : > { %v3359_v49 = vsel %vm669_vm6, %v3348_v44, -1e+30  ;;  %v3370_v16 = vsel %vm673_vm0, %v3360_v39, -inf }
0x17ca   : > { %3371 = vmax.xlane.f32.xlu1 %v3370_v16  ;;  %v3367_v29 = vsel %vm673_vm0, %v3359_v49, -inf }
0x17cb   : > { %3368 = vmax.xlane.f32.xlu0 %v3367_v29 }
0x1853   : > { %v3366_v27 = vpop.xlane.xlu1 %3365 }
0x1854   : > { %v3374_v33 = vsub.f32 %v3358_v40, %v3366_v27  ;;  %v3363_v18 = vpop.xlane.xlu0 %3362 }
0x1855   : > { %v3373_v53 = vsub.f32 %v3357_v17, %v3363_v18 }
0x1856   : > { %v3379_v34 = vmul.f32 1.442695, %v3374_v33 }
0x1857   : > { %v3377_v55 = vmul.f32 1.442695, %v3373_v53  ;;  %v3372_v7 = vpop.xlane.xlu1 %3371 }
0x1858   : > { %5477 = vpow2.f32 %v3379_v34  ;;  %v3376_v20 = vsub.f32 %v3360_v39, %v3372_v7  ;;  %v3369_v28 = vpop.xlane.xlu0 %3368 }
0x1859   : > { %5479 = vpow2.f32 %v3377_v55  ;;  %v3375_v52 = vsub.f32 %v3359_v49, %v3369_v28 }
0x185a   : > { %v3383_v3 = vmul.f32 1.442695, %v3376_v20 }
0x185b   : > { %v3381_v36 = vmul.f32 1.442695, %v3375_v52 }
0x185c   : > { %5481 = vpow2.f32 %v3383_v3 }
0x185d   : > { %5483 = vpow2.f32 %v3381_v36 }
0x1862   : > { %v5478_v31 = vpop.eup %5477 }
0x1863   : > { %v5480_v38 = vpop.eup %5479  ;;  %v3388_v10 = vsel %vm673_vm0, %v5478_v31, 0.0 }
0x1864   : > { %3389 = vadd.xlane.f32.xlu1 %v3388_v10  ;;  %v3385_v50 = vsel %vm673_vm0, %v5480_v38, 0.0 }
0x1865   : > { %3386 = vadd.xlane.f32.xlu0 %v3385_v50 }
0x1866   : > { %v5482_v14 = vpop.eup %5481 }
0x1867   : > { %v5484_v23 = vpop.eup %5483  ;;  %v3394_v60 = vsel %vm673_vm0, %v5482_v14, 0.0 }
0x1868   : > { %3395 = vadd.xlane.f32.xlu1 %v3394_v60  ;;  %v3391_v35 = vsel %vm673_vm0, %v5484_v23, 0.0 }
0x1869   : > { %3392 = vadd.xlane.f32.xlu0 %v3391_v35 }
0x1879   : > { %5319 = vrot.lane.b32.xlu1 %v5318_v13, %s5614_s28 }
0x187d   : > { %3530 = vrot.lane.b32.xlu1 %v6614_v9, %s5614_s28 }
0x187f   : > { %5314 = vrot.lane.b32.xlu0 %v5313_v54, %s5614_s28 }
0x1881   : > { %3532 = vrot.lane.b32.xlu1 %v3216_v25, %s5614_s28 }
0x1883   : > { %3534 = vrot.lane.b32.xlu0 %v3217_v45, %s5614_s28 }
0x1885   : > { %3536 = vrot.lane.b32.xlu1 %v3218_v56, %s5614_s28 }
0x18f1   : > { %v3390_v40 = vpop.xlane.xlu1 %3389 }
0x18f2   : > { %5485 = vrcp.f32 %v3390_v40  ;;  %v3387_v41 = vpop.xlane.xlu0 %3386 }
0x18f3   : > { %5487 = vrcp.f32 %v3387_v41 }
0x18f5   : > { %v3396_v11 = vpop.xlane.xlu1 %3395 }
0x18f6   : > { %5489 = vrcp.f32 %v3396_v11  ;;  %v3393_v12 = vpop.xlane.xlu0 %3392 }
0x18f7   : > { %5491 = vrcp.f32 %v3393_v12  ;;  %v4428_v12 = vld [vmem:[%s6960_s14 + $0x1] ss:$0 sm:$0xff] }
0x18f9   : > { %v5320_v9 = vpop.permute.xlu1 %5319 }
0x18fa   : > { %v5315_v13 = vpop.permute.xlu0 %5314  ;;  %v5322_v54 = vunpack.i.h.bf16 %v5320_v9  ;;  %v5321_v25 = vunpack.i.l.bf16 %v5320_v9 }
0x18fb   : > { %v5317_v17 = vunpack.i.h.bf16 %v5315_v13  ;;  %v5316_v26 = vunpack.i.l.bf16 %v5315_v13 }
0x18fc   : > { %v5486_v46 = vpop.eup %5485  ;;  %v5196_v44 = vpack.c.bf16 %v5322_v54, %v5321_v25  ;;  %v3228_v25 = vadd.f32 %v4428_v12, %v6652_v24 }
0x18fd   : > { %v5488_v1 = vpop.eup %5487  ;;  %v5190_v42 = vpack.c.bf16 %v5317_v17, %v5316_v26  ;;  %v3400_v0 = vmul.f32 %v5486_v46, %v5478_v31  ;;  %v3531_v29 = vpop.permute.xlu1 %3530  ;;  %v3227_v17 = vadd.f32 %v4428_v12, %v6642_v21  ;;  %v3229_v26 = vadd.f32 %v4428_v12, %v6657_v48 }
0x18fe   : > { %v3398_v45 = vmul.f32 %v5488_v1, %v5480_v38  ;;  %v3535_v33 = vpop.permute.xlu0 %3534  ;;  %v4458_v21 = vmul.f32 -1.442695, %v3228_v25  ;;  %v3230_v48 = vadd.f32 %v4428_v12, %v6667_v32  ;;  %v4440_v12 = vld [vmem:[%s6961_s15 + $0xd8] sm:$0xff] }
0x18ff   : > { %5192 = vmatprep.subr.msk.bf16.mxu0 %vm6047_vm2, %v5190_v42  ;;  %v4457_v54 = vmul.f32 -1.442695, %v3227_v17 }
0x1900   : > { %v5490_v56 = vpop.eup %5489  ;;  %4892 = vmatprep.mubr.msk.f32.mxu0 %vm673_vm0, %v3398_v45  ;;  %v4459_v45 = vmul.f32 -1.442695, %v3229_v26  ;;  %v4460_v24 = vmul.f32 -1.442695, %v3230_v48 }
0x1901   : > { %v5492_v39 = vpop.eup %5491  ;;  %4893 = vmatmul.mubr.msk.f32.vlgmr.msra.gmra.mrb[40].mxu0 %vm673_vm0, %v3400_v0  ;;  %v3404_v16 = vmul.f32 %v5490_v56, %v5482_v14  ;;  %v3533_v27 = vpop.permute.xlu1 %3532 }
0x1902   : > { %5195 = vmatpush3.bf16.xpose.msk.msra.mxu0 %vm6047_vm2, %v5190_v42  ;;  %v3402_v49 = vmul.f32 %v5492_v39, %v5484_v23 }
0x1903   : > { %5198 = vmatprep.subr.msk.bf16.mxu0 %vm6047_vm2, %v5196_v44 }
0x1904   : > { %4895 = vmatprep.mubr.msk.f32.mxu0 %vm673_vm0, %v3402_v49 }
0x1905   : > { %4896 = vmatmul.mubr.msk.f32.gmra.mrb[42].mxu0 %vm673_vm0, %v3404_v16  ;;  %v3537_v18 = vpop.permute.xlu1 %3536 }
0x1906   : > { %4906 = vmatprep.mubr.msk.f32.mxu0 %vm1489_vm1, %v3531_v29 }
0x190a   : > { %5201 = vmatpush3.bf16.xpose.msk.msra.mxu0 %vm6047_vm2, %v5196_v44 }
0x1911   : > { %4907 = vmatmul.mubr.msk.f32.vlgmr.msra.gmra.mrb[44].mxu0 %vm1489_vm1, %v3533_v27 }
0x1912   : > { %4909 = vmatprep.mubr.msk.f32.mxu0 %vm1489_vm1, %v3535_v33 }
0x1915   : > { %4910 = vmatmul.mubr.msk.f32.gmra.mrb[46].mxu0 %vm1489_vm1, %v3537_v18 }
0x19d4   : > { %v6714_v53 = vpop.f32.mrb[40].mxu0 }
0x19d5   : > { %v6716_v34 = vpop.f32.mrb[41].mxu0 }
0x19d8   : > { %v6718_v55 = vpop.f32.mrb[42].mxu0 }
0x19d9   : > { %v6720_v7 = vpop.f32.mrb[43].mxu0 }
0x19e4   : > { %v4908_v20 = vpop.f32.mrb[44].mxu0 }
0x19e5   : > { %v3648_v37 = vsel %vm668_vm3, %v4908_v20, -1e+30  ;;  %v3628_v28 = vpop.f32.mrb[45].mxu0 }
0x19e6   : > { %v3654_v52 = vsel %vm673_vm0, %v3648_v37, -inf  ;;  %v3647_v3 = vsel %vm667_vm4, %v3628_v28, -1e+30 }
0x19e7   : > { %v3651_v36 = vsel %vm673_vm0, %v3647_v3, -inf  ;;  %3655 = vmax.xlane.f32.xlu1 %v3654_v52 }
0x19e8   : > { %3652 = vmax.xlane.f32.xlu0 %v3651_v36  ;;  %v4911_v31 = vpop.f32.mrb[46].mxu0 }
0x19e9   : > { %v3638_v38 = vpop.f32.mrb[47].mxu0  ;;  %v3650_v61 = vsel %vm670_vm5, %v4911_v31, -1e+30 }
0x19ea   : > { %v3649_v10 = vsel %vm669_vm6, %v3638_v38, -1e+30  ;;  %v3660_v14 = vsel %vm673_vm0, %v3650_v61, -inf }
0x19eb   : > { %v3657_v50 = vsel %vm673_vm0, %v3649_v10, -inf }
0x19ec   : > { %3658 = vmax.xlane.f32.xlu0 %v3657_v50 }
0x19f0   : > { %3661 = vmax.xlane.f32.xlu0 %v3660_v14 }
0x1a74   : > { %v3656_v62 = vpop.xlane.xlu1 %3655 }
0x1a75   : > { %v3664_v23 = vsub.f32 %v3648_v37, %v3656_v62  ;;  %v3653_v60 = vpop.xlane.xlu0 %3652  ;;  %v4437_v62 = vld [vmem:[%s6961_s15 + $0xc0] sm:$0xff] }
0x1a76   : > { %v3663_v35 = vsub.f32 %v3647_v3, %v3653_v60 }
0x1a77   : > { %v3669_v40 = vmul.f32 1.442695, %v3664_v23  ;;  %v4438_v23 = vld [vmem:[%s6961_s15 + $0xc8] sm:$0xff] }
0x1a78   : > { %v3667_v41 = vmul.f32 1.442695, %v3663_v35 }
0x1a79   : > { %5493 = vpow2.f32 %v3669_v40  ;;  %v3659_v11 = vpop.xlane.xlu0 %3658 }
0x1a7a   : > { %5495 = vpow2.f32 %v3667_v41  ;;  %v3665_v2 = vsub.f32 %v3649_v10, %v3659_v11  ;;  %v5210_v41 = vpack.c.bf16 %v4438_v23, %v4437_v62 }
0x1a7c   : > { %v3671_v63 = vmul.f32 1.442695, %v3665_v2  ;;  %v4439_v2 = vld [vmem:[%s6961_s15 + $0xd0] sm:$0xff] }
0x1a7d   : > { %v3662_v9 = vpop.xlane.xlu0 %3661 }
0x1a7e   : > { %5497 = vpow2.f32 %v3671_v63  ;;  %v3666_v13 = vsub.f32 %v3650_v61, %v3662_v9 }
0x1a80   : > { %v3673_v46 = vmul.f32 1.442695, %v3666_v13  ;;  %v5214_v13 = vpack.c.bf16 %v4440_v12, %v4439_v2 }
0x1a82   : > { %5499 = vpow2.f32 %v3673_v46  ;;  %v4441_v46 = vld [vmem:[%s6961_s15 + $0xe0] sm:$0xff] }
0x1a83   : > { %v6739_v1 = vpop.eup %5493  ;;  %5501 = vpow2.f32 %v4457_v54  ;;  %v4442_v54 = vld [vmem:[%s6961_s15 + $0xe8] sm:$0xff] }
0x1a84   : > { %v5496_v42 = vpop.eup %5495  ;;  %v3678_v0 = vsel %vm673_vm0, %v6739_v1, 0.0  ;;  %5503 = vpow2.f32 %v4459_v45  ;;  %v5218_v25 = vpack.c.bf16 %v4442_v54, %v4441_v46  ;;  %v4444_v45 = vld [vmem:[%s6961_s15 + $0xf8] sm:$0xff] }
0x1a85   : > { %3679 = vadd.xlane.f32.xlu1 %v3678_v0  ;;  %v3675_v56 = vsel %vm673_vm0, %v5496_v42, 0.0  ;;  %5505 = vpow2.f32 %v4458_v21  ;;  %v4430_v21 = vld [vmem:[%s6961_s15 + $0x88] sm:$0xff] }
0x1a86   : > { %3676 = vadd.xlane.f32.xlu0 %v3675_v56  ;;  %5507 = vpow2.f32 %v4460_v24  ;;  %v4429_v56 = vld [vmem:[%s6961_s15 + $0x80] sm:$0xff] }
0x1a87   : > { %v5226_v48 = vpack.c.bf16 %v4430_v21, %v4429_v56 }
0x1a88   : > { %v6746_v39 = vpop.eup %5497 }
0x1a89   : > { %v3681_v44 = vsel %vm673_vm0, %v6746_v39, 0.0 }
0x1a8a   : > { %3682 = vadd.xlane.f32.xlu0 %v3681_v44 }
0x1a8c   : > { %v6750_v49 = vpop.eup %5499 }
0x1a8d   : > { %v3684_v16 = vsel %vm673_vm0, %v6750_v49, 0.0  ;;  %v5502_v29 = vpop.eup %5501 }
0x1a8e   : > { %3685 = vadd.xlane.f32.xlu1 %v3684_v16  ;;  %v5504_v27 = vpop.eup %5503  ;;  %v3514_v33 = vadd.f32 1.0, %v5502_v29  ;;  %v4432_v16 = vld [vmem:[%s6961_s15 + $0x98] sm:$0xff] }
0x1a8f   : > { %v5506_v32 = vpop.eup %5505  ;;  %v3516_v18 = vadd.f32 1.0, %v5504_v27 }
0x1a90   : > { %5509 = vrcp.f32 %v3514_v33  ;;  %v3515_v20 = vadd.f32 1.0, %v5506_v32  ;;  %v5508_v37 = vpop.eup %5507 }
0x1a91   : > { %5511 = vrcp.f32 %v3516_v18  ;;  %v3517_v28 = vadd.f32 1.0, %v5508_v37  ;;  %v4434_v37 = vld [vmem:[%s6961_s15 + $0xa8] sm:$0xff] }
0x1a92   : > { %5513 = vrcp.f32 %v3515_v20  ;;  %v4433_v20 = vld [vmem:[%s6961_s15 + $0xa0] sm:$0xff] }
0x1a93   : > { %5515 = vrcp.f32 %v3517_v28 }
0x1a9a   : > { %v6762_v52 = vpop.eup %5509 }
0x1a9b   : > { %v6764_v3 = vpop.eup %5511 }
0x1a9c   : > { %v6770_v36 = vpop.eup %5513 }
0x1a9d   : > { %v6774_v47 = vpop.eup %5515 }
0x1a9f   : > { %5329 = vrot.lane.b32.xlu1 %v5328_v30, %s5614_s28 }
0x1aa0   : > { %5324 = vrot.lane.b32.xlu0 %v5323_v22, %s5614_s28 }
0x1aa3   : > { %3812 = vrot.lane.b32.xlu1 %v6762_v52, %s5614_s28 }
0x1aa4   : > { %3816 = vrot.lane.b32.xlu0 %v6764_v3, %s5614_s28 }
0x1aa7   : > { %3814 = vrot.lane.b32.xlu1 %v6770_v36, %s5614_s28 }
0x1aab   : > { %3818 = vrot.lane.b32.xlu1 %v6774_v47, %s5614_s28  ;;  %s649_s28 = scalar_lea.vmem [#allocation2], %s4278_s3  ;;  %s7021_s3 = sand.u32 1, %s7017_s22  }
0x1aac   : > { %s4212_s26 = sshll.u32 %s649_s28, 4  ;;  %s6905_s0 = scalar_lea.sflag [#allocation3], %s7021_s3  ;;  %s6900_s26 = int_to_ptr.vmem [resolvable:$true] %s4212_s26 }
0x1aad   : > { %s5549_s25 = scalar_lea.vmem %s6900_s26, 512  ;;  %p5556_p0 = scmp.lt.s32.totalorder %s6900_s26, %s5554_s21 }
0x1aae   : > { %p5550_p11 = scmp.ne.s32.totalorder %s6900_s26, %s5549_s25  ;;  %p5557_p1 = scmp.lt.s32.totalorder %s5555_s30, %s5549_s25 }
0x1ab0   : > { %p5551_p12 = pnand %p5550_p11, %p5766_p5  ;;  %p5558_p2 = por %p5557_p1, %p5556_p0 }
0x1ab2   : > { %p5552_p13 = pneg %p5551_p12 }
0x1ab4   : > { %p5559_p3 = pnand %p5558_p2, %p5552_p13 }
0x1b12   : > { %v3680_v59 = vpop.xlane.xlu1 %3679 }
0x1b13   : > { %v3677_v15 = vpop.xlane.xlu0 %3676 }
0x1b14   : > { %5517 = vrcp.f32 %v3677_v15 }
0x1b15   : > { %5519 = vrcp.f32 %v3680_v59 }
0x1b17   : > { %v3683_v22 = vpop.xlane.xlu0 %3682 }
0x1b18   : > { %5521 = vrcp.f32 %v3683_v22 }
0x1b1b   : > { %v3686_v57 = vpop.xlane.xlu1 %3685  ;;  %v5325_v30 = vpop.permute.xlu0 %5324 }
0x1b1c   : > { %v5327_v31 = vunpack.i.h.bf16 %v5325_v30  ;;  %v5326_v38 = vunpack.i.l.bf16 %v5325_v30  ;;  %5523 = vrcp.f32 %v3686_v57  ;;  %v5234_v30 = vpack.c.bf16 %v4434_v37, %v4433_v20 }
0x1b1e   : > { %v5518_v10 = vpop.eup %5517  ;;  %v5202_v50 = vpack.c.bf16 %v5327_v31, %v5326_v38  ;;  %v3526_v31 = vmul.f32 %v6762_v52, %v6716_v34  ;;  %v4435_v38 = vld [vmem:[%s6961_s15 + $0xb0] sm:$0xff]  ;;  %v3527_v34 = vmul.f32 %v6770_v36, %v6714_v53  ;;  %v3528_v52 = vmul.f32 %v6764_v3, %v6720_v7 }
0x1b1f   : > { %v5330_v61 = vpop.permute.xlu1 %5329  ;;  %v3688_v14 = vmul.f32 %v5518_v10, %v5496_v42  ;;  %v5520_v11 = vpop.eup %5519  ;;  %v4443_v42 = vld [vmem:[%s6961_s15 + $0xf0] sm:$0xff]  ;;  %v4436_v10 = vld [vmem:[%s6961_s15 + $0xb8] sm:$0xff] }
0x1b20   : > { %v5332_v60 = vunpack.i.h.bf16 %v5330_v61  ;;  %v5331_v35 = vunpack.i.l.bf16 %v5330_v61  ;;  %5203 = vmatprep.subr.bf16.mxu1 %v5202_v50  ;;  %v3690_v9 = vmul.f32 %v5520_v11, %v6739_v1  ;;  %v5222_v0 = vpack.c.bf16 %v4444_v45, %v4443_v42  ;;  %v3817_v28 = vpop.permute.xlu0 %3816 }
0x1b21   : > { %5205 = vmatpush3.bf16.msra.mxu1 %v5202_v50  ;;  %4920 = vmatprep.mubr.msk.f32.mxu1 %vm673_vm0, %v3688_v14  ;;  %v5238_v50 = vpack.c.bf16 %v4436_v10, %v4435_v38  ;;  %v3529_v61 = vmul.f32 %v6774_v47, %v6718_v55  ;;  %v4482_v14 = vld [vmem:[%s6962_s16 + $0x1] ss:$0 sm:$0xff] }
0x1b22   : > { %v5206_v40 = vpack.c.bf16 %v5332_v60, %v5331_v35  ;;  %v5522_v63 = vpop.eup %5521 }
0x1b23   : > { %v3692_v26 = vmul.f32 %v5522_v63, %v6746_v39  ;;  %v3813_v39 = vpop.permute.xlu1 %3812 }
0x1b24   : > { %5207 = vmatprep.subr.bf16.mxu1 %v5206_v40 }
0x1b25   : > { %5209 = vmatpush3.bf16.msra.mxu1 %v5206_v40 }
0x1b26   : > { %5211 = vmatprep.subr.bf16.mxu1 %v5210_v41  ;;  %v5524_v17 = vpop.eup %5523 }
0x1b27   : > { %v3694_v1 = vmul.f32 %v5524_v17, %v6750_v49  ;;  %v3815_v44 = vpop.permute.xlu1 %3814  ;;  %v4431_v49 = vld [vmem:[%s6961_s15 + $0x90] sm:$0xff] }
0x1b28   : > { %4921 = vmatmul.mubr.msk.f32.vlgmr.msra.gmra.mrb[48].mxu1 %vm673_vm0, %v3690_v9  ;;  %v5230_v32 = vpack.c.bf16 %v4432_v16, %v4431_v49 }
0x1b29   : > { %4923 = vmatprep.mubr.msk.f32.mxu1 %vm673_vm0, %v3692_v26  ;;  %5213 = vmatpush3.bf16.msra.mxu1 %v5210_v41 }
0x1b2a   : > { %5215 = vmatprep.subr.bf16.mxu1 %v5214_v13 }
0x1b2b   : > { %v3819_v59 = vpop.permute.xlu1 %3818 }
0x1b2c   : > { %4924 = vmatmul.mubr.msk.f32.gmra.mrb[50].mxu1 %vm673_vm0, %v3694_v1 }
0x1b2d   : > { %5217 = vmatpush3.bf16.msra.mxu1 %v5214_v13 }
0x1b2e   : > { %5219 = vmatprep.subr.bf16.mxu1 %v5218_v25 }
0x1b31   : > { %5221 = vmatpush3.bf16.msra.mxu1 %v5218_v25 }
0x1b32   : > { %5223 = vmatprep.subr.bf16.mxu1 %v5222_v0 }
0x1b35   : > { %5225 = vmatpush3.bf16.msra.mxu1 %v5222_v0 }
0x1b36   : > { %5227 = vmatprep.subr.bf16.mxu1 %v5226_v48 }
0x1bfb   : > { %v4922_v24 = vpop.f32.mrb[48].mxu1 }
0x1bfc   : > { %v3789_v29 = vpop.f32.mrb[49].mxu1  ;;  %v3825_v33 = vmul.f32 %v4922_v24, %v3815_v44 }
0x1bfd   : > { %v3824_v27 = vmul.f32 %v3813_v39, %v3789_v29 }
0x1bff   : > { %v4925_v18 = vpop.f32.mrb[50].mxu1  ;;  %4942 = vmatprep.mubr.msk.f32.mxu1 %vm1489_vm1, %v3824_v27 }
0x1c00   : > { %v3799_v15 = vpop.f32.mrb[51].mxu1  ;;  %4943 = vmatmul.mubr.msk.f32.vlgmr.msra.gmra.mrb[52].mxu1 %vm1489_vm1, %v3825_v33  ;;  %v3827_v57 = vmul.f32 %v4925_v18, %v3819_v59 }
0x1c01   : > { %v3826_v22 = vmul.f32 %v3817_v28, %v3799_v15  ;;  %5229 = vmatpush3.bf16.msra.mxu1 %v5226_v48 }
0x1c02   : > { %5231 = vmatprep.subr.bf16.mxu1 %v5230_v32 }
0x1c03   : > { %4945 = vmatprep.mubr.msk.f32.mxu1 %vm1489_vm1, %v3826_v22  ;;  %v4485_v22 = vld [vmem:[%s6963_s17 + $0x1] ss:$0 sm:$0xff] }
0x1c04   : > { %4946 = vmatmul.mubr.msk.f32.gmra.mrb[54].mxu1 %vm1489_vm1, %v3827_v57 }
0x1c05   : > { %5233 = vmatpush3.bf16.msra.mxu1 %v5230_v32  ;;  %4964 = vmatprep.mubr.msk.f32.mxu1 %vm1489_vm1, %v3526_v31  ;;  %v4486_v31 = vld [vmem:[%s6964_s18 + $0x1] ss:$0 sm:$0xff] }
0x1c06   : > { %5235 = vmatprep.subr.bf16.mxu1 %v5234_v30 }
0x1c09   : > { %5237 = vmatpush3.bf16.msra.mxu1 %v5234_v30 }
0x1c0a   : > { %5239 = vmatprep.subr.bf16.mxu1 %v5238_v50 }
0x1c0d   : > { %5241 = vmatpush3.bf16.msra.mxu1 %v5238_v50 }
0x1c10   : > { %4965 = vmatmul.mubr.msk.f32.vlgmr.msra.gmra.mrb[52].mxu1 %vm1489_vm1, %v3527_v34 }
0x1c11   : > { %4967 = vmatprep.mubr.msk.f32.mxu1 %vm1489_vm1, %v3528_v52 }
0x1c14   : > { %4968 = vmatmul.mubr.msk.f32.gmra.mrb[54].mxu1 %vm1489_vm1, %v3529_v61 }
0x1ce3   : > { %v4966_v62 = vpop.f32.mrb[52].mxu1 }
0x1ce4   : > { %v4031_v23 = vadd.f32 %v4966_v62, %v4482_v14  ;;  %v4003_v60 = vpop.f32.mrb[53].mxu1 }
0x1ce5   : > { %v4030_v53 = vadd.f32 %v4482_v14, %v4003_v60 }
0x1ce6   : > { %v4035_v36 = vadd.f32 %v4031_v23, %v6587_v51 }
0x1ce7   : > { %v4034_v7 = vadd.f32 %v4030_v53, %v6576_v4  ;;  %v4969_v3 = vpop.f32.mrb[54].mxu1 }
0x1ce8   : > { %v4013_v35 = vpop.f32.mrb[55].mxu1  ;;  %v4045_v40 = vsel %vm673_vm0, %v4035_v36, 0.0  ;;  %v4033_v41 = vadd.f32 %v4969_v3, %v4482_v14 }
0x1ce9   : > { %v4032_v55 = vadd.f32 %v4482_v14, %v4013_v35  ;;  %4046 = vadd.xlane.f32.xlu1 %v4045_v40  ;;  %v4042_v47 = vsel %vm673_vm0, %v4034_v7, 0.0 }
0x1cea   : > { %4043 = vadd.xlane.f32.xlu0 %v4042_v47  ;;  %v4037_v2 = vadd.f32 %v4033_v41, %v6598_v8 }
0x1ceb   : > { %v4036_v11 = vadd.f32 %v4032_v55, %v6593_v5 }
0x1cec   : > { %v4051_v51 = vsel %vm673_vm0, %v4037_v2, 0.0 }
0x1ced   : > { %v4048_v12 = vsel %vm673_vm0, %v4036_v11, 0.0 }
0x1cee   : > { %4049 = vadd.xlane.f32.xlu0 %v4048_v12 }
0x1cf2   : > { %4052 = vadd.xlane.f32.xlu0 %v4051_v51 }
0x1d76   : > { %v4047_v4 = vpop.xlane.xlu1 %4046 }
0x1d77   : > { %v4055_v63 = vmul.f32 0.03125, %v4047_v4  ;;  %v4044_v9 = vpop.xlane.xlu0 %4043 }
0x1d78   : > { %v4054_v13 = vmul.f32 0.03125, %v4044_v9 }
0x1d79   : > { %v4059_v17 = vsub.f32 %v4035_v36, %v4055_v63 }
0x1d7a   : > { %v4058_v26 = vsub.f32 %v4034_v7, %v4054_v13 }
0x1d7b   : > { %v4050_v46 = vpop.xlane.xlu0 %4049  ;;  %v4063_v54 = vmul.f32 %v4059_v17, %v4059_v17 }
0x1d7c   : > { %v4056_v1 = vmul.f32 0.03125, %v4050_v46  ;;  %v4062_v25 = vmul.f32 %v4058_v26, %v4058_v26 }
0x1d7d   : > { %v4069_v5 = vsel %vm673_vm0, %v4063_v54, 0.0 }
0x1d7e   : > { %v4060_v42 = vsub.f32 %v4036_v11, %v4056_v1  ;;  %4070 = vadd.xlane.f32.xlu1 %v4069_v5  ;;  %v4066_v8 = vsel %vm673_vm0, %v4062_v25, 0.0 }
0x1d7f   : > { %4067 = vadd.xlane.f32.xlu0 %v4066_v8  ;;  %v4053_v45 = vpop.xlane.xlu0 %4052 }
0x1d80   : > { %v4057_v0 = vmul.f32 0.03125, %v4053_v45  ;;  %v4064_v56 = vmul.f32 %v4060_v42, %v4060_v42 }
0x1d82   : > { %v4061_v21 = vsub.f32 %v4037_v2, %v4057_v0  ;;  %v4072_v48 = vsel %vm673_vm0, %v4064_v56, 0.0 }
0x1d83   : > { %4073 = vadd.xlane.f32.xlu0 %v4072_v48 }
0x1d84   : > { %v4065_v39 = vmul.f32 %v4061_v21, %v4061_v21 }
0x1d86   : > { %v4075_v44 = vsel %vm673_vm0, %v4065_v39, 0.0 }
0x1d87   : > { %4076 = vadd.xlane.f32.xlu1 %v4075_v44 }
0x1e0b   : > { %v4071_v24 = vpop.xlane.xlu1 %4070 }
0x1e0c   : > { %v4079_v49 = vmul.f32 0.03125, %v4071_v24  ;;  %v4068_v16 = vpop.xlane.xlu0 %4067 }
0x1e0d   : > { %v4078_v29 = vmul.f32 0.03125, %v4068_v16 }
0x1e0e   : > { %v4083_v27 = vadd.f32 1e-05, %v4079_v49 }
0x1e0f   : > { %v4082_v33 = vadd.f32 1e-05, %v4078_v29 }
0x1e10   : > { %5525 = vrsqrt.f32 %v4083_v27  ;;  %v4074_v32 = vpop.xlane.xlu0 %4073 }
0x1e11   : > { %5527 = vrsqrt.f32 %v4082_v33  ;;  %v4080_v18 = vmul.f32 0.03125, %v4074_v32 }
0x1e13   : > { %v4084_v20 = vadd.f32 1e-05, %v4080_v18  ;;  %v4489_v18 = vld [vmem:[%s6965_s19 + $0x1] ss:$0 sm:$0xff] }
0x1e14   : > { %v4077_v37 = vpop.xlane.xlu1 %4076 }
0x1e15   : > { %5529 = vrsqrt.f32 %v4084_v20  ;;  %v4081_v28 = vmul.f32 0.03125, %v4077_v37 }
0x1e17   : > { %v4085_v15 = vadd.f32 1e-05, %v4081_v28  ;;  %v4490_v28 = vld [vmem:[%s6966_s20 + $0x1] ss:$0 sm:$0xff] }
0x1e19   : > { %5531 = vrsqrt.f32 %v4085_v15 }
0x1e1a   : > { %v5526_v59 = vpop.eup %5525 }
0x1e1b   : > { %v5528_v57 = vpop.eup %5527  ;;  %v4091_v30 = vmul.f32 %v5526_v59, %v4059_v17 }
0x1e1c   : > { %v4090_v38 = vmul.f32 %v5528_v57, %v4058_v26 }
0x1e1d   : > { %v4101_v10 = vmul.f32 %v4485_v22, %v4091_v30 }
0x1e1e   : > { %v4100_v50 = vmul.f32 %v4485_v22, %v4090_v38 }
0x1e1f   : > { %v5530_v34 = vpop.eup %5529  ;;  %v4111_v52 = vadd.f32 %v4486_v31, %v4101_v10 }
0x1e20   : > { %v4110_v61 = vadd.f32 %v4486_v31, %v4100_v50  ;;  %v4092_v14 = vmul.f32 %v5530_v34, %v4060_v42 }
0x1e21   : > { %v4115_v62 = vadd.f32 %v4111_v52, %v6355_v6 }
0x1e22   : > { %v4114_v23 = vadd.f32 %v4110_v61, %v6357_v19  ;;  %v4102_v60 = vmul.f32 %v4485_v22, %v4092_v14 }
0x1e23   : > { %v5532_v53 = vpop.eup %5531  ;;  %v4125_v36 = vsel %vm673_vm0, %v4115_v62, 0.0 }
0x1e24   : > { %4126 = vadd.xlane.f32.xlu1 %v4125_v36  ;;  %v4122_v7 = vsel %vm673_vm0, %v4114_v23, 0.0  ;;  %v4112_v3 = vadd.f32 %v4486_v31, %v4102_v60  ;;  %v4093_v35 = vmul.f32 %v5532_v53, %v4061_v21 }
0x1e25   : > { %4123 = vadd.xlane.f32.xlu0 %v4122_v7 }
0x1e26   : > { %v4116_v40 = vadd.f32 %v4112_v3, %v6363_v43  ;;  %v4103_v41 = vmul.f32 %v4485_v22, %v4093_v35 }
0x1e28   : > { %v4128_v55 = vsel %vm673_vm0, %v4116_v40, 0.0  ;;  %v4113_v47 = vadd.f32 %v4486_v31, %v4103_v41 }
0x1e29   : > { %4129 = vadd.xlane.f32.xlu0 %v4128_v55 }
0x1e2a   : > { %v4117_v6 = vadd.f32 %v4113_v47, %v6367_v58 }
0x1e2c   : > { %v4131_v19 = vsel %vm673_vm0, %v4117_v6, 0.0 }
0x1e2d   : > { %4132 = vadd.xlane.f32.xlu1 %v4131_v19 }
0x1eb1   : > { %v4127_v11 = vpop.xlane.xlu1 %4126 }
0x1eb2   : > { %v4135_v2 = vmul.f32 0.03125, %v4127_v11  ;;  %v4124_v12 = vpop.xlane.xlu0 %4123 }
0x1eb3   : > { %v4134_v51 = vmul.f32 0.03125, %v4124_v12 }
0x1eb4   : > { %v4139_v4 = vsub.f32 %v4115_v62, %v4135_v2 }
0x1eb5   : > { %v4138_v63 = vsub.f32 %v4114_v23, %v4134_v51 }
0x1eb6   : > { %v4130_v9 = vpop.xlane.xlu0 %4129  ;;  %v4143_v13 = vmul.f32 %v4139_v4, %v4139_v4 }
0x1eb7   : > { %v4136_v17 = vmul.f32 0.03125, %v4130_v9  ;;  %v4142_v43 = vmul.f32 %v4138_v63, %v4138_v63 }
0x1eb8   : > { %v4149_v26 = vsel %vm673_vm0, %v4143_v13, 0.0 }
0x1eb9   : > { %v4140_v46 = vsub.f32 %v4116_v40, %v4136_v17  ;;  %4150 = vadd.xlane.f32.xlu1 %v4149_v26  ;;  %v4146_v54 = vsel %vm673_vm0, %v4142_v43, 0.0 }
0x1eba   : > { %v4133_v58 = vpop.xlane.xlu1 %4132  ;;  %4147 = vadd.xlane.f32.xlu0 %v4146_v54 }
0x1ebb   : > { %v4137_v1 = vmul.f32 0.03125, %v4133_v58  ;;  %v4144_v25 = vmul.f32 %v4140_v46, %v4140_v46 }
0x1ebd   : > { %v4141_v5 = vsub.f32 %v4117_v6, %v4137_v1  ;;  %v4152_v42 = vsel %vm673_vm0, %v4144_v25, 0.0 }
0x1ebe   : > { %4153 = vadd.xlane.f32.xlu0 %v4152_v42 }
0x1ebf   : > { %v4145_v8 = vmul.f32 %v4141_v5, %v4141_v5 }
0x1ec1   : > { %v4155_v45 = vsel %vm673_vm0, %v4145_v8, 0.0 }
0x1ec2   : > { %4156 = vadd.xlane.f32.xlu1 %v4155_v45 }
0x1f46   : > { %v4151_v0 = vpop.xlane.xlu1 %4150 }
0x1f47   : > { %v4159_v56 = vmul.f32 0.03125, %v4151_v0  ;;  %v4148_v21 = vpop.xlane.xlu0 %4147 }
0x1f48   : > { %v4158_v48 = vmul.f32 0.03125, %v4148_v21 }
0x1f49   : > { %v4163_v39 = vadd.f32 1e-05, %v4159_v56 }
0x1f4a   : > { %v4162_v44 = vadd.f32 1e-05, %v4158_v48 }
0x1f4b   : > { %5533 = vrsqrt.f32 %v4163_v39  ;;  %v4154_v24 = vpop.xlane.xlu0 %4153 }
0x1f4c   : > { %5535 = vrsqrt.f32 %v4162_v44  ;;  %v4160_v49 = vmul.f32 0.03125, %v4154_v24 }
0x1f4e   : > { %v4164_v16 = vadd.f32 1e-05, %v4160_v49 }
0x1f4f   : > { %v4157_v29 = vpop.xlane.xlu1 %4156 }
0x1f50   : > { %5537 = vrsqrt.f32 %v4164_v16  ;;  %v4161_v27 = vmul.f32 0.03125, %v4157_v29 }
0x1f52   : > { %v4165_v33 = vadd.f32 1e-05, %v4161_v27 }
0x1f54   : > { %5539 = vrsqrt.f32 %v4165_v33 }
0x1f55   : > { %v5534_v32 = vpop.eup %5533 }
0x1f56   : > { %v5536_v20 = vpop.eup %5535  ;;  %v4171_v37 = vmul.f32 %v5534_v32, %v4139_v4 }
0x1f57   : > { %v4170_v15 = vmul.f32 %v5536_v20, %v4138_v63 }
0x1f58   : > { %v4181_v59 = vmul.f32 %v4489_v18, %v4171_v37 }
0x1f59   : > { %v4180_v22 = vmul.f32 %v4489_v18, %v4170_v15 }
0x1f5a   : > { %v5538_v57 = vpop.eup %5537  ;;  %v4191_v30 = vadd.f32 %v4490_v28, %v4181_v59 }
0x1f5b   : > { %v4190_v31 = vadd.f32 %v4490_v28, %v4180_v22  ;;  %v4172_v38 = vmul.f32 %v5538_v57, %v4140_v46 }
0x1f5c   : > { %4195 = vst.msk [vmem:[%s649_s28 + $0x8] sm:$0xff] %vm673_vm0, %v4191_v30 }
0x1f5d   : > { %v4182_v10 = vmul.f32 %v4489_v18, %v4172_v38  ;;  %4194 = vst.msk [vmem:[%s649_s28] sm:$0xff] %vm673_vm0, %v4190_v31 }
0x1f5e   : > { %v5540_v50 = vpop.eup %5539 }
0x1f5f   : > { %v4192_v34 = vadd.f32 %v4490_v28, %v4182_v10  ;;  %v4173_v52 = vmul.f32 %v5540_v50, %v4141_v5 }
0x1f61   : > { %v4183_v61 = vmul.f32 %v4489_v18, %v4173_v52  ;;  %4196 = vst.msk [vmem:[%s649_s28 + $0x10] sm:$0xff] %vm673_vm0, %v4192_v34 }
0x1f63   : > { %v4193_v14 = vadd.f32 %v4490_v28, %v4183_v61 }
0x1f65   : > { %4197 = vst.msk [vmem:[%s649_s28 + $0x18] sm:$0xff] %vm673_vm0, %v4193_v14 }
0x1f66   : > { %5562 = shalt.err (!%p5559_p3)
}
0x1f67   : > { %s5563_s22 = scalar_lea.hbm %s6898_s1, 512  ;;  %s5567_s5 = scalar_lea.hbm %s7020_s4, 1024 }
0x1f68   : > { %p5564_p4 = scmp.ne.s32.totalorder %s6898_s1, %s5563_s22  ;;  %p5568_p9 = scmp.lt.u32.totalorder %s6898_s1, %s7020_s4 }
0x1f69   : > { %p5569_p10 = scmp.lt.u32.totalorder %s5567_s5, %s5563_s22  ;;  %p5571_p12 = scmp.lt.u32.totalorder %s5563_s22, %s6898_s1 }
0x1f6a   : > { %p5565_p7 = pnand %p5564_p4, %p5766_p5 }
0x1f6b   : > { %p5570_p11 = por %p5569_p10, %p5568_p9 }
0x1f6c   : > { %p5566_p8 = pneg %p5565_p7 }
0x1f6d   : > { %p5572_p13 = por %p5571_p12, %p5570_p11 }
0x1f6f   : > { %p5573_p0 = pnand %p5572_p13, %p5566_p8 }
0x1f71   : > { %5576 = shalt.err (!%p5573_p0)
}
0x1f72   : > { %s5616_s25 = smov 128   ;;  %s5617_s30 = smov 8  }
0x1f73   : > { %5250 = dma.vmem_to_hbm [thread:$0]  (%p5766_p5), %s6900_s26, 512, %s6898_s1, %s6905_s0, %s5616_s25, %s5616_s25, %s5617_s30  }
0x1f74 PF: > { %s7022_s28 = sld [smem:[#allocation8_spill]]  ;;  %s7023_s2 = sld [smem:[#allocation5_spill]] }
0x1f7a   : > { %p5256_p1 = scmp.ge.s32.totalorder %s7022_s28, 2  ;;  %s4227_s3 = sand.u32 1, %s7023_s2  }
0x1f7b   : > { %s4228_s22 = scalar_lea.sflag [#allocation3], %s4227_s3 }
0x1f7c   : > { %p5253_p2 = pnand %p5256_p1, %p5770_p6 }
0x1f7e   : > { %5594 = dma.done.wait (!%p5253_p2), %s4228_s22, 512  }
0x1f7f   : > { %5596 = vsyncadd (!%p5253_p2), %s4228_s22, 4294966784  ;;  %s7025_s27 = sld [smem:[#allocation10_spill]]  ;;  %s7026_s2 = sld [smem:[#allocation6_spill]] }
0x1f80   : > { %s7027_s25 = sld [smem:[#allocation7_spill]]  ;;  %s7028_s26 = sld [smem:[#allocation11_spill]] }
0x1f85   : > { %p31_p3 = scmp.ge.s32.totalorder %s7025_s27, 4  }
0x1f87   :  { %33 = sbr.rel (!%p31_p3) target bundleno = 12 (0xc), region = 157 }
0x1f8e   :  { %4233 = vsyncpa [#allocation3], 1 }
0x1f8f   :  { %4235 = vsyncpa [#allocation3 + $0x1], 1 }

</bundles_post_ra>
